<compile_context>
chip_gen: v7x
topology: tpu7x:2x2x1
jax: 0.10.0
libtpu: 0.0.40
codegen_flags: <defaults>
</compile_context>

<pallas_src>
import functools
import math

import jax
import jax.numpy as jnp
from jax import lax
from jax.experimental import pallas as pl
from jax.experimental.pallas import tpu as pltpu  # noqa: F401  (kept for TPU-specific tuning hooks)

LN_EPS = 1e-5  # nn.LayerNorm default


def _layernorm(x, w, b):
    mu = jnp.mean(x, axis=-1, keepdims=True)
    var = jnp.mean((x - mu) ** 2, axis=-1, keepdims=True)
    return (x - mu) * lax.rsqrt(var + LN_EPS) * w + b


# ---------------------------------------------------------------- kernel -----

def vit_encoder_kernel(p_ref, pw_ref, posb_ref,
                       ln1w_ref, ln1b_ref, wqkv_ref, wproj_ref, bproj_ref,
                       ln2w_ref, ln2b_ref, w1_ref, b1_ref, w2_ref, b2_ref,
                       nw_ref, nb_ref, o_ref, *, B, N, depth, num_heads, pack):
    D = pw_ref.shape[1]
    nh = num_heads
    hd = D // nh
    scale = 1.0 / math.sqrt(hd)
    inv_sqrt2 = 1.0 / math.sqrt(2.0)
    BN = B * N

    # Patch embedding: one im2col matmul over the whole batch.  Conv bias and
    # pos_embed[:, 1:, :] were pre-summed on the host into posb (both constants).
    patches = p_ref[...].astype(jnp.float32).reshape(BN, p_ref.shape[-1])      # (BN, K)
    x = jnp.dot(patches, pw_ref[...], preferred_element_type=jnp.float32)      # (BN, D)
    x = (x.reshape(B, N, D) + posb_ref[...]).reshape(BN, D)

    # Per-head lane masks, built once and hoisted out of the layer loop.
    lane = lax.broadcasted_iota(jnp.int32, (1, D), 1)
    head_masks = [jnp.where((lane >= h * hd) & (lane < (h + 1) * hd),
                            1.0, 0.0).astype(jnp.float32) for h in range(nh)]

    # depth is small -> static unroll keeps weight indexing static.
    # TODO(synk): for deep models switch to lax.fori_loop + a depth grid axis.
    for l in range(depth):
        # ----------------- attention (pre-norm) -----------------
        xn = _layernorm(x, ln1w_ref[l], ln1b_ref[l])                           # (BN, D)
        qkv = jnp.dot(xn, wqkv_ref[l], preferred_element_type=jnp.float32)     # (BN, 3D)
        q = qkv[:, :D].reshape(B, N, D)
        k = qkv[:, D:2 * D].reshape(B, N, D)
        v = qkv[:, 2 * D:].reshape(B, N, D)

        # Per-head scores without any head-split relayout: masking q to head
        # h's lanes restricts the (full-D) contraction to that head.
        s = jnp.stack(
            [lax.dot_general(q * head_masks[h], k, (((2,), (2,)), ((0,), (0,))),
                             preferred_element_type=jnp.float32)
             for h in range(nh)], axis=0) * scale                              # (nh, B, N, N)
        # single softmax for all heads (exact divide)
        s = s - jnp.max(s, axis=-1, keepdims=True)
        e = jnp.exp(s)
        p_attn = e / jnp.sum(e, axis=-1, keepdims=True)                        # (nh, B, N, N)

        # P_h (v ⊙ m_h) lands head h's output in its own lane block, so the
        # sum over heads is already the concatenated-head context.
        ctx = jnp.zeros_like(q)                                                # (B, N, D)
        for h in range(nh):
            ctx = ctx + lax.dot_general(p_attn[h], v * head_masks[h],
                                        (((2,), (1,)), ((0,), (0,))),
                                        preferred_element_type=jnp.float32)
        ctx = ctx.reshape(BN, D)
        # single output-projection matmul
        x = x + jnp.dot(ctx, wproj_ref[l],
                        preferred_element_type=jnp.float32) + bproj_ref[l]

        # ----------------- MLP (pre-norm) -----------------
        xn2 = _layernorm(x, ln2w_ref[l], ln2b_ref[l])
        h1 = jnp.dot(xn2, w1_ref[l], preferred_element_type=jnp.float32) + b1_ref[l]
        h1 = 0.5 * h1 * (1.0 + lax.erf(h1 * inv_sqrt2))        # exact GELU
        x = x + jnp.dot(h1, w2_ref[l], preferred_element_type=jnp.float32) + b2_ref[l]

    # final LayerNorm; head = Identity (num_classes == 0)
    x = _layernorm(x, nw_ref[...], nb_ref[...])                                # (BN, D)

    # Lane-dense store: contiguous 8-row blocks of x go side-by-side into the
    # (rows, pack*D) output slab (128-lane dense stores + dense DMA); the
    # wrapper undoes this with a free reshape/transpose.  pack == 1 degenerates
    # to a single full-tile store.
    rows = o_ref.shape[0]
    for j in range(pack):
        o_ref[:, j * D:(j + 1) * D] = x[j * rows:(j + 1) * rows].astype(o_ref.dtype)


# ---------------------------------------------------------- pallas wrapper ---

def vit_encoder_call(patches, params, *, depth, num_heads):
    B, N, K = patches.shape
    D = params['patch_w'].shape[1]
    # conv bias + pos_embed[:, 1:, :] pre-summed on the host (both constants)
    posb = params['pos'][:, 1:, :] + params['patch_b']                         # (1, N, D)

    # lane-dense output packing factor (fallback to 1 if shapes don't divide)
    pack = 1
    if D <= 128 and 128 % D == 0:
        cand = 128 // D
        if (B * N) % cand == 0 and ((B * N) // cand) % 8 == 0:
            pack = cand
    rows = (B * N) // pack

    weights = [params['patch_w'], posb,
               params['ln1_w'], params['ln1_b'], params['w_qkv'],
               params['w_proj'], params['b_proj'],
               params['ln2_w'], params['ln2_b'],
               params['w_fc1'], params['b_fc1'], params['w_fc2'], params['b_fc2'],
               params['norm_w'], params['norm_b']]

    # Whole batch in ONE kernel invocation (no grid): removes per-grid-step
    # pipeline overhead and doubles sublane occupancy vs grid=(B,) on
    # single-TensorCore chips.  All inputs/weights (< 1 MiB here) are placed
    # whole-array in VMEM by the default BlockSpecs.
    out = pl.pallas_call(
        functools.partial(vit_encoder_kernel, B=B, N=N, depth=depth,
                          num_heads=num_heads, pack=pack),
        out_shape=jax.ShapeDtypeStruct((rows, pack * D), jnp.float32),
    )(patches, *weights)

    if pack > 1:
        # invert the lane-dense packing: out[i, j*D:(j+1)*D] == x[j*rows + i]
        out = out.reshape(rows, pack, D).transpose(1, 0, 2)
    return out.reshape(B, N, D)


# ----------------------------------------------------------------- model -----

def init_params(key, *, in_chans, patch, embed_dim, depth, mlp_ratio,
                num_patches, num_heads):
    D = embed_dim
    K = in_chans * patch * patch
    Hm = int(D * mlp_ratio)
    keys = list(jax.random.split(key, 2 + 4 * depth))
    it = iter(keys)

    def xavier(k, fan_in, fan_out):
        bound = math.sqrt(6.0 / (fan_in + fan_out))
        return jax.random.uniform(k, (fan_in, fan_out), jnp.float32, -bound, bound)

    params = {}
    conv_bound = 1.0 / math.sqrt(K)  # conv default init (synthetic, deterministic)
    params['patch_w'] = jax.random.uniform(next(it), (K, D), jnp.float32,
                                           -conv_bound, conv_bound)
    params['patch_b'] = jnp.zeros((1, D), jnp.float32)
    # learnable pos_embed (1, num_patches + 1, D), trunc_normal std=0.02 (clipped)
    params['pos'] = jnp.clip(
        0.02 * jax.random.normal(next(it), (1, num_patches + 1, D), jnp.float32),
        -0.02, 0.02)
    params['norm_w'] = jnp.ones((1, D), jnp.float32)
    params['norm_b'] = jnp.zeros((1, D), jnp.float32)

    wqkv, wproj, wfc1, wfc2 = [], [], [], []
    for _ in range(depth):
        wqkv.append(xavier(next(it), D, 3 * D))   # qkv_bias=False
        wproj.append(xavier(next(it), D, D))
        wfc1.append(xavier(next(it), D, Hm))
        wfc2.append(xavier(next(it), Hm, D))
    params['w_qkv'] = jnp.stack(wqkv)                 # (depth, D, 3D)
    params['w_proj'] = jnp.stack(wproj)               # (depth, D, D)
    params['b_proj'] = jnp.zeros((depth, D), jnp.float32)
    params['ln1_w'] = jnp.ones((depth, D), jnp.float32)
    params['ln1_b'] = jnp.zeros((depth, D), jnp.float32)
    params['ln2_w'] = jnp.ones((depth, D), jnp.float32)
    params['ln2_b'] = jnp.zeros((depth, D), jnp.float32)
    params['w_fc1'] = jnp.stack(wfc1)                 # (depth, D, Hm)
    params['b_fc1'] = jnp.zeros((depth, Hm), jnp.float32)
    params['w_fc2'] = jnp.stack(wfc2)                 # (depth, Hm, D)
    params['b_fc2'] = jnp.zeros((depth, D), jnp.float32)
    return params


def vit_encoder_forward(x, params, *, patch, depth, num_heads):
    # x: (B, C, H, W) NCHW, like the PyTorch module.
    B, C, Himg, Wimg = x.shape
    P = patch
    Hp, Wp = Himg // P, Wimg // P
    # im2col for the stride-P conv (matches Conv2d weight (D, C, P, P) flattening
    # followed by flatten(2).transpose(1, 2))
    xp = x.reshape(B, C, Hp, P, Wp, P).transpose(0, 2, 4, 1, 3, 5)
    patches = xp.reshape(B, Hp * Wp, C * P * P)
    return vit_encoder_call(patches, params, depth=depth, num_heads=num_heads)


# ------------------------------------------------------------------ main -----

if __name__ == "__main__":
    B, C, IMG, P = 2, 3, 16, 4
    EMBED, DEPTH, HEADS, MLP_RATIO = 32, 2, 4, 4.0
    NUM_PATCHES = (IMG // P) * (IMG // P)   # 16

    key = jax.random.PRNGKey(0)
    kx, kp = jax.random.split(key)
    x = jax.random.normal(kx, (B, C, IMG, IMG), jnp.float32)
    params = init_params(kp, in_chans=C, patch=P, embed_dim=EMBED,
                         depth=DEPTH, mlp_ratio=MLP_RATIO,
                         num_patches=NUM_PATCHES, num_heads=HEADS)

    out = vit_encoder_forward(x, params, patch=P, depth=DEPTH, num_heads=HEADS)
    out = jax.block_until_ready(out)
    assert out.shape == (B, NUM_PATCHES, EMBED)
    print("KERNEL_OK")
</pallas_src>

<mosaic_0001>
module attributes {stable_mosaic.version = 11 : i64} {
  func.func @vit_encoder_kernel(%arg0: memref<2x16x48xf32, #tpu.memory_space<vmem>>, %arg1: memref<48x32xf32, #tpu.memory_space<vmem>>, %arg2: memref<1x16x32xf32, #tpu.memory_space<vmem>>, %arg3: memref<2x32xf32, #tpu.memory_space<vmem>>, %arg4: memref<2x32xf32, #tpu.memory_space<vmem>>, %arg5: memref<2x32x96xf32, #tpu.memory_space<vmem>>, %arg6: memref<2x32x32xf32, #tpu.memory_space<vmem>>, %arg7: memref<2x32xf32, #tpu.memory_space<vmem>>, %arg8: memref<2x32xf32, #tpu.memory_space<vmem>>, %arg9: memref<2x32xf32, #tpu.memory_space<vmem>>, %arg10: memref<2x32x128xf32, #tpu.memory_space<vmem>>, %arg11: memref<2x128xf32, #tpu.memory_space<vmem>>, %arg12: memref<2x128x32xf32, #tpu.memory_space<vmem>>, %arg13: memref<2x32xf32, #tpu.memory_space<vmem>>, %arg14: memref<1x32xf32, #tpu.memory_space<vmem>>, %arg15: memref<1x32xf32, #tpu.memory_space<vmem>>, %arg16: memref<8x128xf32, #tpu.memory_space<vmem>>) attributes {dimension_semantics = [], scalar_prefetch = 0 : i64, scratch_operands = 0 : i64, tpu.core_type = #tpu.core_type<tc>} {
    %c0 = arith.constant 0 : index
    %c0_0 = arith.constant 0 : index
    %c0_1 = arith.constant 0 : index
    %0 = vector.load %arg0[%c0, %c0_0, %c0_1] : memref<2x16x48xf32, #tpu.memory_space<vmem>>, vector<2x16x48xf32>
    %1 = vector.shape_cast %0 : vector<2x16x48xf32> to vector<32x48xf32>
    %c0_2 = arith.constant 0 : index
    %c0_3 = arith.constant 0 : index
    %2 = vector.load %arg1[%c0_2, %c0_3] : memref<48x32xf32, #tpu.memory_space<vmem>>, vector<48x32xf32>
    %cst = arith.constant dense<0.000000e+00> : vector<32x32xf32>
    %3 = tpu.matmul %1, %2, %cst {dimension_numbers = #tpu.dot_dimension_numbers<[1], [0], [0], [1], [0, 0, 1, 1], [], []>} : vector<32x48xf32>, vector<48x32xf32>, vector<32x32xf32> -> vector<32x32xf32>
    %4 = vector.shape_cast %3 : vector<32x32xf32> to vector<2x16x32xf32>
    %c0_4 = arith.constant 0 : index
    %c0_5 = arith.constant 0 : index
    %c0_6 = arith.constant 0 : index
    %5 = vector.load %arg2[%c0_4, %c0_5, %c0_6] : memref<1x16x32xf32, #tpu.memory_space<vmem>>, vector<1x16x32xf32>
    %6 = vector.broadcast %5 : vector<1x16x32xf32> to vector<2x16x32xf32>
    %7 = arith.addf %4, %6 : vector<2x16x32xf32>
    %8 = vector.shape_cast %7 : vector<2x16x32xf32> to vector<32x32xf32>
    %9 = tpu.iota {dimensions = array<i32: 1>} : vector<1x32xi32>
    %c0_i32 = arith.constant 0 : i32
    %10 = vector.broadcast %c0_i32 : i32 to vector<1x32xi32>
    %11 = arith.cmpi sge, %9, %10 : vector<1x32xi32>
    %c8_i32 = arith.constant 8 : i32
    %12 = vector.broadcast %c8_i32 : i32 to vector<1x32xi32>
    %13 = arith.cmpi slt, %9, %12 : vector<1x32xi32>
    %14 = arith.andi %11, %13 : vector<1x32xi1>
    %cst_7 = arith.constant 1.000000e+00 : f32
    %cst_8 = arith.constant 0.000000e+00 : f32
    %15 = vector.broadcast %cst_7 : f32 to vector<1x32xf32>
    %16 = vector.broadcast %cst_8 : f32 to vector<1x32xf32>
    %17 = arith.select %14, %15, %16 : vector<1x32xi1>, vector<1x32xf32>
    %c8_i32_9 = arith.constant 8 : i32
    %18 = vector.broadcast %c8_i32_9 : i32 to vector<1x32xi32>
    %19 = arith.cmpi sge, %9, %18 : vector<1x32xi32>
    %c16_i32 = arith.constant 16 : i32
    %20 = vector.broadcast %c16_i32 : i32 to vector<1x32xi32>
    %21 = arith.cmpi slt, %9, %20 : vector<1x32xi32>
    %22 = arith.andi %19, %21 : vector<1x32xi1>
    %cst_10 = arith.constant 1.000000e+00 : f32
    %cst_11 = arith.constant 0.000000e+00 : f32
    %23 = vector.broadcast %cst_10 : f32 to vector<1x32xf32>
    %24 = vector.broadcast %cst_11 : f32 to vector<1x32xf32>
    %25 = arith.select %22, %23, %24 : vector<1x32xi1>, vector<1x32xf32>
    %c16_i32_12 = arith.constant 16 : i32
    %26 = vector.broadcast %c16_i32_12 : i32 to vector<1x32xi32>
    %27 = arith.cmpi sge, %9, %26 : vector<1x32xi32>
    %c24_i32 = arith.constant 24 : i32
    %28 = vector.broadcast %c24_i32 : i32 to vector<1x32xi32>
    %29 = arith.cmpi slt, %9, %28 : vector<1x32xi32>
    %30 = arith.andi %27, %29 : vector<1x32xi1>
    %cst_13 = arith.constant 1.000000e+00 : f32
    %cst_14 = arith.constant 0.000000e+00 : f32
    %31 = vector.broadcast %cst_13 : f32 to vector<1x32xf32>
    %32 = vector.broadcast %cst_14 : f32 to vector<1x32xf32>
    %33 = arith.select %30, %31, %32 : vector<1x32xi1>, vector<1x32xf32>
    %c24_i32_15 = arith.constant 24 : i32
    %34 = vector.broadcast %c24_i32_15 : i32 to vector<1x32xi32>
    %35 = arith.cmpi sge, %9, %34 : vector<1x32xi32>
    %c32_i32 = arith.constant 32 : i32
    %36 = vector.broadcast %c32_i32 : i32 to vector<1x32xi32>
    %37 = arith.cmpi slt, %9, %36 : vector<1x32xi32>
    %38 = arith.andi %35, %37 : vector<1x32xi1>
    %cst_16 = arith.constant 1.000000e+00 : f32
    %cst_17 = arith.constant 0.000000e+00 : f32
    %39 = vector.broadcast %cst_16 : f32 to vector<1x32xf32>
    %40 = vector.broadcast %cst_17 : f32 to vector<1x32xf32>
    %41 = arith.select %38, %39, %40 : vector<1x32xi1>, vector<1x32xf32>
    %c0_18 = arith.constant 0 : index
    %c0_19 = arith.constant 0 : index
    %42 = vector.load %arg3[%c0_18, %c0_19] : memref<2x32xf32, #tpu.memory_space<vmem>>, vector<1x32xf32>
    %43 = vector.shape_cast %42 : vector<1x32xf32> to vector<32xf32>
    %c0_20 = arith.constant 0 : index
    %c0_21 = arith.constant 0 : index
    %44 = vector.load %arg4[%c0_20, %c0_21] : memref<2x32xf32, #tpu.memory_space<vmem>>, vector<1x32xf32>
    %45 = vector.shape_cast %44 : vector<1x32xf32> to vector<32xf32>
    %cst_22 = arith.constant dense<0.000000e+00> : vector<32xf32>
    %46 = vector.multi_reduction <add>, %8, %cst_22 [1] : vector<32x32xf32> to vector<32xf32>
    %47 = vector.shape_cast %46 : vector<32xf32> to vector<32x1xf32>
    %cst_23 = arith.constant 3.200000e+01 : f32
    %48 = vector.broadcast %cst_23 : f32 to vector<32x1xf32>
    %49 = arith.divf %47, %48 : vector<32x1xf32>
    %50 = vector.broadcast %49 : vector<32x1xf32> to vector<32x32xf32>
    %51 = arith.subf %8, %50 : vector<32x32xf32>
    %52 = arith.mulf %51, %51 : vector<32x32xf32>
    %cst_24 = arith.constant dense<0.000000e+00> : vector<32xf32>
    %53 = vector.multi_reduction <add>, %52, %cst_24 [1] : vector<32x32xf32> to vector<32xf32>
    %54 = vector.shape_cast %53 : vector<32xf32> to vector<32x1xf32>
    %cst_25 = arith.constant 3.200000e+01 : f32
    %55 = vector.broadcast %cst_25 : f32 to vector<32x1xf32>
    %56 = arith.divf %54, %55 : vector<32x1xf32>
    %57 = vector.broadcast %49 : vector<32x1xf32> to vector<32x32xf32>
    %58 = arith.subf %8, %57 : vector<32x32xf32>
    %cst_26 = arith.constant 9.99999974E-6 : f32
    %59 = vector.broadcast %cst_26 : f32 to vector<32x1xf32>
    %60 = arith.addf %56, %59 : vector<32x1xf32>
    %61 = math.rsqrt %60 : vector<32x1xf32>
    %62 = vector.broadcast %61 : vector<32x1xf32> to vector<32x32xf32>
    %63 = arith.mulf %58, %62 : vector<32x32xf32>
    %64 = vector.shape_cast %43 : vector<32xf32> to vector<1x32xf32>
    %65 = vector.broadcast %64 : vector<1x32xf32> to vector<32x32xf32>
    %66 = arith.mulf %63, %65 : vector<32x32xf32>
    %67 = vector.shape_cast %45 : vector<32xf32> to vector<1x32xf32>
    %68 = vector.broadcast %67 : vector<1x32xf32> to vector<32x32xf32>
    %69 = arith.addf %66, %68 : vector<32x32xf32>
    %c0_27 = arith.constant 0 : index
    %c0_28 = arith.constant 0 : index
    %c0_29 = arith.constant 0 : index
    %70 = vector.load %arg5[%c0_27, %c0_28, %c0_29] : memref<2x32x96xf32, #tpu.memory_space<vmem>>, vector<1x32x96xf32>
    %71 = vector.shape_cast %70 : vector<1x32x96xf32> to vector<32x96xf32>
    %cst_30 = arith.constant dense<0.000000e+00> : vector<32x96xf32>
    %72 = tpu.matmul %69, %71, %cst_30 {dimension_numbers = #tpu.dot_dimension_numbers<[1], [0], [0], [1], [0, 0, 1, 1], [], []>} : vector<32x32xf32>, vector<32x96xf32>, vector<32x96xf32> -> vector<32x96xf32>
    %73 = vector.extract_strided_slice %72 {offsets = [0, 0], sizes = [32, 32], strides = [1, 1]} : vector<32x96xf32> to vector<32x32xf32>
    %74 = vector.shape_cast %73 : vector<32x32xf32> to vector<2x16x32xf32>
    %75 = vector.extract_strided_slice %72 {offsets = [0, 32], sizes = [32, 32], strides = [1, 1]} : vector<32x96xf32> to vector<32x32xf32>
    %76 = vector.shape_cast %75 : vector<32x32xf32> to vector<2x16x32xf32>
    %77 = vector.extract_strided_slice %72 {offsets = [0, 64], sizes = [32, 32], strides = [1, 1]} : vector<32x96xf32> to vector<32x32xf32>
    %78 = vector.shape_cast %77 : vector<32x32xf32> to vector<2x16x32xf32>
    %79 = vector.shape_cast %17 : vector<1x32xf32> to vector<1x1x32xf32>
    %80 = vector.broadcast %79 : vector<1x1x32xf32> to vector<2x16x32xf32>
    %81 = arith.mulf %74, %80 : vector<2x16x32xf32>
    %cst_31 = arith.constant dense<0.000000e+00> : vector<2x16x16xf32>
    %82 = tpu.matmul %81, %76, %cst_31 {dimension_numbers = #tpu.dot_dimension_numbers<[2], [2], [1], [1], [0, 0, 0, 1, 1, 1], [0], [0]>} : vector<2x16x32xf32>, vector<2x16x32xf32>, vector<2x16x16xf32> -> vector<2x16x16xf32>
    %83 = vector.shape_cast %25 : vector<1x32xf32> to vector<1x1x32xf32>
    %84 = vector.broadcast %83 : vector<1x1x32xf32> to vector<2x16x32xf32>
    %85 = arith.mulf %74, %84 : vector<2x16x32xf32>
    %cst_32 = arith.constant dense<0.000000e+00> : vector<2x16x16xf32>
    %86 = tpu.matmul %85, %76, %cst_32 {dimension_numbers = #tpu.dot_dimension_numbers<[2], [2], [1], [1], [0, 0, 0, 1, 1, 1], [0], [0]>} : vector<2x16x32xf32>, vector<2x16x32xf32>, vector<2x16x16xf32> -> vector<2x16x16xf32>
    %87 = vector.shape_cast %33 : vector<1x32xf32> to vector<1x1x32xf32>
    %88 = vector.broadcast %87 : vector<1x1x32xf32> to vector<2x16x32xf32>
    %89 = arith.mulf %74, %88 : vector<2x16x32xf32>
    %cst_33 = arith.constant dense<0.000000e+00> : vector<2x16x16xf32>
    %90 = tpu.matmul %89, %76, %cst_33 {dimension_numbers = #tpu.dot_dimension_numbers<[2], [2], [1], [1], [0, 0, 0, 1, 1, 1], [0], [0]>} : vector<2x16x32xf32>, vector<2x16x32xf32>, vector<2x16x16xf32> -> vector<2x16x16xf32>
    %91 = vector.shape_cast %41 : vector<1x32xf32> to vector<1x1x32xf32>
    %92 = vector.broadcast %91 : vector<1x1x32xf32> to vector<2x16x32xf32>
    %93 = arith.mulf %74, %92 : vector<2x16x32xf32>
    %cst_34 = arith.constant dense<0.000000e+00> : vector<2x16x16xf32>
    %94 = tpu.matmul %93, %76, %cst_34 {dimension_numbers = #tpu.dot_dimension_numbers<[2], [2], [1], [1], [0, 0, 0, 1, 1, 1], [0], [0]>} : vector<2x16x32xf32>, vector<2x16x32xf32>, vector<2x16x16xf32> -> vector<2x16x16xf32>
    %95 = vector.shape_cast %82 : vector<2x16x16xf32> to vector<1x2x16x16xf32>
    %96 = vector.shape_cast %86 : vector<2x16x16xf32> to vector<1x2x16x16xf32>
    %97 = vector.shape_cast %90 : vector<2x16x16xf32> to vector<1x2x16x16xf32>
    %98 = vector.shape_cast %94 : vector<2x16x16xf32> to vector<1x2x16x16xf32>
    %99 = tpu.concatenate %95, %96, %97, %98 in 0 : vector<1x2x16x16xf32>, vector<1x2x16x16xf32>, vector<1x2x16x16xf32>, vector<1x2x16x16xf32> -> vector<4x2x16x16xf32>
    %cst_35 = arith.constant 0.353553385 : f32
    %100 = vector.broadcast %cst_35 : f32 to vector<4x2x16x16xf32>
    %101 = arith.mulf %99, %100 : vector<4x2x16x16xf32>
    %cst_36 = arith.constant dense<0xFF800000> : vector<4x2x16xf32>
    %102 = vector.multi_reduction <maximumf>, %101, %cst_36 [3] : vector<4x2x16x16xf32> to vector<4x2x16xf32>
    %103 = vector.shape_cast %102 : vector<4x2x16xf32> to vector<4x2x16x1xf32>
    %104 = vector.broadcast %103 : vector<4x2x16x1xf32> to vector<4x2x16x16xf32>
    %105 = arith.subf %101, %104 : vector<4x2x16x16xf32>
    %106 = math.exp %105 : vector<4x2x16x16xf32>
    %cst_37 = arith.constant dense<0.000000e+00> : vector<4x2x16xf32>
    %107 = vector.multi_reduction <add>, %106, %cst_37 [3] : vector<4x2x16x16xf32> to vector<4x2x16xf32>
    %108 = vector.shape_cast %107 : vector<4x2x16xf32> to vector<4x2x16x1xf32>
    %109 = vector.broadcast %108 : vector<4x2x16x1xf32> to vector<4x2x16x16xf32>
    %110 = arith.divf %106, %109 : vector<4x2x16x16xf32>
    %cst_38 = arith.constant 0.000000e+00 : f32
    %111 = vector.broadcast %cst_38 : f32 to vector<2x16x32xf32>
    %112 = vector.extract_strided_slice %110 {offsets = [0, 0, 0, 0], sizes = [1, 2, 16, 16], strides = [1, 1, 1, 1]} : vector<4x2x16x16xf32> to vector<1x2x16x16xf32>
    %113 = vector.shape_cast %112 : vector<1x2x16x16xf32> to vector<2x16x16xf32>
    %114 = vector.shape_cast %17 : vector<1x32xf32> to vector<1x1x32xf32>
    %115 = vector.broadcast %114 : vector<1x1x32xf32> to vector<2x16x32xf32>
    %116 = arith.mulf %78, %115 : vector<2x16x32xf32>
    %cst_39 = arith.constant dense<0.000000e+00> : vector<2x16x32xf32>
    %117 = tpu.matmul %113, %116, %cst_39 {dimension_numbers = #tpu.dot_dimension_numbers<[2], [1], [1], [2], [0, 0, 0, 1, 1, 2], [0], [0]>} : vector<2x16x16xf32>, vector<2x16x32xf32>, vector<2x16x32xf32> -> vector<2x16x32xf32>
    %118 = arith.addf %111, %117 : vector<2x16x32xf32>
    %119 = vector.extract_strided_slice %110 {offsets = [1, 0, 0, 0], sizes = [1, 2, 16, 16], strides = [1, 1, 1, 1]} : vector<4x2x16x16xf32> to vector<1x2x16x16xf32>
    %120 = vector.shape_cast %119 : vector<1x2x16x16xf32> to vector<2x16x16xf32>
    %121 = vector.shape_cast %25 : vector<1x32xf32> to vector<1x1x32xf32>
    %122 = vector.broadcast %121 : vector<1x1x32xf32> to vector<2x16x32xf32>
    %123 = arith.mulf %78, %122 : vector<2x16x32xf32>
    %cst_40 = arith.constant dense<0.000000e+00> : vector<2x16x32xf32>
    %124 = tpu.matmul %120, %123, %cst_40 {dimension_numbers = #tpu.dot_dimension_numbers<[2], [1], [1], [2], [0, 0, 0, 1, 1, 2], [0], [0]>} : vector<2x16x16xf32>, vector<2x16x32xf32>, vector<2x16x32xf32> -> vector<2x16x32xf32>
    %125 = arith.addf %118, %124 : vector<2x16x32xf32>
    %126 = vector.extract_strided_slice %110 {offsets = [2, 0, 0, 0], sizes = [1, 2, 16, 16], strides = [1, 1, 1, 1]} : vector<4x2x16x16xf32> to vector<1x2x16x16xf32>
    %127 = vector.shape_cast %126 : vector<1x2x16x16xf32> to vector<2x16x16xf32>
    %128 = vector.shape_cast %33 : vector<1x32xf32> to vector<1x1x32xf32>
    %129 = vector.broadcast %128 : vector<1x1x32xf32> to vector<2x16x32xf32>
    %130 = arith.mulf %78, %129 : vector<2x16x32xf32>
    %cst_41 = arith.constant dense<0.000000e+00> : vector<2x16x32xf32>
    %131 = tpu.matmul %127, %130, %cst_41 {dimension_numbers = #tpu.dot_dimension_numbers<[2], [1], [1], [2], [0, 0, 0, 1, 1, 2], [0], [0]>} : vector<2x16x16xf32>, vector<2x16x32xf32>, vector<2x16x32xf32> -> vector<2x16x32xf32>
    %132 = arith.addf %125, %131 : vector<2x16x32xf32>
    %133 = vector.extract_strided_slice %110 {offsets = [3, 0, 0, 0], sizes = [1, 2, 16, 16], strides = [1, 1, 1, 1]} : vector<4x2x16x16xf32> to vector<1x2x16x16xf32>
    %134 = vector.shape_cast %133 : vector<1x2x16x16xf32> to vector<2x16x16xf32>
    %135 = vector.shape_cast %41 : vector<1x32xf32> to vector<1x1x32xf32>
    %136 = vector.broadcast %135 : vector<1x1x32xf32> to vector<2x16x32xf32>
    %137 = arith.mulf %78, %136 : vector<2x16x32xf32>
    %cst_42 = arith.constant dense<0.000000e+00> : vector<2x16x32xf32>
    %138 = tpu.matmul %134, %137, %cst_42 {dimension_numbers = #tpu.dot_dimension_numbers<[2], [1], [1], [2], [0, 0, 0, 1, 1, 2], [0], [0]>} : vector<2x16x16xf32>, vector<2x16x32xf32>, vector<2x16x32xf32> -> vector<2x16x32xf32>
    %139 = arith.addf %132, %138 : vector<2x16x32xf32>
    %140 = vector.shape_cast %139 : vector<2x16x32xf32> to vector<32x32xf32>
    %c0_43 = arith.constant 0 : index
    %c0_44 = arith.constant 0 : index
    %c0_45 = arith.constant 0 : index
    %141 = vector.load %arg6[%c0_43, %c0_44, %c0_45] : memref<2x32x32xf32, #tpu.memory_space<vmem>>, vector<1x32x32xf32>
    %142 = vector.shape_cast %141 : vector<1x32x32xf32> to vector<32x32xf32>
    %cst_46 = arith.constant dense<0.000000e+00> : vector<32x32xf32>
    %143 = tpu.matmul %140, %142, %cst_46 {dimension_numbers = #tpu.dot_dimension_numbers<[1], [0], [0], [1], [0, 0, 1, 1], [], []>} : vector<32x32xf32>, vector<32x32xf32>, vector<32x32xf32> -> vector<32x32xf32>
    %144 = arith.addf %8, %143 : vector<32x32xf32>
    %c0_47 = arith.constant 0 : index
    %c0_48 = arith.constant 0 : index
    %145 = vector.load %arg7[%c0_47, %c0_48] : memref<2x32xf32, #tpu.memory_space<vmem>>, vector<1x32xf32>
    %146 = vector.shape_cast %145 : vector<1x32xf32> to vector<32xf32>
    %147 = vector.shape_cast %146 : vector<32xf32> to vector<1x32xf32>
    %148 = vector.broadcast %147 : vector<1x32xf32> to vector<32x32xf32>
    %149 = arith.addf %144, %148 : vector<32x32xf32>
    %c0_49 = arith.constant 0 : index
    %c0_50 = arith.constant 0 : index
    %150 = vector.load %arg8[%c0_49, %c0_50] : memref<2x32xf32, #tpu.memory_space<vmem>>, vector<1x32xf32>
    %151 = vector.shape_cast %150 : vector<1x32xf32> to vector<32xf32>
    %c0_51 = arith.constant 0 : index
    %c0_52 = arith.constant 0 : index
    %152 = vector.load %arg9[%c0_51, %c0_52] : memref<2x32xf32, #tpu.memory_space<vmem>>, vector<1x32xf32>
    %153 = vector.shape_cast %152 : vector<1x32xf32> to vector<32xf32>
    %cst_53 = arith.constant dense<0.000000e+00> : vector<32xf32>
    %154 = vector.multi_reduction <add>, %149, %cst_53 [1] : vector<32x32xf32> to vector<32xf32>
    %155 = vector.shape_cast %154 : vector<32xf32> to vector<32x1xf32>
    %cst_54 = arith.constant 3.200000e+01 : f32
    %156 = vector.broadcast %cst_54 : f32 to vector<32x1xf32>
    %157 = arith.divf %155, %156 : vector<32x1xf32>
    %158 = vector.broadcast %157 : vector<32x1xf32> to vector<32x32xf32>
    %159 = arith.subf %149, %158 : vector<32x32xf32>
    %160 = arith.mulf %159, %159 : vector<32x32xf32>
    %cst_55 = arith.constant dense<0.000000e+00> : vector<32xf32>
    %161 = vector.multi_reduction <add>, %160, %cst_55 [1] : vector<32x32xf32> to vector<32xf32>
    %162 = vector.shape_cast %161 : vector<32xf32> to vector<32x1xf32>
    %cst_56 = arith.constant 3.200000e+01 : f32
    %163 = vector.broadcast %cst_56 : f32 to vector<32x1xf32>
    %164 = arith.divf %162, %163 : vector<32x1xf32>
    %165 = vector.broadcast %157 : vector<32x1xf32> to vector<32x32xf32>
    %166 = arith.subf %149, %165 : vector<32x32xf32>
    %cst_57 = arith.constant 9.99999974E-6 : f32
    %167 = vector.broadcast %cst_57 : f32 to vector<32x1xf32>
    %168 = arith.addf %164, %167 : vector<32x1xf32>
    %169 = math.rsqrt %168 : vector<32x1xf32>
    %170 = vector.broadcast %169 : vector<32x1xf32> to vector<32x32xf32>
    %171 = arith.mulf %166, %170 : vector<32x32xf32>
    %172 = vector.shape_cast %151 : vector<32xf32> to vector<1x32xf32>
    %173 = vector.broadcast %172 : vector<1x32xf32> to vector<32x32xf32>
    %174 = arith.mulf %171, %173 : vector<32x32xf32>
    %175 = vector.shape_cast %153 : vector<32xf32> to vector<1x32xf32>
    %176 = vector.broadcast %175 : vector<1x32xf32> to vector<32x32xf32>
    %177 = arith.addf %174, %176 : vector<32x32xf32>
    %c0_58 = arith.constant 0 : index
    %c0_59 = arith.constant 0 : index
    %c0_60 = arith.constant 0 : index
    %178 = vector.load %arg10[%c0_58, %c0_59, %c0_60] : memref<2x32x128xf32, #tpu.memory_space<vmem>>, vector<1x32x128xf32>
    %179 = vector.shape_cast %178 : vector<1x32x128xf32> to vector<32x128xf32>
    %cst_61 = arith.constant dense<0.000000e+00> : vector<32x128xf32>
    %180 = tpu.matmul %177, %179, %cst_61 {dimension_numbers = #tpu.dot_dimension_numbers<[1], [0], [0], [1], [0, 0, 1, 1], [], []>} : vector<32x32xf32>, vector<32x128xf32>, vector<32x128xf32> -> vector<32x128xf32>
    %c0_62 = arith.constant 0 : index
    %c0_63 = arith.constant 0 : index
    %181 = vector.load %arg11[%c0_62, %c0_63] : memref<2x128xf32, #tpu.memory_space<vmem>>, vector<1x128xf32>
    %182 = vector.shape_cast %181 : vector<1x128xf32> to vector<128xf32>
    %183 = vector.shape_cast %182 : vector<128xf32> to vector<1x128xf32>
    %184 = vector.broadcast %183 : vector<1x128xf32> to vector<32x128xf32>
    %185 = arith.addf %180, %184 : vector<32x128xf32>
    %cst_64 = arith.constant 5.000000e-01 : f32
    %186 = vector.broadcast %cst_64 : f32 to vector<32x128xf32>
    %187 = arith.mulf %186, %185 : vector<32x128xf32>
    %cst_65 = arith.constant 0.707106769 : f32
    %188 = vector.broadcast %cst_65 : f32 to vector<32x128xf32>
    %189 = arith.mulf %185, %188 : vector<32x128xf32>
    %190 = math.erf %189 : vector<32x128xf32>
    %cst_66 = arith.constant 1.000000e+00 : f32
    %191 = vector.broadcast %cst_66 : f32 to vector<32x128xf32>
    %192 = arith.addf %191, %190 : vector<32x128xf32>
    %193 = arith.mulf %187, %192 : vector<32x128xf32>
    %c0_67 = arith.constant 0 : index
    %c0_68 = arith.constant 0 : index
    %c0_69 = arith.constant 0 : index
    %194 = vector.load %arg12[%c0_67, %c0_68, %c0_69] : memref<2x128x32xf32, #tpu.memory_space<vmem>>, vector<1x128x32xf32>
    %195 = vector.shape_cast %194 : vector<1x128x32xf32> to vector<128x32xf32>
    %cst_70 = arith.constant dense<0.000000e+00> : vector<32x32xf32>
    %196 = tpu.matmul %193, %195, %cst_70 {dimension_numbers = #tpu.dot_dimension_numbers<[1], [0], [0], [1], [0, 0, 1, 1], [], []>} : vector<32x128xf32>, vector<128x32xf32>, vector<32x32xf32> -> vector<32x32xf32>
    %197 = arith.addf %149, %196 : vector<32x32xf32>
    %c0_71 = arith.constant 0 : index
    %c0_72 = arith.constant 0 : index
    %198 = vector.load %arg13[%c0_71, %c0_72] : memref<2x32xf32, #tpu.memory_space<vmem>>, vector<1x32xf32>
    %199 = vector.shape_cast %198 : vector<1x32xf32> to vector<32xf32>
    %200 = vector.shape_cast %199 : vector<32xf32> to vector<1x32xf32>
    %201 = vector.broadcast %200 : vector<1x32xf32> to vector<32x32xf32>
    %202 = arith.addf %197, %201 : vector<32x32xf32>
    %c1 = arith.constant 1 : index
    %c0_73 = arith.constant 0 : index
    %203 = vector.load %arg3[%c1, %c0_73] : memref<2x32xf32, #tpu.memory_space<vmem>>, vector<1x32xf32>
    %204 = vector.shape_cast %203 : vector<1x32xf32> to vector<32xf32>
    %c1_74 = arith.constant 1 : index
    %c0_75 = arith.constant 0 : index
    %205 = vector.load %arg4[%c1_74, %c0_75] : memref<2x32xf32, #tpu.memory_space<vmem>>, vector<1x32xf32>
    %206 = vector.shape_cast %205 : vector<1x32xf32> to vector<32xf32>
    %cst_76 = arith.constant dense<0.000000e+00> : vector<32xf32>
    %207 = vector.multi_reduction <add>, %202, %cst_76 [1] : vector<32x32xf32> to vector<32xf32>
    %208 = vector.shape_cast %207 : vector<32xf32> to vector<32x1xf32>
    %cst_77 = arith.constant 3.200000e+01 : f32
    %209 = vector.broadcast %cst_77 : f32 to vector<32x1xf32>
    %210 = arith.divf %208, %209 : vector<32x1xf32>
    %211 = vector.broadcast %210 : vector<32x1xf32> to vector<32x32xf32>
    %212 = arith.subf %202, %211 : vector<32x32xf32>
    %213 = arith.mulf %212, %212 : vector<32x32xf32>
    %cst_78 = arith.constant dense<0.000000e+00> : vector<32xf32>
    %214 = vector.multi_reduction <add>, %213, %cst_78 [1] : vector<32x32xf32> to vector<32xf32>
    %215 = vector.shape_cast %214 : vector<32xf32> to vector<32x1xf32>
    %cst_79 = arith.constant 3.200000e+01 : f32
    %216 = vector.broadcast %cst_79 : f32 to vector<32x1xf32>
    %217 = arith.divf %215, %216 : vector<32x1xf32>
    %218 = vector.broadcast %210 : vector<32x1xf32> to vector<32x32xf32>
    %219 = arith.subf %202, %218 : vector<32x32xf32>
    %cst_80 = arith.constant 9.99999974E-6 : f32
    %220 = vector.broadcast %cst_80 : f32 to vector<32x1xf32>
    %221 = arith.addf %217, %220 : vector<32x1xf32>
    %222 = math.rsqrt %221 : vector<32x1xf32>
    %223 = vector.broadcast %222 : vector<32x1xf32> to vector<32x32xf32>
    %224 = arith.mulf %219, %223 : vector<32x32xf32>
    %225 = vector.shape_cast %204 : vector<32xf32> to vector<1x32xf32>
    %226 = vector.broadcast %225 : vector<1x32xf32> to vector<32x32xf32>
    %227 = arith.mulf %224, %226 : vector<32x32xf32>
    %228 = vector.shape_cast %206 : vector<32xf32> to vector<1x32xf32>
    %229 = vector.broadcast %228 : vector<1x32xf32> to vector<32x32xf32>
    %230 = arith.addf %227, %229 : vector<32x32xf32>
    %c1_81 = arith.constant 1 : index
    %c0_82 = arith.constant 0 : index
    %c0_83 = arith.constant 0 : index
    %231 = vector.load %arg5[%c1_81, %c0_82, %c0_83] : memref<2x32x96xf32, #tpu.memory_space<vmem>>, vector<1x32x96xf32>
    %232 = vector.shape_cast %231 : vector<1x32x96xf32> to vector<32x96xf32>
    %cst_84 = arith.constant dense<0.000000e+00> : vector<32x96xf32>
    %233 = tpu.matmul %230, %232, %cst_84 {dimension_numbers = #tpu.dot_dimension_numbers<[1], [0], [0], [1], [0, 0, 1, 1], [], []>} : vector<32x32xf32>, vector<32x96xf32>, vector<32x96xf32> -> vector<32x96xf32>
    %234 = vector.extract_strided_slice %233 {offsets = [0, 0], sizes = [32, 32], strides = [1, 1]} : vector<32x96xf32> to vector<32x32xf32>
    %235 = vector.shape_cast %234 : vector<32x32xf32> to vector<2x16x32xf32>
    %236 = vector.extract_strided_slice %233 {offsets = [0, 32], sizes = [32, 32], strides = [1, 1]} : vector<32x96xf32> to vector<32x32xf32>
    %237 = vector.shape_cast %236 : vector<32x32xf32> to vector<2x16x32xf32>
    %238 = vector.extract_strided_slice %233 {offsets = [0, 64], sizes = [32, 32], strides = [1, 1]} : vector<32x96xf32> to vector<32x32xf32>
    %239 = vector.shape_cast %238 : vector<32x32xf32> to vector<2x16x32xf32>
    %240 = vector.shape_cast %17 : vector<1x32xf32> to vector<1x1x32xf32>
    %241 = vector.broadcast %240 : vector<1x1x32xf32> to vector<2x16x32xf32>
    %242 = arith.mulf %235, %241 : vector<2x16x32xf32>
    %cst_85 = arith.constant dense<0.000000e+00> : vector<2x16x16xf32>
    %243 = tpu.matmul %242, %237, %cst_85 {dimension_numbers = #tpu.dot_dimension_numbers<[2], [2], [1], [1], [0, 0, 0, 1, 1, 1], [0], [0]>} : vector<2x16x32xf32>, vector<2x16x32xf32>, vector<2x16x16xf32> -> vector<2x16x16xf32>
    %244 = vector.shape_cast %25 : vector<1x32xf32> to vector<1x1x32xf32>
    %245 = vector.broadcast %244 : vector<1x1x32xf32> to vector<2x16x32xf32>
    %246 = arith.mulf %235, %245 : vector<2x16x32xf32>
    %cst_86 = arith.constant dense<0.000000e+00> : vector<2x16x16xf32>
    %247 = tpu.matmul %246, %237, %cst_86 {dimension_numbers = #tpu.dot_dimension_numbers<[2], [2], [1], [1], [0, 0, 0, 1, 1, 1], [0], [0]>} : vector<2x16x32xf32>, vector<2x16x32xf32>, vector<2x16x16xf32> -> vector<2x16x16xf32>
    %248 = vector.shape_cast %33 : vector<1x32xf32> to vector<1x1x32xf32>
    %249 = vector.broadcast %248 : vector<1x1x32xf32> to vector<2x16x32xf32>
    %250 = arith.mulf %235, %249 : vector<2x16x32xf32>
    %cst_87 = arith.constant dense<0.000000e+00> : vector<2x16x16xf32>
    %251 = tpu.matmul %250, %237, %cst_87 {dimension_numbers = #tpu.dot_dimension_numbers<[2], [2], [1], [1], [0, 0, 0, 1, 1, 1], [0], [0]>} : vector<2x16x32xf32>, vector<2x16x32xf32>, vector<2x16x16xf32> -> vector<2x16x16xf32>
    %252 = vector.shape_cast %41 : vector<1x32xf32> to vector<1x1x32xf32>
    %253 = vector.broadcast %252 : vector<1x1x32xf32> to vector<2x16x32xf32>
    %254 = arith.mulf %235, %253 : vector<2x16x32xf32>
    %cst_88 = arith.constant dense<0.000000e+00> : vector<2x16x16xf32>
    %255 = tpu.matmul %254, %237, %cst_88 {dimension_numbers = #tpu.dot_dimension_numbers<[2], [2], [1], [1], [0, 0, 0, 1, 1, 1], [0], [0]>} : vector<2x16x32xf32>, vector<2x16x32xf32>, vector<2x16x16xf32> -> vector<2x16x16xf32>
    %256 = vector.shape_cast %243 : vector<2x16x16xf32> to vector<1x2x16x16xf32>
    %257 = vector.shape_cast %247 : vector<2x16x16xf32> to vector<1x2x16x16xf32>
    %258 = vector.shape_cast %251 : vector<2x16x16xf32> to vector<1x2x16x16xf32>
    %259 = vector.shape_cast %255 : vector<2x16x16xf32> to vector<1x2x16x16xf32>
    %260 = tpu.concatenate %256, %257, %258, %259 in 0 : vector<1x2x16x16xf32>, vector<1x2x16x16xf32>, vector<1x2x16x16xf32>, vector<1x2x16x16xf32> -> vector<4x2x16x16xf32>
    %cst_89 = arith.constant 0.353553385 : f32
    %261 = vector.broadcast %cst_89 : f32 to vector<4x2x16x16xf32>
    %262 = arith.mulf %260, %261 : vector<4x2x16x16xf32>
    %cst_90 = arith.constant dense<0xFF800000> : vector<4x2x16xf32>
    %263 = vector.multi_reduction <maximumf>, %262, %cst_90 [3] : vector<4x2x16x16xf32> to vector<4x2x16xf32>
    %264 = vector.shape_cast %263 : vector<4x2x16xf32> to vector<4x2x16x1xf32>
    %265 = vector.broadcast %264 : vector<4x2x16x1xf32> to vector<4x2x16x16xf32>
    %266 = arith.subf %262, %265 : vector<4x2x16x16xf32>
    %267 = math.exp %266 : vector<4x2x16x16xf32>
    %cst_91 = arith.constant dense<0.000000e+00> : vector<4x2x16xf32>
    %268 = vector.multi_reduction <add>, %267, %cst_91 [3] : vector<4x2x16x16xf32> to vector<4x2x16xf32>
    %269 = vector.shape_cast %268 : vector<4x2x16xf32> to vector<4x2x16x1xf32>
    %270 = vector.broadcast %269 : vector<4x2x16x1xf32> to vector<4x2x16x16xf32>
    %271 = arith.divf %267, %270 : vector<4x2x16x16xf32>
    %cst_92 = arith.constant 0.000000e+00 : f32
    %272 = vector.broadcast %cst_92 : f32 to vector<2x16x32xf32>
    %273 = vector.extract_strided_slice %271 {offsets = [0, 0, 0, 0], sizes = [1, 2, 16, 16], strides = [1, 1, 1, 1]} : vector<4x2x16x16xf32> to vector<1x2x16x16xf32>
    %274 = vector.shape_cast %273 : vector<1x2x16x16xf32> to vector<2x16x16xf32>
    %275 = vector.shape_cast %17 : vector<1x32xf32> to vector<1x1x32xf32>
    %276 = vector.broadcast %275 : vector<1x1x32xf32> to vector<2x16x32xf32>
    %277 = arith.mulf %239, %276 : vector<2x16x32xf32>
    %cst_93 = arith.constant dense<0.000000e+00> : vector<2x16x32xf32>
    %278 = tpu.matmul %274, %277, %cst_93 {dimension_numbers = #tpu.dot_dimension_numbers<[2], [1], [1], [2], [0, 0, 0, 1, 1, 2], [0], [0]>} : vector<2x16x16xf32>, vector<2x16x32xf32>, vector<2x16x32xf32> -> vector<2x16x32xf32>
    %279 = arith.addf %272, %278 : vector<2x16x32xf32>
    %280 = vector.extract_strided_slice %271 {offsets = [1, 0, 0, 0], sizes = [1, 2, 16, 16], strides = [1, 1, 1, 1]} : vector<4x2x16x16xf32> to vector<1x2x16x16xf32>
    %281 = vector.shape_cast %280 : vector<1x2x16x16xf32> to vector<2x16x16xf32>
    %282 = vector.shape_cast %25 : vector<1x32xf32> to vector<1x1x32xf32>
    %283 = vector.broadcast %282 : vector<1x1x32xf32> to vector<2x16x32xf32>
    %284 = arith.mulf %239, %283 : vector<2x16x32xf32>
    %cst_94 = arith.constant dense<0.000000e+00> : vector<2x16x32xf32>
    %285 = tpu.matmul %281, %284, %cst_94 {dimension_numbers = #tpu.dot_dimension_numbers<[2], [1], [1], [2], [0, 0, 0, 1, 1, 2], [0], [0]>} : vector<2x16x16xf32>, vector<2x16x32xf32>, vector<2x16x32xf32> -> vector<2x16x32xf32>
    %286 = arith.addf %279, %285 : vector<2x16x32xf32>
    %287 = vector.extract_strided_slice %271 {offsets = [2, 0, 0, 0], sizes = [1, 2, 16, 16], strides = [1, 1, 1, 1]} : vector<4x2x16x16xf32> to vector<1x2x16x16xf32>
    %288 = vector.shape_cast %287 : vector<1x2x16x16xf32> to vector<2x16x16xf32>
    %289 = vector.shape_cast %33 : vector<1x32xf32> to vector<1x1x32xf32>
    %290 = vector.broadcast %289 : vector<1x1x32xf32> to vector<2x16x32xf32>
    %291 = arith.mulf %239, %290 : vector<2x16x32xf32>
    %cst_95 = arith.constant dense<0.000000e+00> : vector<2x16x32xf32>
    %292 = tpu.matmul %288, %291, %cst_95 {dimension_numbers = #tpu.dot_dimension_numbers<[2], [1], [1], [2], [0, 0, 0, 1, 1, 2], [0], [0]>} : vector<2x16x16xf32>, vector<2x16x32xf32>, vector<2x16x32xf32> -> vector<2x16x32xf32>
    %293 = arith.addf %286, %292 : vector<2x16x32xf32>
    %294 = vector.extract_strided_slice %271 {offsets = [3, 0, 0, 0], sizes = [1, 2, 16, 16], strides = [1, 1, 1, 1]} : vector<4x2x16x16xf32> to vector<1x2x16x16xf32>
    %295 = vector.shape_cast %294 : vector<1x2x16x16xf32> to vector<2x16x16xf32>
    %296 = vector.shape_cast %41 : vector<1x32xf32> to vector<1x1x32xf32>
    %297 = vector.broadcast %296 : vector<1x1x32xf32> to vector<2x16x32xf32>
    %298 = arith.mulf %239, %297 : vector<2x16x32xf32>
    %cst_96 = arith.constant dense<0.000000e+00> : vector<2x16x32xf32>
    %299 = tpu.matmul %295, %298, %cst_96 {dimension_numbers = #tpu.dot_dimension_numbers<[2], [1], [1], [2], [0, 0, 0, 1, 1, 2], [0], [0]>} : vector<2x16x16xf32>, vector<2x16x32xf32>, vector<2x16x32xf32> -> vector<2x16x32xf32>
    %300 = arith.addf %293, %299 : vector<2x16x32xf32>
    %301 = vector.shape_cast %300 : vector<2x16x32xf32> to vector<32x32xf32>
    %c1_97 = arith.constant 1 : index
    %c0_98 = arith.constant 0 : index
    %c0_99 = arith.constant 0 : index
    %302 = vector.load %arg6[%c1_97, %c0_98, %c0_99] : memref<2x32x32xf32, #tpu.memory_space<vmem>>, vector<1x32x32xf32>
    %303 = vector.shape_cast %302 : vector<1x32x32xf32> to vector<32x32xf32>
    %cst_100 = arith.constant dense<0.000000e+00> : vector<32x32xf32>
    %304 = tpu.matmul %301, %303, %cst_100 {dimension_numbers = #tpu.dot_dimension_numbers<[1], [0], [0], [1], [0, 0, 1, 1], [], []>} : vector<32x32xf32>, vector<32x32xf32>, vector<32x32xf32> -> vector<32x32xf32>
    %305 = arith.addf %202, %304 : vector<32x32xf32>
    %c1_101 = arith.constant 1 : index
    %c0_102 = arith.constant 0 : index
    %306 = vector.load %arg7[%c1_101, %c0_102] : memref<2x32xf32, #tpu.memory_space<vmem>>, vector<1x32xf32>
    %307 = vector.shape_cast %306 : vector<1x32xf32> to vector<32xf32>
    %308 = vector.shape_cast %307 : vector<32xf32> to vector<1x32xf32>
    %309 = vector.broadcast %308 : vector<1x32xf32> to vector<32x32xf32>
    %310 = arith.addf %305, %309 : vector<32x32xf32>
    %c1_103 = arith.constant 1 : index
    %c0_104 = arith.constant 0 : index
    %311 = vector.load %arg8[%c1_103, %c0_104] : memref<2x32xf32, #tpu.memory_space<vmem>>, vector<1x32xf32>
    %312 = vector.shape_cast %311 : vector<1x32xf32> to vector<32xf32>
    %c1_105 = arith.constant 1 : index
    %c0_106 = arith.constant 0 : index
    %313 = vector.load %arg9[%c1_105, %c0_106] : memref<2x32xf32, #tpu.memory_space<vmem>>, vector<1x32xf32>
    %314 = vector.shape_cast %313 : vector<1x32xf32> to vector<32xf32>
    %cst_107 = arith.constant dense<0.000000e+00> : vector<32xf32>
    %315 = vector.multi_reduction <add>, %310, %cst_107 [1] : vector<32x32xf32> to vector<32xf32>
    %316 = vector.shape_cast %315 : vector<32xf32> to vector<32x1xf32>
    %cst_108 = arith.constant 3.200000e+01 : f32
    %317 = vector.broadcast %cst_108 : f32 to vector<32x1xf32>
    %318 = arith.divf %316, %317 : vector<32x1xf32>
    %319 = vector.broadcast %318 : vector<32x1xf32> to vector<32x32xf32>
    %320 = arith.subf %310, %319 : vector<32x32xf32>
    %321 = arith.mulf %320, %320 : vector<32x32xf32>
    %cst_109 = arith.constant dense<0.000000e+00> : vector<32xf32>
    %322 = vector.multi_reduction <add>, %321, %cst_109 [1] : vector<32x32xf32> to vector<32xf32>
    %323 = vector.shape_cast %322 : vector<32xf32> to vector<32x1xf32>
    %cst_110 = arith.constant 3.200000e+01 : f32
    %324 = vector.broadcast %cst_110 : f32 to vector<32x1xf32>
    %325 = arith.divf %323, %324 : vector<32x1xf32>
    %326 = vector.broadcast %318 : vector<32x1xf32> to vector<32x32xf32>
    %327 = arith.subf %310, %326 : vector<32x32xf32>
    %cst_111 = arith.constant 9.99999974E-6 : f32
    %328 = vector.broadcast %cst_111 : f32 to vector<32x1xf32>
    %329 = arith.addf %325, %328 : vector<32x1xf32>
    %330 = math.rsqrt %329 : vector<32x1xf32>
    %331 = vector.broadcast %330 : vector<32x1xf32> to vector<32x32xf32>
    %332 = arith.mulf %327, %331 : vector<32x32xf32>
    %333 = vector.shape_cast %312 : vector<32xf32> to vector<1x32xf32>
    %334 = vector.broadcast %333 : vector<1x32xf32> to vector<32x32xf32>
    %335 = arith.mulf %332, %334 : vector<32x32xf32>
    %336 = vector.shape_cast %314 : vector<32xf32> to vector<1x32xf32>
    %337 = vector.broadcast %336 : vector<1x32xf32> to vector<32x32xf32>
    %338 = arith.addf %335, %337 : vector<32x32xf32>
    %c1_112 = arith.constant 1 : index
    %c0_113 = arith.constant 0 : index
    %c0_114 = arith.constant 0 : index
    %339 = vector.load %arg10[%c1_112, %c0_113, %c0_114] : memref<2x32x128xf32, #tpu.memory_space<vmem>>, vector<1x32x128xf32>
    %340 = vector.shape_cast %339 : vector<1x32x128xf32> to vector<32x128xf32>
    %cst_115 = arith.constant dense<0.000000e+00> : vector<32x128xf32>
    %341 = tpu.matmul %338, %340, %cst_115 {dimension_numbers = #tpu.dot_dimension_numbers<[1], [0], [0], [1], [0, 0, 1, 1], [], []>} : vector<32x32xf32>, vector<32x128xf32>, vector<32x128xf32> -> vector<32x128xf32>
    %c1_116 = arith.constant 1 : index
    %c0_117 = arith.constant 0 : index
    %342 = vector.load %arg11[%c1_116, %c0_117] : memref<2x128xf32, #tpu.memory_space<vmem>>, vector<1x128xf32>
    %343 = vector.shape_cast %342 : vector<1x128xf32> to vector<128xf32>
    %344 = vector.shape_cast %343 : vector<128xf32> to vector<1x128xf32>
    %345 = vector.broadcast %344 : vector<1x128xf32> to vector<32x128xf32>
    %346 = arith.addf %341, %345 : vector<32x128xf32>
    %cst_118 = arith.constant 5.000000e-01 : f32
    %347 = vector.broadcast %cst_118 : f32 to vector<32x128xf32>
    %348 = arith.mulf %347, %346 : vector<32x128xf32>
    %cst_119 = arith.constant 0.707106769 : f32
    %349 = vector.broadcast %cst_119 : f32 to vector<32x128xf32>
    %350 = arith.mulf %346, %349 : vector<32x128xf32>
    %351 = math.erf %350 : vector<32x128xf32>
    %cst_120 = arith.constant 1.000000e+00 : f32
    %352 = vector.broadcast %cst_120 : f32 to vector<32x128xf32>
    %353 = arith.addf %352, %351 : vector<32x128xf32>
    %354 = arith.mulf %348, %353 : vector<32x128xf32>
    %c1_121 = arith.constant 1 : index
    %c0_122 = arith.constant 0 : index
    %c0_123 = arith.constant 0 : index
    %355 = vector.load %arg12[%c1_121, %c0_122, %c0_123] : memref<2x128x32xf32, #tpu.memory_space<vmem>>, vector<1x128x32xf32>
    %356 = vector.shape_cast %355 : vector<1x128x32xf32> to vector<128x32xf32>
    %cst_124 = arith.constant dense<0.000000e+00> : vector<32x32xf32>
    %357 = tpu.matmul %354, %356, %cst_124 {dimension_numbers = #tpu.dot_dimension_numbers<[1], [0], [0], [1], [0, 0, 1, 1], [], []>} : vector<32x128xf32>, vector<128x32xf32>, vector<32x32xf32> -> vector<32x32xf32>
    %358 = arith.addf %310, %357 : vector<32x32xf32>
    %c1_125 = arith.constant 1 : index
    %c0_126 = arith.constant 0 : index
    %359 = vector.load %arg13[%c1_125, %c0_126] : memref<2x32xf32, #tpu.memory_space<vmem>>, vector<1x32xf32>
    %360 = vector.shape_cast %359 : vector<1x32xf32> to vector<32xf32>
    %361 = vector.shape_cast %360 : vector<32xf32> to vector<1x32xf32>
    %362 = vector.broadcast %361 : vector<1x32xf32> to vector<32x32xf32>
    %363 = arith.addf %358, %362 : vector<32x32xf32>
    %c0_127 = arith.constant 0 : index
    %c0_128 = arith.constant 0 : index
    %364 = vector.load %arg14[%c0_127, %c0_128] : memref<1x32xf32, #tpu.memory_space<vmem>>, vector<1x32xf32>
    %c0_129 = arith.constant 0 : index
    %c0_130 = arith.constant 0 : index
    %365 = vector.load %arg15[%c0_129, %c0_130] : memref<1x32xf32, #tpu.memory_space<vmem>>, vector<1x32xf32>
    %cst_131 = arith.constant dense<0.000000e+00> : vector<32xf32>
    %366 = vector.multi_reduction <add>, %363, %cst_131 [1] : vector<32x32xf32> to vector<32xf32>
    %367 = vector.shape_cast %366 : vector<32xf32> to vector<32x1xf32>
    %cst_132 = arith.constant 3.200000e+01 : f32
    %368 = vector.broadcast %cst_132 : f32 to vector<32x1xf32>
    %369 = arith.divf %367, %368 : vector<32x1xf32>
    %370 = vector.broadcast %369 : vector<32x1xf32> to vector<32x32xf32>
    %371 = arith.subf %363, %370 : vector<32x32xf32>
    %372 = arith.mulf %371, %371 : vector<32x32xf32>
    %cst_133 = arith.constant dense<0.000000e+00> : vector<32xf32>
    %373 = vector.multi_reduction <add>, %372, %cst_133 [1] : vector<32x32xf32> to vector<32xf32>
    %374 = vector.shape_cast %373 : vector<32xf32> to vector<32x1xf32>
    %cst_134 = arith.constant 3.200000e+01 : f32
    %375 = vector.broadcast %cst_134 : f32 to vector<32x1xf32>
    %376 = arith.divf %374, %375 : vector<32x1xf32>
    %377 = vector.broadcast %369 : vector<32x1xf32> to vector<32x32xf32>
    %378 = arith.subf %363, %377 : vector<32x32xf32>
    %cst_135 = arith.constant 9.99999974E-6 : f32
    %379 = vector.broadcast %cst_135 : f32 to vector<32x1xf32>
    %380 = arith.addf %376, %379 : vector<32x1xf32>
    %381 = math.rsqrt %380 : vector<32x1xf32>
    %382 = vector.broadcast %381 : vector<32x1xf32> to vector<32x32xf32>
    %383 = arith.mulf %378, %382 : vector<32x32xf32>
    %384 = vector.broadcast %364 : vector<1x32xf32> to vector<32x32xf32>
    %385 = arith.mulf %383, %384 : vector<32x32xf32>
    %386 = vector.broadcast %365 : vector<1x32xf32> to vector<32x32xf32>
    %387 = arith.addf %385, %386 : vector<32x32xf32>
    %388 = vector.extract_strided_slice %387 {offsets = [0, 0], sizes = [8, 32], strides = [1, 1]} : vector<32x32xf32> to vector<8x32xf32>
    %c0_136 = arith.constant 0 : index
    %c0_137 = arith.constant 0 : index
    %389 = vector.load %arg16[%c0_136, %c0_137] : memref<8x128xf32, #tpu.memory_space<vmem>>, vector<8x32xf32>
    tpu.vector_store %arg16[%c0_136, %c0_137], %388 {strides = array<i32>} : memref<8x128xf32, #tpu.memory_space<vmem>>, vector<8x32xf32>,
    %390 = vector.extract_strided_slice %387 {offsets = [8, 0], sizes = [8, 32], strides = [1, 1]} : vector<32x32xf32> to vector<8x32xf32>
    %c0_138 = arith.constant 0 : index
    %c32 = arith.constant 32 : index
    %391 = vector.load %arg16[%c0_138, %c32] : memref<8x128xf32, #tpu.memory_space<vmem>>, vector<8x32xf32>
    tpu.vector_store %arg16[%c0_138, %c32], %390 {strides = array<i32>} : memref<8x128xf32, #tpu.memory_space<vmem>>, vector<8x32xf32>,
    %392 = vector.extract_strided_slice %387 {offsets = [16, 0], sizes = [8, 32], strides = [1, 1]} : vector<32x32xf32> to vector<8x32xf32>
    %c0_139 = arith.constant 0 : index
    %c64 = arith.constant 64 : index
    %393 = vector.load %arg16[%c0_139, %c64] : memref<8x128xf32, #tpu.memory_space<vmem>>, vector<8x32xf32>
    tpu.vector_store %arg16[%c0_139, %c64], %392 {strides = array<i32>} : memref<8x128xf32, #tpu.memory_space<vmem>>, vector<8x32xf32>,
    %394 = vector.extract_strided_slice %387 {offsets = [24, 0], sizes = [8, 32], strides = [1, 1]} : vector<32x32xf32> to vector<8x32xf32>
    %c0_140 = arith.constant 0 : index
    %c96 = arith.constant 96 : index
    %395 = vector.load %arg16[%c0_140, %c96] : memref<8x128xf32, #tpu.memory_space<vmem>>, vector<8x32xf32>
    tpu.vector_store %arg16[%c0_140, %c96], %394 {strides = array<i32>} : memref<8x128xf32, #tpu.memory_space<vmem>>, vector<8x32xf32>,
    return
  }
}

</mosaic_0001>

<bundles_post_ra>
// kernel: tpu_custom_call.1
= control target key start
LH: loop header
LB: loop body
LE: loop exit
PB: predicated region body
PF: predicated region fallthrough
CT: control target
= control target key end

     0   :  { %s7441_s0 = inlined_call_operand.vmem [shape: f32[2,16,48], index: 0, kind: input, shape index: {}]   ;;  %s7442_s1 = inlined_call_operand.vmem [shape: f32[48,32], index: 1, kind: input, shape index: {}]   ;;  %s7443_s2 = inlined_call_operand.vmem [shape: f32[1,16,32], index: 2, kind: input, shape index: {}]   ;;  %s7444_s3 = inlined_call_operand.vmem [shape: f32[2,32], index: 3, kind: input, shape index: {}]   ;;  %s7445_s4 = inlined_call_operand.vmem [shape: f32[2,32], index: 4, kind: input, shape index: {}]   ;;  %s7446_s5 = inlined_call_operand.vmem [shape: f32[2,32,96], index: 5, kind: input, shape index: {}]   ;;  %s7447_s6 = inlined_call_operand.vmem [shape: f32[2,32,32], index: 6, kind: input, shape index: {}]   ;;  %s7448_s7 = inlined_call_operand.vmem [shape: f32[2,32], index: 7, kind: input, shape index: {}]   ;;  %s7449_s8 = inlined_call_operand.vmem [shape: f32[2,32], index: 8, kind: input, shape index: {}]   ;;  %s7450_s9 = inlined_call_operand.vmem [shape: f32[2,32], index: 9, kind: input, shape index: {}]   ;;  %s7451_s10 = inlined_call_operand.vmem [shape: f32[2,32,128], index: 10, kind: input, shape index: {}]   ;;  %s7452_s11 = inlined_call_operand.vmem [shape: f32[2,128], index: 11, kind: input, shape index: {}]   ;;  %s7453_s12 = inlined_call_operand.vmem [shape: f32[2,128,32], index: 12, kind: input, shape index: {}]   ;;  %s7454_s13 = inlined_call_operand.vmem [shape: f32[2,32], index: 13, kind: input, shape index: {}]   ;;  %s7455_s14 = inlined_call_operand.vmem [shape: f32[1,32], index: 14, kind: input, shape index: {}]   ;;  %s7456_s15 = inlined_call_operand.vmem [shape: f32[1,32], index: 15, kind: input, shape index: {}]   ;;  %s7457_s16 = inlined_call_operand.hbm [shape: f32[8,128], index: 16, kind: output, shape index: {}]  }
   0x1   :  { %7459 = sst [smem:[#allocation5_spill]] %s7441_s0 }
   0x2   :  { %v58_v0 = vld [vmem:[%s7442_s1] sm:$0xff]  ;;  %v59_v1 = vld [vmem:[%s7442_s1 + $0x8] sm:$0xff]  ;;  %v60_v2 = vld [vmem:[%s7442_s1 + $0x10] sm:$0xff]  ;;  %vm64_vm0 = vcmask 392192   ;;  %s7460_s20 = sld [smem:[#allocation5_spill]] }
   0x3   :  { %v5526_v3 = vpack.c.bf16 %v59_v1, %v58_v0  ;;  %v61_v4 = vld [vmem:[%s7442_s1 + $0x18] sm:$0xff]  ;;  %v62_v6 = vld [vmem:[%s7442_s1 + $0x20] sm:$0xff]  ;;  %v63_v7 = vld [vmem:[%s7442_s1 + $0x28] sm:$0xff] }
   0x4   :  { %v5530_v5 = vpack.c.bf16 %v61_v4, %v60_v2 }
   0x5   :  { %5527 = vmatprep.subr.bf16.mxu0 %v5526_v3 }
   0x8   :  { %v54_v8 = vld [vmem:[%s7460_s20] sm:$0xff] }
   0x9   :  { %5136 = vmatprep.mubr.msk.f32.mxu0 %vm64_vm0, %v54_v8 }
   0xa   :  { %21 = vsyncpa [#allocation3], 0  ;;  %5529 = vmatpush3.bf16.msra.mxu0 %v5526_v3  ;;  %v5534_v9 = vpack.c.bf16 %v63_v7, %v62_v6  ;;  %v55_v10 = vld [vmem:[%s7460_s20 + $0x8] sm:$0xff]  ;;  %v56_v11 = vld [vmem:[%s7460_s20 + $0x10] sm:$0xff]  ;;  %vm188_vm1 = vcmask 261120   ;;  %s6158_s25 = smov 96  }
   0xb   :  { %5531 = vmatprep.subr.bf16.mxu0 %v5530_v5  ;;  %v57_v12 = vld [vmem:[%s7460_s20 + $0x18] sm:$0xff]  ;;  %v162_v13 = vld [vmem:[%s7443_s2] sm:$0xff]  ;;  %v163_v15 = vld [vmem:[%s7443_s2 + $0x8] sm:$0xff]  ;;  %s6159_s26 = smov 64   ;;  %vm1059_vm13 = vcmask 130048   ;;  %s6160_s2 = smov 32  }
   0xc   :  { %v258_v47 = vld [vmem:[%s7446_s5] sm:$0xff]  ;;  %v259_v48 = vld [vmem:[%s7446_s5 + $0x8] sm:$0xff]  ;;  %v260_v50 = vld [vmem:[%s7446_s5 + $0x10] sm:$0xff]  ;;  %vm4702_vm14 = vcmask 523520   ;;  %vm4708_vm15 = vcmask 785920  }
   0xd   :  { %v5538_v49 = vpack.c.bf16 %v259_v48, %v258_v47  ;;  %v261_v51 = vld [vmem:[%s7446_s5 + $0x18] sm:$0xff]  ;;  %v4734_v2 = vld [vmem:[%s7444_s3] ss:$0 sm:$0xff]  ;;  %vm6369_vm12 = vmpackc.low %vm188_vm1, %vm188_vm1 }
   0xe   :  { %5533 = vmatpush3.bf16.msra.mxu0 %v5530_v5  ;;  %v5542_v52 = vpack.c.bf16 %v261_v51, %v260_v50  ;;  %v4735_v4 = vld [vmem:[%s7445_s4] ss:$0 sm:$0xff] }
   0xf   :  { %5535 = vmatprep.subr.bf16.mxu0 %v5534_v9 }
  0x12   :  { %5537 = vmatpush3.bf16.msra.mxu0 %v5534_v9 }
  0x13   :  { %5539 = vmatprep.subr.bf16.mxu0 %v5538_v49 }
  0x15   :  { %5137 = vmatmul.mubr.msk.f32.vlgmr.msra.gmra.mrb[0].mxu0 %vm64_vm0, %v55_v10 }
  0x16   :  { %5139 = vmatprep.mubr.msk.f32.mxu0 %vm64_vm0, %v56_v11  ;;  %5541 = vmatpush3.bf16.msra.mxu0 %v5538_v49 }
  0x17   :  { %5543 = vmatprep.subr.bf16.mxu0 %v5542_v52 }
  0x19   :  { %5140 = vmatmul.mubr.msk.f32.gmra.mrb[2].mxu0 %vm64_vm0, %v57_v12  ;;  %vm4714_vm0 = vcmask 1048320  }
  0x1a   :  { %5545 = vmatpush3.bf16.msra.mxu0 %v5542_v52 }
  0xe8   :  { %v5138_v14 = vpop.f32.mrb[0].mxu0 }
  0xe9   :  { %v143_v16 = vpop.f32.mrb[1].mxu0  ;;  %v6289_v18 = vadd.f32 %v5138_v14, %v163_v15 }
  0xea   :  { %v6287_v17 = vadd.f32 %v162_v13, %v143_v16 }
  0xeb   :  { %v192_v24 = vsel %vm188_vm1, %v6289_v18, 0.0 }
  0xec   :  { %v5141_v19 = vpop.f32.mrb[2].mxu0  ;;  %v189_v20 = vsel %vm188_vm1, %v6287_v17, 0.0 }
  0xed   :  { %190 = vadd.xlane.f32.xlu0 %v189_v20  ;;  %v153_v21 = vpop.f32.mrb[3].mxu0  ;;  %v6295_v23 = vadd.f32 %v5141_v19, %v163_v15 }
  0xee   :  { %v6293_v22 = vadd.f32 %v162_v13, %v153_v21  ;;  %v168_v21 = vlaneseq }
  0xef   :  { %v198_v26 = vsel %vm188_vm1, %v6295_v23, 0.0 }
  0xf0   :  { %v195_v25 = vsel %vm188_vm1, %v6293_v22, 0.0 }
  0xf1   :  { %193 = vadd.xlane.f32.xlu0 %v192_v24  ;;  %196 = vadd.xlane.f32.xlu1 %v195_v25  ;;  %v169_v24 = vand.u32 127, %v168_v21  ;;  %v6157_v25 = vmov 0.0  }
  0xf3   :  { %vm171_vm2 = vcmp.lt.s32.totalorder %v169_v24, 8  ;;  %vm174_vm3 = vcmp.ge.s32.totalorder %v169_v24, 8  ;;  %vm175_vm4 = vcmp.lt.s32.totalorder %v169_v24, 16  ;;  %vm178_vm6 = vcmp.ge.s32.totalorder %v169_v24, 16 }
  0xf4   :  { %vm176_vm5 = vmand %vm174_vm3, %vm175_vm4  ;;  %vm179_vm7 = vcmp.lt.s32.totalorder %v169_v24, 24  ;;  %vm182_vm8 = vcmp.ge.s32.totalorder %v169_v24, 24  ;;  %vm183_vm9 = vcmp.lt.s32.totalorder %v169_v24, 32 }
  0xf5   :  { %199 = vadd.xlane.f32.xlu1 %v198_v26  ;;  %v6333_v26 = vsel %vm171_vm2, 1.0, %v6157_v25  ;;  %vm180_vm10 = vmand %vm178_vm6, %vm179_vm7 }
  0xf6   :  { %vm184_vm11 = vmand %vm182_vm8, %vm183_vm9 }
 0x17a   :  { %v191_v27 = vpop.xlane.xlu0 %190 }
 0x17b   :  { %v202_v28 = vmul.f32 0.03125, %v191_v27 }
 0x17d   :  { %v206_v29 = vsub.f32 %v6287_v17, %v202_v28 }
 0x17e   :  { %v194_v30 = vpop.xlane.xlu0 %193  ;;  %v197_v31 = vpop.xlane.xlu1 %196 }
 0x17f   :  { %v203_v32 = vmul.f32 0.03125, %v194_v30  ;;  %v204_v33 = vmul.f32 0.03125, %v197_v31  ;;  %v210_v34 = vmul.f32 %v206_v29, %v206_v29  ;;  %v6343_v31 = vsel %vm176_vm5, 1.0, %v6157_v25 }
 0x181   :  { %v207_v35 = vsub.f32 %v6289_v18, %v203_v32  ;;  %v208_v36 = vsub.f32 %v6293_v22, %v204_v33  ;;  %v214_v37 = vsel %vm188_vm1, %v210_v34, 0.0  ;;  %v5849_v33 = vpack.i.bf16 %v6333_v26, %v6343_v31 }
 0x182   :  { %215 = vadd.xlane.f32.xlu0 %v214_v37  ;;  %v200_v38 = vpop.xlane.xlu1 %199  ;;  %v6357_v37 = vsel %vm180_vm10, 1.0, %v6157_v25 }
 0x183   :  { %v205_v39 = vmul.f32 0.03125, %v200_v38  ;;  %v211_v40 = vmul.f32 %v207_v35, %v207_v35  ;;  %v212_v41 = vmul.f32 %v208_v36, %v208_v36  ;;  %v6359_v38 = vsel %vm184_vm11, 1.0, %v6157_v25 }
 0x185   :  { %v209_v42 = vsub.f32 %v6295_v23, %v205_v39  ;;  %v217_v43 = vsel %vm188_vm1, %v211_v40, 0.0  ;;  %v220_v44 = vsel %vm188_vm1, %v212_v41, 0.0  ;;  %v5854_v39 = vpack.i.bf16 %v6359_v38, %v6357_v37 }
 0x186   :  { %218 = vadd.xlane.f32.xlu1 %v217_v43  ;;  %221 = vadd.xlane.f32.xlu0 %v220_v44 }
 0x187   :  { %v213_v45 = vmul.f32 %v209_v42, %v209_v42 }
 0x189   :  { %v223_v46 = vsel %vm188_vm1, %v213_v45, 0.0 }
 0x18a   :  { %224 = vadd.xlane.f32.xlu1 %v223_v46 }
 0x20f   :  { %v216_v53 = vpop.xlane.xlu0 %215 }
 0x210   :  { %v226_v54 = vmul.f32 0.03125, %v216_v53 }
 0x212   :  { %v230_v55 = vadd.f32 1e-05, %v226_v54 }
 0x213   :  { %v222_v56 = vpop.xlane.xlu0 %221  ;;  %v219_v57 = vpop.xlane.xlu1 %218 }
 0x214   :  { %5949 = vrsqrt.f32 %v230_v55  ;;  %v228_v58 = vmul.f32 0.03125, %v222_v56  ;;  %v227_v59 = vmul.f32 0.03125, %v219_v57 }
 0x216   :  { %v232_v60 = vadd.f32 1e-05, %v228_v58  ;;  %v231_v61 = vadd.f32 1e-05, %v227_v59 }
 0x217   :  { %v225_v62 = vpop.xlane.xlu1 %224 }
 0x218   :  { %5951 = vrsqrt.f32 %v232_v60  ;;  %v229_v63 = vmul.f32 0.03125, %v225_v62 }
 0x219   :  { %5953 = vrsqrt.f32 %v231_v61 }
 0x21a   :  { %v233_v0 = vadd.f32 1e-05, %v229_v63 }
 0x21c   :  { %5955 = vrsqrt.f32 %v233_v0 }
 0x21e   :  { %v5950_v1 = vpop.eup %5949 }
 0x21f   :  { %v238_v3 = vmul.f32 %v5950_v1, %v206_v29 }
 0x221   :  { %v246_v5 = vmul.f32 %v4734_v2, %v238_v3 }
 0x222   :  { %v5952_v6 = vpop.eup %5951 }
 0x223   :  { %v5954_v7 = vpop.eup %5953  ;;  %v254_v8 = vadd.f32 %v4735_v4, %v246_v5  ;;  %v240_v9 = vmul.f32 %v5952_v6, %v208_v36 }
 0x224   :  { %v239_v10 = vmul.f32 %v5954_v7, %v207_v35 }
 0x225   :  { %5150 = vmatprep.mubr.msk.f32.mxu0 %vm188_vm1, %v254_v8  ;;  %v248_v11 = vmul.f32 %v4734_v2, %v240_v9 }
 0x226   :  { %v5956_v12 = vpop.eup %5955  ;;  %v247_v13 = vmul.f32 %v4734_v2, %v239_v10 }
 0x227   :  { %v256_v14 = vadd.f32 %v4735_v4, %v248_v11  ;;  %v241_v15 = vmul.f32 %v5956_v12, %v209_v42 }
 0x228   :  { %v255_v16 = vadd.f32 %v4735_v4, %v247_v13 }
 0x229   :  { %v249_v19 = vmul.f32 %v4734_v2, %v241_v15 }
 0x22a   :  { %5151 = vmatmul.mubr.msk.f32.vlgmr.msra.gmra.mrb[4].mxu0 %vm188_vm1, %v255_v16 }
 0x22b   :  { %5153 = vmatprep.mubr.msk.f32.mxu0 %vm188_vm1, %v256_v14  ;;  %v257_v20 = vadd.f32 %v4735_v4, %v249_v19 }
 0x22e   :  { %5154 = vmatmul.mubr.msk.f32.gmra.mrb[6].mxu0 %vm188_vm1, %v257_v20 }
 0x2fd   :  { %v6335_v27 = vpop.f32.mrb[4].mxu0 }
 0x2fe   :  { %v6337_v28 = vpop.f32.mrb[5].mxu0  ;;  %v360_v1 = vmul.f32 %v6335_v27, %v6333_v26  ;;  %v546_v21 = vmul.f32 %v6335_v27, %v6343_v31 }
 0x2ff   :  { %v5839_v29 = vpack.i.bf16 %v6335_v27, %v6337_v28  ;;  %v359_v30 = vmul.f32 %v6337_v28, %v6333_v26  ;;  %v545_v2 = vmul.f32 %v6337_v28, %v6343_v31  ;;  %v711_v24 = vmul.f32 %v6337_v28, %v6357_v37 }
 0x301   :  { %5840 = vrot.lane.b32.xlu0 %v5839_v29, %s6158_s25  ;;  %v6346_v32 = vpop.f32.mrb[6].mxu0  ;;  %5160 = vmatprep.mubr.msk.f32.mxu1 %vm188_vm1, %v359_v30  ;;  %v712_v30 = vmul.f32 %v6335_v27, %v6357_v37 }
 0x302   :  { %v6351_v34 = vpop.f32.mrb[7].mxu0  ;;  %v362_v16 = vmul.f32 %v6346_v32, %v6333_v26  ;;  %v548_v25 = vmul.f32 %v6346_v32, %v6343_v31 }
 0x303   :  { %v5844_v35 = vpack.i.bf16 %v6346_v32, %v6351_v34  ;;  %v361_v36 = vmul.f32 %v6351_v34, %v6333_v26  ;;  %v547_v20 = vmul.f32 %v6351_v34, %v6343_v31  ;;  %v713_v29 = vmul.f32 %v6351_v34, %v6357_v37 }
 0x305   :  { %5850 = vrot.lane.b32.xlu0 %v5849_v33, %s6159_s26  ;;  %5845 = vrot.lane.b32.xlu1 %v5844_v35, %s6158_s25  ;;  %v877_v33 = vmul.f32 %v6337_v28, %v6359_v38  ;;  %v714_v35 = vmul.f32 %v6346_v32, %v6357_v37 }
 0x306   :  { %5167 = vmatprep.mubr.msk.f32.mxu0 %vm188_vm1, %v361_v36  ;;  %v879_v36 = vmul.f32 %v6351_v34, %v6359_v38 }
 0x309   :  { %5855 = vrot.lane.b32.xlu1 %v5854_v39, %s6159_s26  ;;  %v880_v39 = vmul.f32 %v6346_v32, %v6359_v38 }
 0x373   :  { %v5841_v40 = vpop.permute.xlu0 %5840 }
 0x374   :  { %v5843_v41 = vunpack.i.h.bf16 %v5841_v40  ;;  %v5842_v42 = vunpack.i.l.bf16 %v5841_v40 }
 0x376   :  { %v6373_v44 = vpack.c.bf16 %v5843_v41, %v5842_v42 }
 0x377   :  { %v5851_v45 = vpop.permute.xlu0 %5850  ;;  %v5846_v46 = vpop.permute.xlu1 %5845 }
 0x378   :  { %v6375_v47 = vunpack.i.h.bf16 %v5851_v45  ;;  %v6377_v48 = vunpack.i.l.bf16 %v5851_v45  ;;  %v5848_v49 = vunpack.i.h.bf16 %v5846_v46  ;;  %v5847_v50 = vunpack.i.l.bf16 %v5846_v46  ;;  %5548 = vmatprep.subr.msk.bf16.mxu1 %vm6369_vm12, %v6373_v44 }
 0x379   :  { %5551 = vmatpush3.bf16.xpose.msk.msra.mxu1 %vm6369_vm12, %v6373_v44 }
 0x37a   :  { %v6385_v51 = vpack.c.bf16 %v5848_v49, %v5847_v50  ;;  %5560 = vmatprep.subr.msk.bf16.mxu1 %vm6369_vm12, %v6373_v44  ;;  %v1248_v52 = vmul.f32 %v6377_v48, %v6337_v28  ;;  %v1249_v53 = vmul.f32 %v6377_v48, %v6335_v27  ;;  %v1240_v54 = vmul.f32 %v6375_v47, %v6337_v28 }
 0x37b   :  { %v5856_v55 = vpop.permute.xlu1 %5855  ;;  %v1241_v56 = vmul.f32 %v6375_v47, %v6335_v27  ;;  %v1250_v57 = vmul.f32 %v6377_v48, %v6351_v34  ;;  %v1251_v58 = vmul.f32 %v6377_v48, %v6346_v32  ;;  %v6404_v59 = vmul.f32 %v6375_v47, %v6351_v34 }
 0x37c   :  { %v6406_v60 = vunpack.i.h.bf16 %v5856_v55  ;;  %v6408_v61 = vunpack.i.l.bf16 %v5856_v55  ;;  %5554 = vmatprep.subr.msk.bf16.mxu0 %vm6369_vm12, %v6385_v51  ;;  %v5859_v62 = vpack.i.bf16 %v1249_v53, %v1248_v52  ;;  %v6415_v63 = vmul.f32 %v6375_v47, %v6346_v32 }
 0x37d   :  { %5557 = vmatpush3.bf16.xpose.msk.msra.mxu0 %vm6369_vm12, %v6385_v51  ;;  %v5864_v0 = vpack.i.bf16 %v1241_v56, %v1240_v54  ;;  %v5869_v3 = vpack.i.bf16 %v1251_v58, %v1250_v57 }
 0x37e   :  { %5860 = vrot.lane.b32.xlu0 %v5859_v62, %s6159_s26  ;;  %5566 = vmatprep.subr.msk.bf16.mxu0 %vm6369_vm12, %v6385_v51  ;;  %v5879_v4 = vpack.i.bf16 %v6415_v63, %v6404_v59  ;;  %v6432_v5 = vmul.f32 %v6406_v60, %v6337_v28  ;;  %v6436_v6 = vmul.f32 %v6406_v60, %v6335_v27 }
 0x37f   :  { %5865 = vrot.lane.b32.xlu1 %v5864_v0, %s6159_s26  ;;  %v6441_v7 = vmul.f32 %v6408_v61, %v6337_v28  ;;  %v6445_v8 = vmul.f32 %v6408_v61, %v6335_v27  ;;  %v6449_v9 = vmul.f32 %v6406_v60, %v6351_v34  ;;  %v6453_v10 = vmul.f32 %v6406_v60, %v6346_v32 }
 0x380   :  { %5161 = vmatmul.mubr.msk.f32.vlgmr.msra.gmra.mrb[0].mxu1 %vm188_vm1, %v360_v1  ;;  %v5884_v11 = vpack.i.bf16 %v6436_v6, %v6432_v5  ;;  %v6460_v12 = vmul.f32 %v6408_v61, %v6351_v34  ;;  %v6464_v13 = vmul.f32 %v6408_v61, %v6346_v32  ;;  %v878_v28 = vmul.f32 %v6335_v27, %v6359_v38 }
 0x381   :  { %5563 = vmatpush3.bf16.xpose.msk.msra.mxu1 %vm6369_vm12, %v6373_v44  ;;  %5174 = vmatprep.mubr.msk.f32.mxu1 %vm188_vm1, %v545_v2  ;;  %v5874_v14 = vpack.i.bf16 %v6445_v8, %v6441_v7  ;;  %v5894_v15 = vpack.i.bf16 %v6453_v10, %v6449_v9 }
 0x382   :  { %5572 = vmatprep.subr.msk.bf16.mxu1 %vm6369_vm12, %v6373_v44  ;;  %v5889_v19 = vpack.i.bf16 %v6464_v13, %v6460_v12 }
 0x383   :  { %5870 = vrot.lane.b32.xlu1 %v5869_v3, %s6159_s26 }
 0x384   :  { %5168 = vmatmul.mubr.msk.f32.vlgmr.msra.gmra.mrb[8].mxu0 %vm188_vm1, %v362_v16 }
 0x385   :  { %5569 = vmatpush3.bf16.xpose.msk.msra.mxu0 %vm6369_vm12, %v6385_v51  ;;  %5181 = vmatprep.mubr.msk.f32.mxu0 %vm188_vm1, %v547_v20 }
 0x386   :  { %5578 = vmatprep.subr.msk.bf16.mxu0 %vm6369_vm12, %v6385_v51 }
 0x388   :  { %5175 = vmatmul.mubr.msk.f32.vlgmr.msra.gmra.mrb[2].mxu1 %vm188_vm1, %v546_v21 }
 0x389   :  { %5575 = vmatpush3.bf16.xpose.msk.msra.mxu1 %vm6369_vm12, %v6373_v44  ;;  %5188 = vmatprep.mubr.msk.f32.mxu1 %vm188_vm1, %v711_v24 }
 0x38a   :  { %5584 = vmatprep.subr.msk.bf16.mxu1 %vm6369_vm12, %v6373_v44 }
 0x38c   :  { %5182 = vmatmul.mubr.msk.f32.vlgmr.msra.gmra.mrb[10].mxu0 %vm188_vm1, %v548_v25 }
 0x38d   :  { %5581 = vmatpush3.bf16.xpose.msk.msra.mxu0 %vm6369_vm12, %v6385_v51  ;;  %5195 = vmatprep.mubr.msk.f32.mxu0 %vm188_vm1, %v713_v29 }
 0x38e   :  { %5590 = vmatprep.subr.msk.bf16.mxu0 %vm6369_vm12, %v6385_v51 }
 0x390   :  { %5189 = vmatmul.mubr.msk.f32.vlgmr.msra.gmra.mrb[4].mxu1 %vm188_vm1, %v712_v30 }
 0x391   :  { %5587 = vmatpush3.bf16.xpose.msk.msra.mxu1 %vm6369_vm12, %v6373_v44  ;;  %5202 = vmatprep.mubr.msk.f32.mxu1 %vm188_vm1, %v877_v33 }
 0x394   :  { %5196 = vmatmul.mubr.msk.f32.vlgmr.msra.gmra.mrb[12].mxu0 %vm188_vm1, %v714_v35 }
 0x395   :  { %5593 = vmatpush3.bf16.xpose.msk.msra.mxu0 %vm6369_vm12, %v6385_v51  ;;  %5209 = vmatprep.mubr.msk.f32.mxu0 %vm188_vm1, %v879_v36 }
 0x398   :  { %5203 = vmatmul.mubr.msk.f32.vlgmr.msra.gmra.mrb[6].mxu1 %vm188_vm1, %v878_v28 }
 0x39c   :  { %5210 = vmatmul.mubr.msk.f32.vlgmr.msra.gmra.mrb[14].mxu0 %vm188_vm1, %v880_v39 }
 0x3f0   :  { %v5861_v40 = vpop.permute.xlu0 %5860 }
 0x3f1   :  { %v5863_v34 = vunpack.i.h.bf16 %v5861_v40  ;;  %v5862_v41 = vunpack.i.l.bf16 %v5861_v40  ;;  %v5866_v42 = vpop.permute.xlu1 %5865 }
 0x3f2   :  { %v5868_v44 = vunpack.i.h.bf16 %v5866_v42  ;;  %v5867_v45 = vunpack.i.l.bf16 %v5866_v42 }
 0x3f3   :  { %v5594_v46 = vpack.c.bf16 %v5863_v34, %v5862_v41 }
 0x3f4   :  { %v5602_v49 = vpack.c.bf16 %v5868_v44, %v5867_v45 }
 0x3f5   :  { %v5871_v50 = vpop.permute.xlu1 %5870  ;;  %5595 = vmatprep.subr.bf16.mxu0 %v5594_v46 }
 0x3f6   :  { %v5873_v51 = vunpack.i.h.bf16 %v5871_v50  ;;  %v5872_v52 = vunpack.i.l.bf16 %v5871_v50  ;;  %5603 = vmatprep.subr.bf16.mxu1 %v5602_v49  ;;  %5597 = vmatpush3.bf16.msra.mxu0 %v5594_v46 }
 0x3f7   :  { %5605 = vmatpush3.bf16.msra.mxu1 %v5602_v49 }
 0x3f8   :  { %v6540_v27 = vpack.c.bf16 %v5873_v51, %v5872_v52 }
 0x3fa   :  { %5599 = vmatprep.subr.bf16.mxu0 %v6540_v27 }
 0x453   :  { %v5162_v32 = vpop.f32.mrb[0].mxu1 }
 0x454   :  { %v6543_v53 = vmul.f32 0.35355338, %v5162_v32  ;;  %v445_v54 = vpop.f32.mrb[1].mxu1 }
 0x455   :  { %v6545_v55 = vmul.f32 0.35355338, %v445_v54 }
 0x456   :  { %v1063_v56 = vsel %vm1059_vm13, %v6543_v53, -inf }
 0x457   :  { %1064 = vmax.xlane.f32.xlu1 %v1063_v56  ;;  %v5169_v57 = vpop.f32.mrb[8].mxu0  ;;  %v1060_v58 = vsel %vm1059_vm13, %v6545_v55, -inf }
 0x458   :  { %v6551_v62 = vmul.f32 0.35355338, %v5169_v57  ;;  %1061 = vmax.xlane.f32.xlu0 %v1060_v58  ;;  %v536_v0 = vpop.f32.mrb[9].mxu0 }
 0x459   :  { %v6553_v1 = vmul.f32 0.35355338, %v536_v0 }
 0x45a   :  { %v1069_v2 = vsel %vm1059_vm13, %v6551_v62, -inf }
 0x45b   :  { %v5176_v3 = vpop.f32.mrb[2].mxu1  ;;  %1070 = vmax.xlane.f32.xlu1 %v1069_v2  ;;  %v1066_v16 = vsel %vm1059_vm13, %v6553_v1, -inf }
 0x45c   :  { %v6559_v20 = vmul.f32 0.35355338, %v5176_v3  ;;  %v621_v21 = vpop.f32.mrb[3].mxu1  ;;  %1067 = vmax.xlane.f32.xlu0 %v1066_v16 }
 0x45d   :  { %v6561_v24 = vmul.f32 0.35355338, %v621_v21 }
 0x45e   :  { %v1075_v25 = vsel %vm1059_vm13, %v6559_v20, -inf }
 0x45f   :  { %v5183_v29 = vpop.f32.mrb[10].mxu0  ;;  %v1072_v30 = vsel %vm1059_vm13, %v6561_v24, -inf }
 0x460   :  { %v6567_v33 = vmul.f32 0.35355338, %v5183_v29  ;;  %1073 = vmax.xlane.f32.xlu1 %v1072_v30  ;;  %1076 = vmax.xlane.f32.xlu0 %v1075_v25  ;;  %v702_v35 = vpop.f32.mrb[11].mxu0 }
 0x461   :  { %v6569_v36 = vmul.f32 0.35355338, %v702_v35 }
 0x462   :  { %v1081_v28 = vsel %vm1059_vm13, %v6567_v33, -inf }
 0x463   :  { %v5190_v39 = vpop.f32.mrb[4].mxu1  ;;  %v1078_v40 = vsel %vm1059_vm13, %v6569_v36, -inf }
 0x464   :  { %v6575_v34 = vmul.f32 0.35355338, %v5190_v39  ;;  %v787_v41 = vpop.f32.mrb[5].mxu1  ;;  %1082 = vmax.xlane.f32.xlu1 %v1081_v28  ;;  %1079 = vmax.xlane.f32.xlu0 %v1078_v40 }
 0x465   :  { %v6577_v42 = vmul.f32 0.35355338, %v787_v41 }
 0x466   :  { %v1087_v44 = vsel %vm1059_vm13, %v6575_v34, -inf }
 0x467   :  { %v5197_v45 = vpop.f32.mrb[12].mxu0  ;;  %v1084_v46 = vsel %vm1059_vm13, %v6577_v42, -inf }
 0x468   :  { %v6583_v49 = vmul.f32 0.35355338, %v5197_v45  ;;  %1088 = vmax.xlane.f32.xlu1 %v1087_v44  ;;  %1085 = vmax.xlane.f32.xlu0 %v1084_v46  ;;  %v868_v50 = vpop.f32.mrb[13].mxu0 }
 0x469   :  { %v6585_v51 = vmul.f32 0.35355338, %v868_v50 }
 0x46a   :  { %v1093_v52 = vsel %vm1059_vm13, %v6583_v49, -inf }
 0x46b   :  { %v5204_v32 = vpop.f32.mrb[6].mxu1  ;;  %v1090_v54 = vsel %vm1059_vm13, %v6585_v51, -inf }
 0x46c   :  { %v6591_v56 = vmul.f32 0.35355338, %v5204_v32  ;;  %v953_v57 = vpop.f32.mrb[7].mxu1  ;;  %1094 = vmax.xlane.f32.xlu1 %v1093_v52  ;;  %1091 = vmax.xlane.f32.xlu0 %v1090_v54 }
 0x46d   :  { %v6593_v58 = vmul.f32 0.35355338, %v953_v57 }
 0x46e   :  { %v1099_v0 = vsel %vm1059_vm13, %v6591_v56, -inf }
 0x46f   :  { %v5211_v2 = vpop.f32.mrb[14].mxu0  ;;  %v1096_v3 = vsel %vm1059_vm13, %v6593_v58, -inf }
 0x470   :  { %v6599_v16 = vmul.f32 0.35355338, %v5211_v2  ;;  %1100 = vmax.xlane.f32.xlu1 %v1099_v0  ;;  %1097 = vmax.xlane.f32.xlu0 %v1096_v3  ;;  %v1034_v21 = vpop.f32.mrb[15].mxu0 }
 0x471   :  { %v6601_v25 = vmul.f32 0.35355338, %v1034_v21 }
 0x472   :  { %v1105_v29 = vsel %vm1059_vm13, %v6599_v16, -inf }
 0x473   :  { %v1102_v30 = vsel %vm1059_vm13, %v6601_v25, -inf }
 0x474   :  { %1106 = vmax.xlane.f32.xlu1 %v1105_v29  ;;  %1103 = vmax.xlane.f32.xlu0 %v1102_v30 }
 0x485   :  { %5880 = vrot.lane.b32.xlu1 %v5879_v4, %s6159_s26 }
 0x489   :  { %5885 = vrot.lane.b32.xlu1 %v5884_v11, %s6159_s26 }
 0x48a   :  { %5875 = vrot.lane.b32.xlu0 %v5874_v14, %s6159_s26 }
 0x4e4   :  { %v1065_v35 = vpop.xlane.xlu1 %1064 }
 0x4e5   :  { %v1109_v28 = vsub.f32 %v6543_v53, %v1065_v35  ;;  %v1062_v39 = vpop.xlane.xlu0 %1061 }
 0x4e6   :  { %v1108_v40 = vsub.f32 %v6545_v55, %v1062_v39 }
 0x4e7   :  { %v1126_v41 = vmul.f32 1.442695, %v1109_v28 }
 0x4e8   :  { %v1124_v44 = vmul.f32 1.442695, %v1108_v40  ;;  %v1071_v59 = vpop.xlane.xlu1 %1070 }
 0x4e9   :  { %5957 = vpow2.f32 %v1126_v41  ;;  %v1111_v63 = vsub.f32 %v6551_v62, %v1071_v59  ;;  %v1068_v4 = vpop.xlane.xlu0 %1067 }
 0x4ea   :  { %5959 = vpow2.f32 %v1124_v44  ;;  %v1110_v5 = vsub.f32 %v6553_v1, %v1068_v4 }
 0x4eb   :  { %v1130_v6 = vmul.f32 1.442695, %v1111_v63 }
 0x4ec   :  { %v1128_v11 = vmul.f32 1.442695, %v1110_v5 }
 0x4ed   :  { %5961 = vpow2.f32 %v1130_v6  ;;  %v1074_v7 = vpop.xlane.xlu1 %1073  ;;  %v1077_v8 = vpop.xlane.xlu0 %1076 }
 0x4ee   :  { %5963 = vpow2.f32 %v1128_v11  ;;  %v1112_v14 = vsub.f32 %v6561_v24, %v1074_v7  ;;  %v1113_v53 = vsub.f32 %v6559_v20, %v1077_v8 }
 0x4f0   :  { %v1132_v55 = vmul.f32 1.442695, %v1112_v14  ;;  %v1134_v45 = vmul.f32 1.442695, %v1113_v53 }
 0x4f1   :  { %v1083_v46 = vpop.xlane.xlu1 %1082  ;;  %v1080_v50 = vpop.xlane.xlu0 %1079 }
 0x4f2   :  { %5965 = vpow2.f32 %v1132_v55  ;;  %v1115_v62 = vsub.f32 %v6567_v33, %v1083_v46  ;;  %v1114_v52 = vsub.f32 %v6569_v36, %v1080_v50 }
 0x4f3   :  { %v6627_v1 = vpop.eup %5957  ;;  %5967 = vpow2.f32 %v1134_v45 }
 0x4f4   :  { %v6629_v32 = vpop.eup %5959  ;;  %v1138_v54 = vmul.f32 1.442695, %v1115_v62  ;;  %v1136_v57 = vmul.f32 1.442695, %v1114_v52  ;;  %v1159_v24 = vsel %vm1059_vm13, %v6627_v1, 0.0 }
 0x4f5   :  { %v1089_v20 = vpop.xlane.xlu1 %1088  ;;  %v1086_v0 = vpop.xlane.xlu0 %1085  ;;  %1160 = vadd.xlane.f32.xlu1 %v1159_v24  ;;  %v1156_v2 = vsel %vm1059_vm13, %v6629_v32, 0.0 }
 0x4f6   :  { %5969 = vpow2.f32 %v1138_v54  ;;  %v1117_v33 = vsub.f32 %v6575_v34, %v1089_v20  ;;  %v1116_v36 = vsub.f32 %v6577_v42, %v1086_v0  ;;  %1157 = vadd.xlane.f32.xlu0 %v1156_v2 }
 0x4f7   :  { %v6637_v3 = vpop.eup %5961  ;;  %5971 = vpow2.f32 %v1136_v57 }
 0x4f8   :  { %v6639_v21 = vpop.eup %5963  ;;  %v1142_v29 = vmul.f32 1.442695, %v1117_v33  ;;  %v1140_v30 = vmul.f32 1.442695, %v1116_v36  ;;  %v1165_v35 = vsel %vm1059_vm13, %v6637_v3, 0.0 }
 0x4f9   :  { %v1095_v28 = vpop.xlane.xlu1 %1094  ;;  %v1092_v39 = vpop.xlane.xlu0 %1091  ;;  %1166 = vadd.xlane.f32.xlu1 %v1165_v35  ;;  %v1162_v40 = vsel %vm1059_vm13, %v6639_v21, 0.0 }
 0x4fa   :  { %5973 = vpow2.f32 %v1142_v29  ;;  %v1119_v34 = vsub.f32 %v6583_v49, %v1095_v28  ;;  %v1118_v42 = vsub.f32 %v6585_v51, %v1092_v39  ;;  %1163 = vadd.xlane.f32.xlu0 %v1162_v40 }
 0x4fb   :  { %5975 = vpow2.f32 %v1140_v30 }
 0x4fc   :  { %v6647_v41 = vpop.eup %5965  ;;  %v1146_v44 = vmul.f32 1.442695, %v1119_v34  ;;  %v1144_v59 = vmul.f32 1.442695, %v1118_v42 }
 0x4fd   :  { %v6649_v63 = vpop.eup %5967  ;;  %v1101_v4 = vpop.xlane.xlu1 %1100  ;;  %v1168_v6 = vsel %vm1059_vm13, %v6647_v41, 0.0 }
 0x4fe   :  { %v1098_v5 = vpop.xlane.xlu0 %1097  ;;  %5977 = vpow2.f32 %v1146_v44  ;;  %v1121_v11 = vsub.f32 %v6591_v56, %v1101_v4  ;;  %1169 = vadd.xlane.f32.xlu1 %v1168_v6  ;;  %v1171_v51 = vsel %vm1059_vm13, %v6649_v63, 0.0 }
 0x4ff   :  { %v1120_v49 = vsub.f32 %v6593_v58, %v1098_v5  ;;  %5979 = vpow2.f32 %v1144_v59  ;;  %1172 = vadd.xlane.f32.xlu0 %v1171_v51 }
 0x500   :  { %v6657_v7 = vpop.eup %5969  ;;  %v1150_v8 = vmul.f32 1.442695, %v1121_v11 }
 0x501   :  { %v1148_v14 = vmul.f32 1.442695, %v1120_v49  ;;  %v6659_v53 = vpop.eup %5971  ;;  %v1107_v55 = vpop.xlane.xlu1 %1106  ;;  %v1177_v46 = vsel %vm1059_vm13, %v6657_v7, 0.0 }
 0x502   :  { %v1104_v45 = vpop.xlane.xlu0 %1103  ;;  %5981 = vpow2.f32 %v1150_v8  ;;  %v1123_v56 = vsub.f32 %v6599_v16, %v1107_v55  ;;  %1178 = vadd.xlane.f32.xlu1 %v1177_v46  ;;  %v1174_v50 = vsel %vm1059_vm13, %v6659_v53, 0.0 }
 0x503   :  { %v1122_v58 = vsub.f32 %v6601_v25, %v1104_v45  ;;  %5983 = vpow2.f32 %v1148_v14  ;;  %1175 = vadd.xlane.f32.xlu0 %v1174_v50 }
 0x504   :  { %v6667_v62 = vpop.eup %5973  ;;  %v1154_v52 = vmul.f32 1.442695, %v1123_v56 }
 0x505   :  { %v1152_v54 = vmul.f32 1.442695, %v1122_v58  ;;  %v6669_v57 = vpop.eup %5975  ;;  %v1183_v20 = vsel %vm1059_vm13, %v6667_v62, 0.0  ;;  %v5881_v4 = vpop.permute.xlu1 %5880 }
 0x506   :  { %v5876_v24 = vpop.permute.xlu0 %5875  ;;  %5985 = vpow2.f32 %v1154_v52  ;;  %1184 = vadd.xlane.f32.xlu1 %v1183_v20  ;;  %v1180_v0 = vsel %vm1059_vm13, %v6669_v57, 0.0  ;;  %v5883_v52 = vunpack.i.h.bf16 %v5881_v4 }
 0x507   :  { %v5878_v16 = vunpack.i.h.bf16 %v5876_v24  ;;  %5987 = vpow2.f32 %v1152_v54  ;;  %v5877_v25 = vunpack.i.l.bf16 %v5876_v24  ;;  %1181 = vadd.xlane.f32.xlu0 %v1180_v0  ;;  %v5882_v54 = vunpack.i.l.bf16 %v5881_v4 }
 0x508   :  { %v6675_v2 = vpop.eup %5977 }
 0x509   :  { %v6677_v33 = vpop.eup %5979  ;;  %v5610_v36 = vpack.c.bf16 %v5878_v16, %v5877_v25  ;;  %v1189_v29 = vsel %vm1059_vm13, %v6675_v2, 0.0  ;;  %v5886_v5 = vpop.permute.xlu1 %5885 }
 0x50a   :  { %1190 = vadd.xlane.f32.xlu1 %v1189_v29  ;;  %v1186_v30 = vsel %vm1059_vm13, %v6677_v33, 0.0  ;;  %v5888_v10 = vunpack.i.h.bf16 %v5886_v5 }
 0x50b   :  { %5611 = vmatprep.subr.bf16.mxu1 %v5610_v36  ;;  %1187 = vadd.xlane.f32.xlu0 %v1186_v30 }
 0x50c   :  { %v6683_v35 = vpop.eup %5981 }
 0x50d   :  { %v6685_v28 = vpop.eup %5983  ;;  %v1195_v39 = vsel %vm1059_vm13, %v6683_v35, 0.0 }
 0x50e   :  { %1196 = vadd.xlane.f32.xlu1 %v1195_v39  ;;  %v1192_v40 = vsel %vm1059_vm13, %v6685_v28, 0.0 }
 0x50f   :  { %1193 = vadd.xlane.f32.xlu0 %v1192_v40 }
 0x510   :  { %v6691_v34 = vpop.eup %5985 }
 0x511   :  { %v6693_v42 = vpop.eup %5987  ;;  %v1201_v44 = vsel %vm1059_vm13, %v6691_v34, 0.0 }
 0x512   :  { %v1198_v59 = vsel %vm1059_vm13, %v6693_v42, 0.0 }
 0x513   :  { %1199 = vadd.xlane.f32.xlu1 %v1198_v59  ;;  %1202 = vadd.xlane.f32.xlu0 %v1201_v44 }
 0x524   :  { %5895 = vrot.lane.b32.xlu1 %v5894_v15, %s6159_s26  ;;  %v5887_v15 = vunpack.i.l.bf16 %v5886_v5 }
 0x526   :  { %v5618_v46 = vpack.c.bf16 %v5888_v10, %v5887_v15 }
 0x529   :  { %5890 = vrot.lane.b32.xlu0 %v5889_v19, %s6159_s26 }
 0x582   :  { %v1161_v6 = vpop.xlane.xlu1 %1160 }
 0x583   :  { %5989 = vrcp.f32 %v1161_v6  ;;  %v1158_v11 = vpop.xlane.xlu0 %1157 }
 0x584   :  { %5991 = vrcp.f32 %v1158_v11 }
 0x586   :  { %v1167_v49 = vpop.xlane.xlu1 %1166 }
 0x587   :  { %v1164_v51 = vpop.xlane.xlu0 %1163 }
 0x58b   :  { %v1170_v8 = vpop.xlane.xlu1 %1169 }
 0x58c   :  { %5993 = vrcp.f32 %v1170_v8  ;;  %v1173_v14 = vpop.xlane.xlu0 %1172 }
 0x58d   :  { %v5990_v55 = vpop.eup %5989  ;;  %5995 = vrcp.f32 %v1173_v14 }
 0x58e   :  { %v5992_v9 = vpop.eup %5991  ;;  %5997 = vrcp.f32 %v1164_v51  ;;  %v1207_v13 = vmul.f32 %v5990_v55, %v6627_v1 }
 0x58f   :  { %v1179_v45 = vpop.xlane.xlu1 %1178  ;;  %v1205_v12 = vmul.f32 %v5992_v9, %v6629_v32 }
 0x590   :  { %5999 = vrcp.f32 %v1179_v45  ;;  %v1176_v19 = vpop.xlane.xlu0 %1175 }
 0x591   :  { %6001 = vrcp.f32 %v1176_v19  ;;  %5230 = vmatprep.mubr.msk.f32.mxu1 %vm1059_vm13, %v1205_v12 }
 0x592   :  { %5231 = vmatmul.mubr.msk.f32.vlgmr.msra.gmra.mrb[8].mxu1 %vm1059_vm13, %v1207_v13 }
 0x593   :  { %5613 = vmatpush3.bf16.msra.mxu1 %v5610_v36  ;;  %v1185_v56 = vpop.xlane.xlu1 %1184  ;;  %v5606_v36 = vpack.c.bf16 %v5883_v52, %v5882_v54 }
 0x594   :  { %6003 = vrcp.f32 %v1185_v56  ;;  %5619 = vmatprep.subr.bf16.mxu1 %v5618_v46  ;;  %v1182_v58 = vpop.xlane.xlu0 %1181 }
 0x595   :  { %6005 = vrcp.f32 %v1182_v58 }
 0x596   :  { %v5994_v50 = vpop.eup %5993  ;;  %6007 = vrcp.f32 %v1167_v49 }
 0x597   :  { %v5996_v32 = vpop.eup %5995  ;;  %v1191_v24 = vpop.xlane.xlu1 %1190  ;;  %v1213_v1 = vmul.f32 %v5994_v50, %v6647_v41 }
 0x598   :  { %v1215_v20 = vmul.f32 %v5996_v32, %v6649_v63  ;;  %v5998_v16 = vpop.eup %5997  ;;  %v1188_v25 = vpop.xlane.xlu0 %1187 }
 0x599   :  { %5216 = vmatprep.mubr.msk.f32.mxu0 %vm1059_vm13, %v1213_v1  ;;  %6009 = vrcp.f32 %v1188_v25  ;;  %v1209_v44 = vmul.f32 %v5998_v16, %v6639_v21 }
 0x59a   :  { %v6000_v0 = vpop.eup %5999  ;;  %5217 = vmatmul.mubr.msk.f32.vlgmr.msra.gmra.mrb[16].mxu0 %vm1059_vm13, %v1215_v20 }
 0x59b   :  { %v6002_v29 = vpop.eup %6001  ;;  %v1219_v30 = vmul.f32 %v6000_v0, %v6657_v7  ;;  %5601 = vmatpush3.bf16.msra.mxu0 %v6540_v27  ;;  %v1197_v39 = vpop.xlane.xlu1 %1196  ;;  %v4792_v0 = vld [vmem:[%s7448_s7] ss:$0 sm:$0xff] }
 0x59c   :  { %6011 = vrcp.f32 %v1197_v39  ;;  %5607 = vmatprep.subr.bf16.mxu0 %v5606_v36  ;;  %v1217_v41 = vmul.f32 %v6002_v29, %v6659_v53  ;;  %v1194_v63 = vpop.xlane.xlu0 %1193 }
 0x59d   :  { %6013 = vrcp.f32 %v1194_v63 }
 0x59e   :  { %v6004_v40 = vpop.eup %6003  ;;  %5223 = vmatprep.mubr.msk.f32.mxu0 %vm1059_vm13, %v1217_v41  ;;  %6015 = vrcp.f32 %v1191_v24 }
 0x59f   :  { %5224 = vmatmul.mubr.msk.f32.vlgmr.msra.gmra.mrb[18].mxu0 %vm1059_vm13, %v1219_v30  ;;  %v6006_v59 = vpop.eup %6005  ;;  %v1223_v4 = vmul.f32 %v6004_v40, %v6667_v62 }
 0x5a0   :  { %5609 = vmatpush3.bf16.msra.mxu0 %v5606_v36  ;;  %v1200_v27 = vpop.xlane.xlu1 %1199  ;;  %5237 = vmatprep.mubr.msk.f32.mxu0 %vm1059_vm13, %v1209_v44  ;;  %v1203_v7 = vpop.xlane.xlu0 %1202  ;;  %v1221_v53 = vmul.f32 %v6006_v59, %v6669_v57 }
 0x5a1   :  { %6017 = vrcp.f32 %v1200_v27  ;;  %v6008_v5 = vpop.eup %6007 }
 0x5a2   :  { %5244 = vmatprep.mubr.msk.f32.mxu1 %vm1059_vm13, %v1221_v53  ;;  %v1211_v11 = vmul.f32 %v6008_v5, %v6637_v3  ;;  %6019 = vrcp.f32 %v1203_v7 }
 0x5a3   :  { %v6010_v6 = vpop.eup %6009  ;;  %5245 = vmatmul.mubr.msk.f32.vlgmr.msra.gmra.mrb[8].mxu1 %vm1059_vm13, %v1223_v4 }
 0x5a4   :  { %v5896_v21 = vpop.permute.xlu1 %5895  ;;  %5621 = vmatpush3.bf16.msra.mxu1 %v5618_v46  ;;  %v5891_v49 = vpop.permute.xlu0 %5890  ;;  %v1225_v9 = vmul.f32 %v6010_v6, %v6677_v33  ;;  %v1988_v46 = vld [vmem:[%s7447_s6] sm:$0xff] }
 0x5a5   :  { %v5898_v62 = vunpack.i.h.bf16 %v5896_v21  ;;  %v5897_v8 = vunpack.i.l.bf16 %v5896_v21  ;;  %v5893_v14 = vunpack.i.h.bf16 %v5891_v49  ;;  %v5892_v55 = vunpack.i.l.bf16 %v5891_v49 }
 0x5a6   :  { %v6012_v51 = vpop.eup %6011 }
 0x5a7   :  { %5238 = vmatmul.mubr.msk.f32.vlgmr.msra.gmra.mrb[18].mxu0 %vm1059_vm13, %v1211_v11  ;;  %v6014_v57 = vpop.eup %6013  ;;  %v1231_v10 = vmul.f32 %v6012_v51, %v6683_v35  ;;  %v5614_v15 = vpack.c.bf16 %v5893_v14, %v5892_v55  ;;  %v5622_v12 = vpack.c.bf16 %v5898_v62, %v5897_v8 }
 0x5a8   :  { %5251 = vmatprep.mubr.msk.f32.mxu0 %vm1059_vm13, %v1225_v9  ;;  %v1229_v3 = vmul.f32 %v6014_v57, %v6685_v28  ;;  %v6016_v45 = vpop.eup %6015 }
 0x5a9   :  { %5615 = vmatprep.subr.bf16.mxu0 %v5614_v15  ;;  %v1227_v33 = vmul.f32 %v6016_v45, %v6675_v2  ;;  %v1989_v2 = vld [vmem:[%s7447_s6 + $0x8] sm:$0xff] }
 0x5aa   :  { %5617 = vmatpush3.bf16.msra.mxu0 %v5614_v15  ;;  %5258 = vmatprep.mubr.msk.f32.mxu1 %vm1059_vm13, %v1229_v3  ;;  %v5626_v56 = vpack.c.bf16 %v1989_v2, %v1988_v46  ;;  %v2175_v46 = vld [vmem:[%s7451_s10 + $0x18] sm:$0xff] }
 0x5ab   :  { %v6018_v13 = vpop.eup %6017  ;;  %5259 = vmatmul.mubr.msk.f32.vlgmr.msra.gmra.mrb[8].mxu1 %vm1059_vm13, %v1231_v10  ;;  %5623 = vmatprep.subr.bf16.mxu0 %v5622_v12 }
 0x5ac   :  { %v1233_v35 = vmul.f32 %v6018_v13, %v6693_v42  ;;  %v6020_v28 = vpop.eup %6019  ;;  %5627 = vmatprep.subr.bf16.mxu1 %v5626_v56  ;;  %v1990_v42 = vld [vmem:[%s7447_s6 + $0x10] sm:$0xff] }
 0x5ad   :  { %v1235_v19 = vmul.f32 %v6020_v28, %v6691_v34  ;;  %5629 = vmatpush3.bf16.msra.mxu1 %v5626_v56  ;;  %v1991_v34 = vld [vmem:[%s7447_s6 + $0x18] sm:$0xff]  ;;  %v2298_v56 = vld [vmem:[%s7453_s12] sm:$0xff] }
 0x5ae   :  { %v5630_v58 = vpack.c.bf16 %v1991_v34, %v1990_v42  ;;  %v2299_v42 = vld [vmem:[%s7453_s12 + $0x8] sm:$0xff]  ;;  %v2300_v34 = vld [vmem:[%s7453_s12 + $0x10] sm:$0xff] }
 0x5af   :  { %5252 = vmatmul.mubr.msk.f32.vlgmr.msra.gmra.mrb[18].mxu0 %vm1059_vm13, %v1227_v33  ;;  %v2172_v33 = vld [vmem:[%s7451_s10] sm:$0xff] }
 0x5b0   :  { %5625 = vmatpush3.bf16.msra.mxu0 %v5622_v12  ;;  %5265 = vmatprep.mubr.msk.f32.mxu0 %vm1059_vm13, %v1233_v35  ;;  %v2173_v35 = vld [vmem:[%s7451_s10 + $0x8] sm:$0xff] }
 0x5b1   :  { %5631 = vmatprep.subr.bf16.mxu1 %v5630_v58  ;;  %v5634_v28 = vpack.c.bf16 %v2173_v35, %v2172_v33  ;;  %v2308_v33 = vld [vmem:[%s7453_s12 + $0x50] sm:$0xff]  ;;  %v2309_v35 = vld [vmem:[%s7453_s12 + $0x58] sm:$0xff] }
 0x5b2   :  { %5633 = vmatpush3.bf16.msra.mxu1 %v5630_v58  ;;  %v5642_v58 = vpack.c.bf16 %v2299_v42, %v2298_v56  ;;  %v2312_v56 = vld [vmem:[%s7453_s12 + $0x70] sm:$0xff]  ;;  %v2313_v42 = vld [vmem:[%s7453_s12 + $0x78] sm:$0xff] }
 0x5b3   :  { %5635 = vmatprep.subr.bf16.mxu0 %v5634_v28 }
 0x5b4   :  { %5643 = vmatprep.subr.bf16.mxu1 %v5642_v58 }
 0x5b7   :  { %5266 = vmatmul.mubr.msk.f32.vlgmr.msra.gmra.mrb[18].mxu0 %vm1059_vm13, %v1235_v19  ;;  %v2174_v19 = vld [vmem:[%s7451_s10 + $0x10] sm:$0xff] }
 0x5b8   :  { %5637 = vmatpush3.bf16.msra.mxu0 %v5634_v28  ;;  %v5638_v2 = vpack.c.bf16 %v2175_v46, %v2174_v19  ;;  %v5662_v28 = vpack.c.bf16 %v2309_v35, %v2308_v33  ;;  %v2310_v19 = vld [vmem:[%s7453_s12 + $0x60] sm:$0xff]  ;;  %v2311_v46 = vld [vmem:[%s7453_s12 + $0x68] sm:$0xff] }
 0x5ba   :  { %5639 = vmatprep.subr.bf16.mxu0 %v5638_v2 }
 0x5bc   :  { %5641 = vmatpush3.bf16.msra.mxu0 %v5638_v2  ;;  %v5666_v2 = vpack.c.bf16 %v2311_v46, %v2310_v19 }
 0x66d   :  { %v5218_v50 = vpop.f32.mrb[16].mxu0 }
 0x66e   :  { %v1332_v52 = vpop.f32.mrb[17].mxu0 }
 0x67e   :  { %v5260_v54 = vpop.f32.mrb[8].mxu1 }
 0x67f   :  { %v5810_v32 = vadd.f32 %v5260_v54, %v5218_v50  ;;  %v1886_v24 = vpop.f32.mrb[9].mxu1  ;;  %v2301_v50 = vld [vmem:[%s7453_s12 + $0x18] sm:$0xff]  ;;  %v2302_v54 = vld [vmem:[%s7453_s12 + $0x20] sm:$0xff] }
 0x680   :  { %v5811_v1 = vadd.f32 %v1886_v24, %v1332_v52  ;;  %v5646_v52 = vpack.c.bf16 %v2301_v50, %v2300_v34  ;;  %v5670_v34 = vpack.c.bf16 %v2313_v42, %v2312_v56 }
 0x682   :  { %5276 = vmatprep.mubr.msk.f32.mxu1 %vm188_vm1, %v5811_v1 }
 0x683   :  { %5277 = vmatmul.mubr.msk.f32.vlgmr.msra.gmra.mrb[10].mxu1 %vm188_vm1, %v5810_v32  ;;  %v2303_v32 = vld [vmem:[%s7453_s12 + $0x28] sm:$0xff] }
 0x684   :  { %5645 = vmatpush3.bf16.msra.mxu1 %v5642_v58  ;;  %v5650_v24 = vpack.c.bf16 %v2303_v32, %v2302_v54  ;;  %v4795_v58 = vld [vmem:[%s7452_s11] ss:$0 sm:$0xff] }
 0x685   :  { %5647 = vmatprep.subr.bf16.mxu1 %v5646_v52 }
 0x688   :  { %5649 = vmatpush3.bf16.msra.mxu1 %v5646_v52 }
 0x689   :  { %5651 = vmatprep.subr.bf16.mxu1 %v5650_v24 }
 0x68a   :  { %v5267_v20 = vpop.f32.mrb[18].mxu0 }
 0x68b   :  { %v1975_v16 = vpop.f32.mrb[19].mxu0 }
 0x68c   :  { %5279 = vmatprep.mubr.msk.f32.mxu1 %vm188_vm1, %v1975_v16  ;;  %5653 = vmatpush3.bf16.msra.mxu1 %v5650_v24 }
 0x68d   :  { %5280 = vmatmul.mubr.msk.f32.gmra.mrb[12].mxu1 %vm188_vm1, %v5267_v20 }
 0x756   :  { %v5278_v25 = vpop.f32.mrb[10].mxu1 }
 0x757   :  { %v2090_v36 = vadd.f32 %v5278_v25, %v6289_v18  ;;  %v2070_v29 = vpop.f32.mrb[11].mxu1 }
 0x758   :  { %v2089_v30 = vadd.f32 %v2070_v29, %v6287_v17 }
 0x759   :  { %v6761_v39 = vadd.f32 %v4792_v0, %v2090_v36 }
 0x75a   :  { %v6763_v41 = vadd.f32 %v4792_v0, %v2089_v30 }
 0x75b   :  { %v2107_v63 = vsel %vm188_vm1, %v6761_v39, 0.0 }
 0x75c   :  { %2108 = vadd.xlane.f32.xlu1 %v2107_v63  ;;  %v2104_v40 = vsel %vm188_vm1, %v6763_v41, 0.0 }
 0x75d   :  { %2105 = vadd.xlane.f32.xlu0 %v2104_v40 }
 0x760   :  { %v5281_v44 = vpop.f32.mrb[12].mxu1 }
 0x761   :  { %v2080_v59 = vpop.f32.mrb[13].mxu1  ;;  %v2092_v4 = vadd.f32 %v5281_v44, %v6295_v23 }
 0x762   :  { %v2091_v18 = vadd.f32 %v2080_v59, %v6293_v22 }
 0x763   :  { %v6773_v17 = vadd.f32 %v4792_v0, %v2092_v4  ;;  %v4793_v4 = vld [vmem:[%s7449_s8] ss:$0 sm:$0xff] }
 0x764   :  { %v6771_v27 = vadd.f32 %v4792_v0, %v2091_v18 }
 0x765   :  { %v2113_v53 = vsel %vm188_vm1, %v6773_v17, 0.0 }
 0x766   :  { %v2110_v7 = vsel %vm188_vm1, %v6771_v27, 0.0 }
 0x767   :  { %2111 = vadd.xlane.f32.xlu0 %v2110_v7 }
 0x76b   :  { %2114 = vadd.xlane.f32.xlu0 %v2113_v53 }
 0x7e9   :  { %v2109_v5 = vpop.xlane.xlu1 %2108 }
 0x7ea   :  { %v2117_v6 = vmul.f32 0.03125, %v2109_v5  ;;  %v2106_v21 = vpop.xlane.xlu0 %2105 }
 0x7eb   :  { %v2116_v11 = vmul.f32 0.03125, %v2106_v21 }
 0x7ec   :  { %v2121_v23 = vsub.f32 %v6761_v39, %v2117_v6  ;;  %v4794_v6 = vld [vmem:[%s7450_s9] ss:$0 sm:$0xff] }
 0x7ed   :  { %v6781_v22 = vsub.f32 %v6763_v41, %v2116_v11 }
 0x7ee   :  { %v2125_v62 = vmul.f32 %v2121_v23, %v2121_v23 }
 0x7ef   :  { %v2124_v49 = vmul.f32 %v6781_v22, %v6781_v22 }
 0x7f0   :  { %v2131_v51 = vsel %vm188_vm1, %v2125_v62, 0.0 }
 0x7f1   :  { %2132 = vadd.xlane.f32.xlu1 %v2131_v51  ;;  %v2128_v8 = vsel %vm188_vm1, %v2124_v49, 0.0 }
 0x7f2   :  { %2129 = vadd.xlane.f32.xlu0 %v2128_v8 }
 0x7f4   :  { %v2112_v14 = vpop.xlane.xlu0 %2111 }
 0x7f5   :  { %v2118_v55 = vmul.f32 0.03125, %v2112_v14 }
 0x7f7   :  { %v6788_v9 = vsub.f32 %v6771_v27, %v2118_v55 }
 0x7f8   :  { %v2115_v57 = vpop.xlane.xlu0 %2114 }
 0x7f9   :  { %v2119_v10 = vmul.f32 0.03125, %v2115_v57  ;;  %v2126_v15 = vmul.f32 %v6788_v9, %v6788_v9 }
 0x7fb   :  { %v6793_v3 = vsub.f32 %v6773_v17, %v2119_v10  ;;  %v2134_v45 = vsel %vm188_vm1, %v2126_v15, 0.0  ;;  %v2304_v15 = vld [vmem:[%s7453_s12 + $0x30] sm:$0xff] }
 0x7fc   :  { %2135 = vadd.xlane.f32.xlu0 %v2134_v45  ;;  %v2305_v45 = vld [vmem:[%s7453_s12 + $0x38] sm:$0xff] }
 0x7fd   :  { %v2127_v12 = vmul.f32 %v6793_v3, %v6793_v3 }
 0x7ff   :  { %v2137_v13 = vsel %vm188_vm1, %v2127_v12, 0.0  ;;  %v2307_v12 = vld [vmem:[%s7453_s12 + $0x48] sm:$0xff] }
 0x800   :  { %2138 = vadd.xlane.f32.xlu1 %v2137_v13 }
 0x87e   :  { %v2133_v1 = vpop.xlane.xlu1 %2132 }
 0x87f   :  { %v2141_v20 = vmul.f32 0.03125, %v2133_v1  ;;  %v2130_v16 = vpop.xlane.xlu0 %2129 }
 0x880   :  { %v2140_v25 = vmul.f32 0.03125, %v2130_v16 }
 0x881   :  { %v2145_v0 = vadd.f32 1e-05, %v2141_v20 }
 0x882   :  { %v2144_v36 = vadd.f32 1e-05, %v2140_v25 }
 0x883   :  { %6021 = vrsqrt.f32 %v2145_v0 }
 0x884   :  { %6023 = vrsqrt.f32 %v2144_v36 }
 0x889   :  { %v2136_v29 = vpop.xlane.xlu0 %2135 }
 0x88a   :  { %v2142_v30 = vmul.f32 0.03125, %v2136_v29 }
 0x88c   :  { %v2146_v63 = vadd.f32 1e-05, %v2142_v30 }
 0x88d   :  { %v2139_v40 = vpop.xlane.xlu1 %2138  ;;  %v6022_v44 = vpop.eup %6021 }
 0x88e   :  { %6025 = vrsqrt.f32 %v2146_v63  ;;  %v2143_v59 = vmul.f32 0.03125, %v2139_v40  ;;  %v6024_v18 = vpop.eup %6023  ;;  %v2153_v7 = vmul.f32 %v6022_v44, %v2121_v23 }
 0x88f   :  { %v2152_v5 = vmul.f32 %v6024_v18, %v6781_v22 }
 0x890   :  { %v2147_v53 = vadd.f32 1e-05, %v2143_v59  ;;  %v2161_v21 = vmul.f32 %v4793_v4, %v2153_v7 }
 0x891   :  { %v2160_v11 = vmul.f32 %v4793_v4, %v2152_v5 }
 0x892   :  { %6027 = vrsqrt.f32 %v2147_v53  ;;  %v2169_v49 = vadd.f32 %v4794_v6, %v2161_v21 }
 0x893   :  { %v2168_v62 = vadd.f32 %v4794_v6, %v2160_v11 }
 0x895   :  { %5290 = vmatprep.mubr.msk.f32.mxu0 %vm188_vm1, %v2168_v62 }
 0x896   :  { %5291 = vmatmul.mubr.msk.f32.vlgmr.msra.gmra.mrb[20].mxu0 %vm188_vm1, %v2169_v49 }
 0x898   :  { %v6026_v51 = vpop.eup %6025 }
 0x899   :  { %v2154_v8 = vmul.f32 %v6026_v51, %v6788_v9  ;;  %v5654_v9 = vpack.c.bf16 %v2305_v45, %v2304_v15 }
 0x89b   :  { %v2162_v23 = vmul.f32 %v4793_v4, %v2154_v8  ;;  %5655 = vmatprep.subr.bf16.mxu1 %v5654_v9 }
 0x89c   :  { %v6028_v14 = vpop.eup %6027  ;;  %5657 = vmatpush3.bf16.msra.mxu1 %v5654_v9 }
 0x89d   :  { %v2170_v55 = vadd.f32 %v4794_v6, %v2162_v23  ;;  %v2155_v22 = vmul.f32 %v6028_v14, %v6793_v3  ;;  %v2306_v3 = vld [vmem:[%s7453_s12 + $0x40] sm:$0xff] }
 0x89e   :  { %v5658_v13 = vpack.c.bf16 %v2307_v12, %v2306_v3  ;;  %v4800_v23 = vld [vmem:[%s7454_s13] ss:$0 sm:$0xff] }
 0x89f   :  { %5293 = vmatprep.mubr.msk.f32.mxu0 %vm188_vm1, %v2170_v55  ;;  %v2163_v57 = vmul.f32 %v4793_v4, %v2155_v22 }
 0x8a0   :  { %5659 = vmatprep.subr.bf16.mxu1 %v5658_v13 }
 0x8a1   :  { %v2171_v10 = vadd.f32 %v4794_v6, %v2163_v57  ;;  %5661 = vmatpush3.bf16.msra.mxu1 %v5658_v13 }
 0x8a2   :  { %5663 = vmatprep.subr.bf16.mxu1 %v5662_v28 }
 0x8a3   :  { %5294 = vmatmul.mubr.msk.f32.gmra.mrb[22].mxu0 %vm188_vm1, %v2171_v10 }
 0x8a5   :  { %5665 = vmatpush3.bf16.msra.mxu1 %v5662_v28 }
 0x8a6   :  { %5667 = vmatprep.subr.bf16.mxu1 %v5666_v2 }
 0x8a9   :  { %5669 = vmatpush3.bf16.msra.mxu1 %v5666_v2 }
 0x8aa   :  { %5671 = vmatprep.subr.bf16.mxu1 %v5670_v34 }
 0x8ad   :  { %5673 = vmatpush3.bf16.msra.mxu1 %v5670_v34 }
 0x969   :  { %v5292_v50 = vpop.f32.mrb[20].mxu0 }
 0x96a   :  { %v2265_v52 = vadd.f32 %v5292_v50, %v4795_v58  ;;  %v2259_v54 = vpop.f32.mrb[21].mxu0 }
 0x96b   :  { %v2260_v32 = vadd.f32 %v4795_v58, %v2259_v54 }
 0x96c   :  { %v2283_v24 = vmul.f32 0.70710677, %v2265_v52  ;;  %v2279_v4 = vmul.f32 0.5, %v2265_v52 }
 0x96d   :  { %v2282_v1 = vmul.f32 0.70710677, %v2260_v32  ;;  %v2278_v44 = vmul.f32 0.5, %v2260_v32 }
 0x96e   :  { %6029 = verf.f32 %v2283_v24 }
 0x96f   :  { %6031 = verf.f32 %v2282_v1 }
 0x976   :  { %v5295_v20 = vpop.f32.mrb[22].mxu0 }
 0x977   :  { %v2275_v16 = vadd.f32 %v5295_v20, %v4795_v58  ;;  %v2269_v25 = vpop.f32.mrb[23].mxu0 }
 0x978   :  { %v2270_v0 = vadd.f32 %v4795_v58, %v2269_v25  ;;  %v6030_v36 = vpop.eup %6029 }
 0x979   :  { %v2285_v29 = vmul.f32 0.70710677, %v2275_v16  ;;  %v6032_v30 = vpop.eup %6031  ;;  %v2291_v63 = vadd.f32 1.0, %v6030_v36  ;;  %v2281_v62 = vmul.f32 0.5, %v2275_v16  ;;  %v4803_v36 = vld [vmem:[%s7446_s5 + $0x20] sm:$0xff] }
 0x97a   :  { %v2284_v40 = vmul.f32 0.70710677, %v2270_v0  ;;  %v2290_v59 = vadd.f32 1.0, %v6032_v30  ;;  %v2280_v21 = vmul.f32 0.5, %v2270_v0 }
 0x97b   :  { %6033 = verf.f32 %v2285_v29  ;;  %v2295_v7 = vmul.f32 %v2291_v63, %v2279_v4  ;;  %v4804_v29 = vld [vmem:[%s7446_s5 + $0x28] sm:$0xff]  ;;  %v4805_v63 = vld [vmem:[%s7446_s5 + $0x30] sm:$0xff] }
 0x97c   :  { %6035 = verf.f32 %v2284_v40  ;;  %v2294_v18 = vmul.f32 %v2290_v59, %v2278_v44  ;;  %v5674_v30 = vpack.c.bf16 %v4804_v29, %v4803_v36  ;;  %v4806_v40 = vld [vmem:[%s7446_s5 + $0x38] sm:$0xff] }
 0x97d   :  { %v5678_v44 = vpack.c.bf16 %v4806_v40, %v4805_v63 }
 0x97e   :  { %5328 = vmatprep.mubr.f32.mxu1 %v2294_v18  ;;  %5675 = vmatprep.subr.bf16.mxu0 %v5674_v30 }
 0x97f   :  { %5329 = vmatmul.mubr.f32.vlgmr.msra.gmra.mrb[14].mxu1 %v2295_v7  ;;  %5677 = vmatpush3.bf16.msra.mxu0 %v5674_v30 }
 0x980   :  { %5679 = vmatprep.subr.bf16.mxu0 %v5678_v44 }
 0x983   :  { %5681 = vmatpush3.bf16.msra.mxu0 %v5678_v44 }
 0x985   :  { %v6034_v53 = vpop.eup %6033 }
 0x986   :  { %v6036_v5 = vpop.eup %6035  ;;  %v2293_v6 = vadd.f32 1.0, %v6034_v53 }
 0x987   :  { %v2292_v11 = vadd.f32 1.0, %v6036_v5 }
 0x988   :  { %v2297_v51 = vmul.f32 %v2293_v6, %v2281_v62 }
 0x989   :  { %v2296_v49 = vmul.f32 %v2292_v11, %v2280_v21 }
 0x98b   :  { %5331 = vmatprep.mubr.f32.mxu1 %v2296_v49 }
 0x98c   :  { %5332 = vmatmul.mubr.f32.gmra.mrb[16].mxu1 %v2297_v51 }
 0xa52   :  { %v5330_v8 = vpop.f32.mrb[14].mxu1 }
 0xa53   :  { %v2400_v14 = vadd.f32 %v5330_v8, %v6761_v39  ;;  %v2380_v55 = vpop.f32.mrb[15].mxu1  ;;  %v4801_v8 = vld [vmem:[%s7444_s3 + $0x1] ss:$0 sm:$0xff] }
 0xa54   :  { %v2399_v22 = vadd.f32 %v2380_v55, %v6763_v41 }
 0xa55   :  { %v6880_v57 = vadd.f32 %v4800_v23, %v2400_v14 }
 0xa56   :  { %v6882_v10 = vadd.f32 %v4800_v23, %v2399_v22 }
 0xa57   :  { %v2417_v15 = vsel %vm188_vm1, %v6880_v57, 0.0 }
 0xa58   :  { %2418 = vadd.xlane.f32.xlu1 %v2417_v15  ;;  %v2414_v45 = vsel %vm188_vm1, %v6882_v10, 0.0  ;;  %v4802_v15 = vld [vmem:[%s7445_s4 + $0x1] ss:$0 sm:$0xff] }
 0xa59   :  { %2415 = vadd.xlane.f32.xlu0 %v2414_v45 }
 0xa5f   :  { %v5333_v9 = vpop.f32.mrb[16].mxu1 }
 0xa60   :  { %v2402_v3 = vadd.f32 %v5333_v9, %v6773_v17  ;;  %v2390_v12 = vpop.f32.mrb[17].mxu1 }
 0xa61   :  { %v2401_v39 = vadd.f32 %v2390_v12, %v6771_v27 }
 0xa62   :  { %v6890_v13 = vadd.f32 %v4800_v23, %v2402_v3 }
 0xa63   :  { %v6892_v41 = vadd.f32 %v4800_v23, %v2401_v39 }
 0xa64   :  { %v2423_v33 = vsel %vm188_vm1, %v6890_v13, 0.0 }
 0xa65   :  { %2424 = vadd.xlane.f32.xlu1 %v2423_v33  ;;  %v2420_v35 = vsel %vm188_vm1, %v6892_v41, 0.0 }
 0xa66   :  { %2421 = vadd.xlane.f32.xlu0 %v2420_v35 }
 0xae5   :  { %v2419_v28 = vpop.xlane.xlu1 %2418 }
 0xae6   :  { %v2427_v19 = vmul.f32 0.03125, %v2419_v28  ;;  %v2416_v46 = vpop.xlane.xlu0 %2415 }
 0xae7   :  { %v2426_v2 = vmul.f32 0.03125, %v2416_v46 }
 0xae8   :  { %v2431_v17 = vsub.f32 %v6880_v57, %v2427_v19 }
 0xae9   :  { %v2430_v27 = vsub.f32 %v6882_v10, %v2426_v2 }
 0xaea   :  { %v2435_v56 = vmul.f32 %v2431_v17, %v2431_v17 }
 0xaeb   :  { %v2434_v42 = vmul.f32 %v2430_v27, %v2430_v27 }
 0xaec   :  { %v2441_v34 = vsel %vm188_vm1, %v2435_v56, 0.0 }
 0xaed   :  { %2442 = vadd.xlane.f32.xlu1 %v2441_v34  ;;  %v2438_v58 = vsel %vm188_vm1, %v2434_v42, 0.0 }
 0xaee   :  { %2439 = vadd.xlane.f32.xlu0 %v2438_v58 }
 0xaf2   :  { %v2425_v50 = vpop.xlane.xlu1 %2424 }
 0xaf3   :  { %v2429_v52 = vmul.f32 0.03125, %v2425_v50  ;;  %v2422_v54 = vpop.xlane.xlu0 %2421 }
 0xaf4   :  { %v2428_v32 = vmul.f32 0.03125, %v2422_v54 }
 0xaf5   :  { %v2433_v24 = vsub.f32 %v6890_v13, %v2429_v52 }
 0xaf6   :  { %v2432_v1 = vsub.f32 %v6892_v41, %v2428_v32 }
 0xaf7   :  { %v2437_v20 = vmul.f32 %v2433_v24, %v2433_v24 }
 0xaf8   :  { %v2436_v16 = vmul.f32 %v2432_v1, %v2432_v1 }
 0xaf9   :  { %v2447_v25 = vsel %vm188_vm1, %v2437_v20, 0.0 }
 0xafa   :  { %2448 = vadd.xlane.f32.xlu1 %v2447_v25  ;;  %v2444_v0 = vsel %vm188_vm1, %v2436_v16, 0.0 }
 0xafb   :  { %2445 = vadd.xlane.f32.xlu0 %v2444_v0 }
 0xb7a   :  { %v2443_v59 = vpop.xlane.xlu1 %2442 }
 0xb7b   :  { %v2451_v4 = vmul.f32 0.03125, %v2443_v59  ;;  %v2440_v18 = vpop.xlane.xlu0 %2439 }
 0xb7c   :  { %v2450_v7 = vmul.f32 0.03125, %v2440_v18 }
 0xb7d   :  { %v2455_v53 = vadd.f32 1e-05, %v2451_v4 }
 0xb7e   :  { %v2454_v5 = vadd.f32 1e-05, %v2450_v7 }
 0xb7f   :  { %6037 = vrsqrt.f32 %v2455_v53 }
 0xb80   :  { %6039 = vrsqrt.f32 %v2454_v5 }
 0xb87   :  { %v2449_v6 = vpop.xlane.xlu1 %2448 }
 0xb88   :  { %v2453_v21 = vmul.f32 0.03125, %v2449_v6  ;;  %v2446_v11 = vpop.xlane.xlu0 %2445 }
 0xb89   :  { %v2452_v62 = vmul.f32 0.03125, %v2446_v11  ;;  %v6038_v49 = vpop.eup %6037 }
 0xb8a   :  { %v2457_v51 = vadd.f32 1e-05, %v2453_v21  ;;  %v6040_v23 = vpop.eup %6039  ;;  %v2463_v14 = vmul.f32 %v6038_v49, %v2431_v17 }
 0xb8b   :  { %v2456_v55 = vadd.f32 1e-05, %v2452_v62  ;;  %v2462_v22 = vmul.f32 %v6040_v23, %v2430_v27 }
 0xb8c   :  { %6041 = vrsqrt.f32 %v2457_v51  ;;  %v2471_v45 = vmul.f32 %v4801_v8, %v2463_v14 }
 0xb8d   :  { %6043 = vrsqrt.f32 %v2456_v55  ;;  %v2470_v9 = vmul.f32 %v4801_v8, %v2462_v22 }
 0xb8e   :  { %v2479_v12 = vadd.f32 %v4802_v15, %v2471_v45 }
 0xb8f   :  { %v2478_v3 = vadd.f32 %v4802_v15, %v2470_v9 }
 0xb91   :  { %5342 = vmatprep.mubr.msk.f32.mxu0 %vm188_vm1, %v2478_v3 }
 0xb92   :  { %5343 = vmatmul.mubr.msk.f32.vlgmr.msra.gmra.mrb[24].mxu0 %vm188_vm1, %v2479_v12 }
 0xb96   :  { %v6042_v39 = vpop.eup %6041 }
 0xb97   :  { %v6044_v33 = vpop.eup %6043  ;;  %v2465_v35 = vmul.f32 %v6042_v39, %v2433_v24 }
 0xb98   :  { %v2464_v28 = vmul.f32 %v6044_v33, %v2432_v1 }
 0xb99   :  { %v2473_v19 = vmul.f32 %v4801_v8, %v2465_v35 }
 0xb9a   :  { %v2472_v46 = vmul.f32 %v4801_v8, %v2464_v28 }
 0xb9b   :  { %v2481_v17 = vadd.f32 %v4802_v15, %v2473_v19 }
 0xb9c   :  { %v2480_v2 = vadd.f32 %v4802_v15, %v2472_v46 }
 0xb9e   :  { %5345 = vmatprep.mubr.msk.f32.mxu0 %vm188_vm1, %v2480_v2 }
 0xb9f   :  { %5346 = vmatmul.mubr.msk.f32.gmra.mrb[26].mxu0 %vm188_vm1, %v2481_v17 }
 0xc65   :  { %v6928_v27 = vpop.f32.mrb[24].mxu0 }
 0xc66   :  { %v6930_v56 = vpop.f32.mrb[25].mxu0  ;;  %v3465_v42 = vmul.f32 %v6377_v48, %v6928_v27  ;;  %v6948_v32 = vmul.f32 %v6375_v47, %v6928_v27  ;;  %v6956_v1 = vmul.f32 %v6408_v61, %v6928_v27  ;;  %v6964_v16 = vmul.f32 %v6406_v60, %v6928_v27 }
 0xc67   :  { %v5899_v34 = vpack.i.bf16 %v6928_v27, %v6930_v56  ;;  %v2584_v58 = vmul.f32 %v6930_v56, %v6333_v26  ;;  %v3464_v50 = vmul.f32 %v6377_v48, %v6930_v56  ;;  %v6942_v52 = vmul.f32 %v6375_v47, %v6930_v56 }
 0xc68   :  { %v6952_v24 = vmul.f32 %v6408_v61, %v6930_v56  ;;  %v6960_v20 = vmul.f32 %v6406_v60, %v6930_v56  ;;  %v2770_v9 = vmul.f32 %v6930_v56, %v6343_v31  ;;  %v2936_v39 = vmul.f32 %v6930_v56, %v6357_v37 }
 0xc69   :  { %5900 = vrot.lane.b32.xlu0 %v5899_v34, %s6158_s25  ;;  %5352 = vmatprep.mubr.msk.f32.mxu0 %vm188_vm1, %v2584_v58  ;;  %v5909_v54 = vpack.i.bf16 %v3465_v42, %v3464_v50  ;;  %v5919_v25 = vpack.i.bf16 %v6948_v32, %v6942_v52  ;;  %v2937_v19 = vmul.f32 %v6928_v27, %v6357_v37 }
 0xc6a   :  { %v5929_v0 = vpack.i.bf16 %v6956_v1, %v6952_v24  ;;  %v5939_v36 = vpack.i.bf16 %v6964_v16, %v6960_v20  ;;  %v3102_v17 = vmul.f32 %v6930_v56, %v6359_v38  ;;  %v3103_v58 = vmul.f32 %v6928_v27, %v6359_v38  ;;  %v4862_v20 = vld [vmem:[%s7447_s6 + $0x38] sm:$0xff] }
 0xc6d   :  { %5910 = vrot.lane.b32.xlu0 %v5909_v54, %s6159_s26 }
 0xc72   :  { %v6973_v29 = vpop.f32.mrb[26].mxu0 }
 0xc73   :  { %v2575_v30 = vpop.f32.mrb[27].mxu0  ;;  %v3467_v63 = vmul.f32 %v6377_v48, %v6973_v29  ;;  %v6987_v7 = vmul.f32 %v6375_v47, %v6973_v29  ;;  %v6994_v5 = vmul.f32 %v6408_v61, %v6973_v29  ;;  %v7001_v6 = vmul.f32 %v6406_v60, %v6973_v29 }
 0xc74   :  { %v5904_v40 = vpack.i.bf16 %v6973_v29, %v2575_v30  ;;  %v2772_v44 = vmul.f32 %v2575_v30, %v6343_v31  ;;  %v3466_v59 = vmul.f32 %v6377_v48, %v2575_v30  ;;  %v6981_v4 = vmul.f32 %v6375_v47, %v2575_v30 }
 0xc75   :  { %v6990_v53 = vmul.f32 %v6408_v61, %v2575_v30  ;;  %v6997_v48 = vmul.f32 %v6406_v60, %v2575_v30  ;;  %v2585_v60 = vmul.f32 %v6928_v27, %v6333_v26  ;;  %v2586_v23 = vmul.f32 %v2575_v30, %v6333_v26 }
 0xc76   :  { %5905 = vrot.lane.b32.xlu1 %v5904_v40, %s6158_s25  ;;  %5373 = vmatprep.mubr.msk.f32.mxu1 %vm188_vm1, %v2772_v44  ;;  %v5914_v18 = vpack.i.bf16 %v3467_v63, %v3466_v59  ;;  %v5924_v21 = vpack.i.bf16 %v6987_v7, %v6981_v4  ;;  %v2587_v15 = vmul.f32 %v6973_v29, %v6333_v26 }
 0xc77   :  { %v5934_v47 = vpack.i.bf16 %v6994_v5, %v6990_v53  ;;  %v5944_v11 = vpack.i.bf16 %v7001_v6, %v6997_v48  ;;  %v2773_v45 = vmul.f32 %v6973_v29, %v6343_v31  ;;  %v2938_v3 = vmul.f32 %v2575_v30, %v6357_v37 }
 0xc78   :  { %v2771_v26 = vmul.f32 %v6928_v27, %v6343_v31  ;;  %v2939_v12 = vmul.f32 %v6973_v29, %v6357_v37  ;;  %v3104_v35 = vmul.f32 %v2575_v30, %v6359_v38  ;;  %v3105_v46 = vmul.f32 %v6973_v29, %v6359_v38 }
 0xc7a   :  { %5915 = vrot.lane.b32.xlu1 %v5914_v18, %s6159_s26 }
 0xcdb   :  { %v5901_v61 = vpop.permute.xlu0 %5900 }
 0xcdc   :  { %v5903_v62 = vunpack.i.h.bf16 %v5901_v61  ;;  %v5902_v49 = vunpack.i.l.bf16 %v5901_v61 }
 0xcde   :  { %v5682_v51 = vpack.c.bf16 %v5903_v62, %v5902_v49 }
 0xcdf   :  { %v5911_v33 = vpop.permute.xlu0 %5910 }
 0xce0   :  { %5684 = vmatprep.subr.msk.bf16.mxu0 %vm6369_vm12, %v5682_v51  ;;  %v5913_v31 = vunpack.i.h.bf16 %v5911_v33  ;;  %v5912_v28 = vunpack.i.l.bf16 %v5911_v33 }
 0xce1   :  { %5687 = vmatpush3.bf16.xpose.msk.msra.mxu0 %vm6369_vm12, %v5682_v51 }
 0xce2   :  { %v5730_v2 = vpack.c.bf16 %v5913_v31, %v5912_v28 }
 0xce8   :  { %v5906_v8 = vpop.permute.xlu1 %5905  ;;  %5353 = vmatmul.mubr.msk.f32.vlgmr.msra.gmra.mrb[28].mxu0 %vm188_vm1, %v2585_v60 }
 0xce9   :  { %v5908_v14 = vunpack.i.h.bf16 %v5906_v8  ;;  %v5907_v55 = vunpack.i.l.bf16 %v5906_v8  ;;  %5359 = vmatprep.mubr.msk.f32.mxu0 %vm188_vm1, %v2586_v23 }
 0xceb   :  { %v5688_v22 = vpack.c.bf16 %v5908_v14, %v5907_v55 }
 0xcec   :  { %v5916_v42 = vpop.permute.xlu1 %5915 }
 0xced   :  { %5690 = vmatprep.subr.msk.bf16.mxu0 %vm6369_vm12, %v5688_v22  ;;  %5702 = vmatprep.subr.msk.bf16.mxu1 %vm6369_vm12, %v5688_v22  ;;  %v5918_v34 = vunpack.i.h.bf16 %v5916_v42  ;;  %v5917_v37 = vunpack.i.l.bf16 %v5916_v42 }
 0xcee   :  { %5693 = vmatpush3.bf16.xpose.msk.msra.mxu0 %vm6369_vm12, %v5688_v22  ;;  %5705 = vmatpush3.bf16.xpose.msk.msra.mxu1 %vm6369_vm12, %v5688_v22 }
 0xcef   :  { %5696 = vmatprep.subr.msk.bf16.mxu0 %vm6369_vm12, %v5682_v51  ;;  %5714 = vmatprep.subr.msk.bf16.mxu1 %vm6369_vm12, %v5688_v22  ;;  %v7080_v50 = vpack.c.bf16 %v5918_v34, %v5917_v37 }
 0xcf5   :  { %5360 = vmatmul.mubr.msk.f32.vlgmr.msra.gmra.mrb[30].mxu0 %vm188_vm1, %v2587_v15  ;;  %5374 = vmatmul.mubr.msk.f32.vlgmr.msra.gmra.mrb[18].mxu1 %vm188_vm1, %v2773_v45 }
 0xcf6   :  { %5699 = vmatpush3.bf16.xpose.msk.msra.mxu0 %vm6369_vm12, %v5682_v51  ;;  %5366 = vmatprep.mubr.msk.f32.mxu0 %vm188_vm1, %v2770_v9 }
 0xcf7   :  { %5717 = vmatpush3.bf16.xpose.msk.msra.mxu1 %vm6369_vm12, %v5688_v22  ;;  %5387 = vmatprep.mubr.msk.f32.mxu1 %vm188_vm1, %v2938_v3 }
 0xcf8   :  { %5708 = vmatprep.subr.msk.bf16.mxu0 %vm6369_vm12, %v5682_v51  ;;  %5726 = vmatprep.subr.msk.bf16.mxu1 %vm6369_vm12, %v5688_v22 }
 0xcfd   :  { %5367 = vmatmul.mubr.msk.f32.vlgmr.msra.gmra.mrb[32].mxu0 %vm188_vm1, %v2771_v26 }
 0xcfe   :  { %5388 = vmatmul.mubr.msk.f32.vlgmr.msra.gmra.mrb[20].mxu1 %vm188_vm1, %v2939_v12  ;;  %5711 = vmatpush3.bf16.xpose.msk.msra.mxu0 %vm6369_vm12, %v5682_v51 }
 0xcff   :  { %5380 = vmatprep.mubr.msk.f32.mxu0 %vm188_vm1, %v2936_v39  ;;  %5729 = vmatpush3.bf16.xpose.msk.msra.mxu1 %vm6369_vm12, %v5688_v22 }
 0xd00   :  { %5401 = vmatprep.mubr.msk.f32.mxu1 %vm188_vm1, %v3104_v35  ;;  %5720 = vmatprep.subr.msk.bf16.mxu0 %vm6369_vm12, %v5682_v51 }
 0xd05   :  { %5381 = vmatmul.mubr.msk.f32.vlgmr.msra.gmra.mrb[34].mxu0 %vm188_vm1, %v2937_v19 }
 0xd06   :  { %5402 = vmatmul.mubr.msk.f32.vlgmr.msra.gmra.mrb[22].mxu1 %vm188_vm1, %v3105_v46  ;;  %5723 = vmatpush3.bf16.xpose.msk.msra.mxu0 %vm6369_vm12, %v5682_v51 }
 0xd07   :  { %5394 = vmatprep.mubr.msk.f32.mxu0 %vm188_vm1, %v3102_v17  ;;  %5731 = vmatprep.subr.bf16.mxu0 %v5730_v2 }
 0xd0d   :  { %5395 = vmatmul.mubr.msk.f32.vlgmr.msra.gmra.mrb[36].mxu0 %vm188_vm1, %v3103_v58 }
 0xd0e   :  { %5733 = vmatpush3.bf16.msra.mxu0 %v5730_v2 }
 0xd0f   :  { %5735 = vmatprep.subr.bf16.mxu0 %v7080_v50 }
 0xdbb   :  { %v5354_v56 = vpop.f32.mrb[28].mxu0 }
 0xdbc   :  { %v7084_v54 = vmul.f32 0.35355338, %v5354_v56  ;;  %v2670_v43 = vpop.f32.mrb[29].mxu0 }
 0xdbd   :  { %v7086_v29 = vmul.f32 0.35355338, %v2670_v43 }
 0xdbe   :  { %v3287_v30 = vsel %vm1059_vm13, %v7084_v54, -inf }
 0xdbf   :  { %3288 = vmax.xlane.f32.xlu1 %v3287_v30  ;;  %v3284_v38 = vsel %vm1059_vm13, %v7086_v29, -inf }
 0xdc0   :  { %3285 = vmax.xlane.f32.xlu0 %v3284_v38 }
 0xdc8   :  { %v5361_v27 = vpop.f32.mrb[30].mxu0  ;;  %v5375_v63 = vpop.f32.mrb[18].mxu1 }
 0xdc9   :  { %v7092_v40 = vmul.f32 0.35355338, %v5375_v63  ;;  %v2761_v44 = vpop.f32.mrb[31].mxu0  ;;  %v2927_v59 = vpop.f32.mrb[19].mxu1  ;;  %v7096_v61 = vmul.f32 0.35355338, %v5361_v27 }
 0xdca   :  { %v7094_v18 = vmul.f32 0.35355338, %v2927_v59  ;;  %v7100_v49 = vmul.f32 0.35355338, %v2761_v44 }
 0xdcb   :  { %v3305_v62 = vsel %vm1059_vm13, %v7092_v40, -inf  ;;  %v3293_v60 = vsel %vm1059_vm13, %v7096_v61, -inf }
 0xdcc   :  { %3306 = vmax.xlane.f32.xlu1 %v3305_v62  ;;  %v3302_v51 = vsel %vm1059_vm13, %v7094_v18, -inf  ;;  %v3290_v23 = vsel %vm1059_vm13, %v7100_v49, -inf }
 0xdcd   :  { %3303 = vmax.xlane.f32.xlu0 %v3302_v51 }
 0xdd0   :  { %3294 = vmax.xlane.f32.xlu1 %v3293_v60  ;;  %v5368_v8 = vpop.f32.mrb[32].mxu0 }
 0xdd1   :  { %v5389_v14 = vpop.f32.mrb[20].mxu1  ;;  %v7108_v55 = vmul.f32 0.35355338, %v5368_v8  ;;  %3291 = vmax.xlane.f32.xlu0 %v3290_v23  ;;  %v2846_v22 = vpop.f32.mrb[33].mxu0 }
 0xdd2   :  { %v7110_v15 = vmul.f32 0.35355338, %v5389_v14  ;;  %v3093_v45 = vpop.f32.mrb[21].mxu1  ;;  %v7116_v26 = vmul.f32 0.35355338, %v2846_v22 }
 0xdd3   :  { %v3299_v9 = vsel %vm1059_vm13, %v7108_v55, -inf  ;;  %v7114_v3 = vmul.f32 0.35355338, %v3093_v45 }
 0xdd4   :  { %v3317_v12 = vsel %vm1059_vm13, %v7110_v15, -inf  ;;  %v3296_v39 = vsel %vm1059_vm13, %v7116_v26, -inf }
 0xdd5   :  { %3318 = vmax.xlane.f32.xlu1 %v3317_v12  ;;  %3300 = vmax.xlane.f32.xlu0 %v3299_v9  ;;  %v3314_v35 = vsel %vm1059_vm13, %v7114_v3, -inf }
 0xdd8   :  { %v5382_v33 = vpop.f32.mrb[34].mxu0 }
 0xdd9   :  { %v5403_v31 = vpop.f32.mrb[22].mxu1  ;;  %3297 = vmax.xlane.f32.xlu1 %v3296_v39  ;;  %v7124_v28 = vmul.f32 0.35355338, %v5382_v33  ;;  %3315 = vmax.xlane.f32.xlu0 %v3314_v35  ;;  %v3012_v19 = vpop.f32.mrb[35].mxu0 }
 0xdda   :  { %v3259_v46 = vpop.f32.mrb[23].mxu1  ;;  %v7126_v2 = vmul.f32 0.35355338, %v3012_v19  ;;  %v7130_v42 = vmul.f32 0.35355338, %v5403_v31 }
 0xddb   :  { %v3311_v17 = vsel %vm1059_vm13, %v7124_v28, -inf  ;;  %v7132_v34 = vmul.f32 0.35355338, %v3259_v46 }
 0xddc   :  { %v3308_v37 = vsel %vm1059_vm13, %v7126_v2, -inf  ;;  %v3329_v58 = vsel %vm1059_vm13, %v7130_v42, -inf }
 0xddd   :  { %3312 = vmax.xlane.f32.xlu1 %v3311_v17  ;;  %3309 = vmax.xlane.f32.xlu0 %v3308_v37  ;;  %v3326_v43 = vsel %vm1059_vm13, %v7132_v34, -inf }
 0xde0   :  { %v5396_v56 = vpop.f32.mrb[36].mxu0 }
 0xde1   :  { %3330 = vmax.xlane.f32.xlu1 %v3329_v58  ;;  %v7140_v30 = vmul.f32 0.35355338, %v5396_v56  ;;  %3327 = vmax.xlane.f32.xlu0 %v3326_v43  ;;  %v3178_v38 = vpop.f32.mrb[37].mxu0 }
 0xde2   :  { %v7142_v27 = vmul.f32 0.35355338, %v3178_v38 }
 0xde3   :  { %v3323_v63 = vsel %vm1059_vm13, %v7140_v30, -inf }
 0xde4   :  { %v3320_v44 = vsel %vm1059_vm13, %v7142_v27, -inf }
 0xde5   :  { %3324 = vmax.xlane.f32.xlu1 %v3323_v63  ;;  %3321 = vmax.xlane.f32.xlu0 %v3320_v44 }
 0xdf6   :  { %5925 = vrot.lane.b32.xlu1 %v5924_v21, %s6159_s26 }
 0xdfb   :  { %5920 = vrot.lane.b32.xlu0 %v5919_v25, %s6159_s26 }
 0xe4c   :  { %v3289_v59 = vpop.xlane.xlu1 %3288 }
 0xe4d   :  { %v3333_v62 = vsub.f32 %v7084_v54, %v3289_v59  ;;  %v3286_v51 = vpop.xlane.xlu0 %3285 }
 0xe4e   :  { %v3332_v60 = vsub.f32 %v7086_v29, %v3286_v51 }
 0xe4f   :  { %v3350_v8 = vmul.f32 1.442695, %v3333_v62 }
 0xe50   :  { %v3348_v23 = vmul.f32 1.442695, %v3332_v60 }
 0xe51   :  { %6045 = vpow2.f32 %v3350_v8 }
 0xe52   :  { %6047 = vpow2.f32 %v3348_v23 }
 0xe59   :  { %v3307_v14 = vpop.xlane.xlu1 %3306 }
 0xe5a   :  { %v3339_v22 = vsub.f32 %v7092_v40, %v3307_v14  ;;  %v3304_v4 = vpop.xlane.xlu0 %3303 }
 0xe5b   :  { %v3338_v7 = vsub.f32 %v7094_v18, %v3304_v4  ;;  %v7160_v21 = vpop.eup %6045 }
 0xe5c   :  { %v3362_v52 = vmul.f32 1.442695, %v3339_v22  ;;  %v7162_v32 = vpop.eup %6047  ;;  %v3383_v29 = vsel %vm1059_vm13, %v7160_v21, 0.0 }
 0xe5d   :  { %v3360_v25 = vmul.f32 1.442695, %v3338_v7  ;;  %v3295_v54 = vpop.xlane.xlu1 %3294  ;;  %3384 = vadd.xlane.f32.xlu1 %v3383_v29  ;;  %v3380_v40 = vsel %vm1059_vm13, %v7162_v32, 0.0 }
 0xe5e   :  { %6049 = vpow2.f32 %v3362_v52  ;;  %v3335_v45 = vsub.f32 %v7096_v61, %v3295_v54  ;;  %v3292_v9 = vpop.xlane.xlu0 %3291  ;;  %3381 = vadd.xlane.f32.xlu0 %v3380_v40 }
 0xe5f   :  { %6051 = vpow2.f32 %v3360_v25  ;;  %v3334_v18 = vsub.f32 %v7100_v49, %v3292_v9 }
 0xe60   :  { %v3354_v12 = vmul.f32 1.442695, %v3335_v45 }
 0xe61   :  { %v3352_v39 = vmul.f32 1.442695, %v3334_v18 }
 0xe62   :  { %6053 = vpow2.f32 %v3354_v12  ;;  %v3319_v33 = vpop.xlane.xlu1 %3318  ;;  %v3301_v35 = vpop.xlane.xlu0 %3300 }
 0xe63   :  { %6055 = vpow2.f32 %v3352_v39  ;;  %v3343_v31 = vsub.f32 %v7110_v15, %v3319_v33  ;;  %v3337_v19 = vsub.f32 %v7108_v55, %v3301_v35 }
 0xe65   :  { %v3358_v61 = vmul.f32 1.442695, %v3337_v19  ;;  %v3370_v46 = vmul.f32 1.442695, %v3343_v31 }
 0xe66   :  { %v3298_v17 = vpop.xlane.xlu1 %3297  ;;  %v3316_v23 = vpop.xlane.xlu0 %3315 }
 0xe67   :  { %v3336_v37 = vsub.f32 %v7116_v26, %v3298_v17  ;;  %6057 = vpow2.f32 %v3358_v61  ;;  %v3342_v4 = vsub.f32 %v7114_v3, %v3316_v23 }
 0xe68   :  { %v7173_v58 = vpop.eup %6049  ;;  %6059 = vpow2.f32 %v3370_v46 }
 0xe69   :  { %v7175_v49 = vpop.eup %6051  ;;  %v3356_v56 = vmul.f32 1.442695, %v3336_v37  ;;  %v3401_v43 = vsel %vm1059_vm13, %v7173_v58, 0.0  ;;  %v3368_v25 = vmul.f32 1.442695, %v3342_v4  ;;  %v4859_v37 = vld [vmem:[%s7447_s6 + $0x20] sm:$0xff] }
 0xe6a   :  { %3402 = vadd.xlane.f32.xlu1 %v3401_v43  ;;  %v3398_v15 = vsel %vm1059_vm13, %v7175_v49, 0.0  ;;  %v3313_v14 = vpop.xlane.xlu1 %3312  ;;  %v3310_v22 = vpop.xlane.xlu0 %3309  ;;  %v4861_v43 = vld [vmem:[%s7447_s6 + $0x30] sm:$0xff] }
 0xe6b   :  { %6061 = vpow2.f32 %v3356_v56  ;;  %3399 = vadd.xlane.f32.xlu0 %v3398_v15  ;;  %v3341_v52 = vsub.f32 %v7124_v28, %v3313_v14  ;;  %v3340_v54 = vsub.f32 %v7126_v2, %v3310_v22  ;;  %v4860_v56 = vld [vmem:[%s7447_s6 + $0x28] sm:$0xff]  ;;  %v5766_v16 = vpack.c.bf16 %v4862_v20, %v4861_v43 }
 0xe6c   :  { %v7181_v55 = vpop.eup %6053  ;;  %6063 = vpow2.f32 %v3368_v25  ;;  %v5762_v15 = vpack.c.bf16 %v4860_v56, %v4859_v37 }
 0xe6d   :  { %v7183_v38 = vpop.eup %6055  ;;  %v3389_v26 = vsel %vm1059_vm13, %v7181_v55, 0.0  ;;  %v3366_v45 = vmul.f32 1.442695, %v3341_v52 }
 0xe6e   :  { %3390 = vadd.xlane.f32.xlu1 %v3389_v26  ;;  %v3386_v63 = vsel %vm1059_vm13, %v7183_v38, 0.0  ;;  %v3331_v7 = vpop.xlane.xlu1 %3330  ;;  %v3328_v29 = vpop.xlane.xlu0 %3327  ;;  %5763 = vmatprep.subr.bf16.mxu1 %v5762_v15 }
 0xe6f   :  { %3387 = vadd.xlane.f32.xlu0 %v3386_v63  ;;  %v3347_v53 = vsub.f32 %v7130_v42, %v3331_v7  ;;  %v3346_v24 = vsub.f32 %v7132_v34, %v3328_v29  ;;  %6065 = vpow2.f32 %v3366_v45  ;;  %5765 = vmatpush3.bf16.msra.mxu1 %v5762_v15 }
 0xe70   :  { %5767 = vmatprep.subr.bf16.mxu1 %v5766_v16 }
 0xe71   :  { %v7189_v44 = vpop.eup %6057  ;;  %v3378_v1 = vmul.f32 1.442695, %v3347_v53  ;;  %v3376_v9 = vmul.f32 1.442695, %v3346_v24 }
 0xe72   :  { %v3395_v59 = vsel %vm1059_vm13, %v7189_v44, 0.0  ;;  %v7193_v62 = vpop.eup %6059  ;;  %v3325_v5 = vpop.xlane.xlu1 %3324 }
 0xe73   :  { %3396 = vadd.xlane.f32.xlu1 %v3395_v59  ;;  %v3413_v8 = vsel %vm1059_vm13, %v7193_v62, 0.0  ;;  %v3322_v3 = vpop.xlane.xlu0 %3321  ;;  %5769 = vmatpush3.bf16.msra.mxu1 %v5766_v16 }
 0xe74   :  { %v3344_v2 = vsub.f32 %v7142_v27, %v3322_v3 }
 0xe75   :  { %v7195_v51 = vpop.eup %6061 }
 0xe76   :  { %v3392_v60 = vsel %vm1059_vm13, %v7195_v51, 0.0  ;;  %v3372_v40 = vmul.f32 1.442695, %v3344_v2  ;;  %v7216_v42 = vpop.eup %6063 }
 0xe77   :  { %3393 = vadd.xlane.f32.xlu0 %v3392_v60  ;;  %3414 = vadd.xlane.f32.xlu1 %v3413_v8  ;;  %v3410_v34 = vsel %vm1059_vm13, %v7216_v42, 0.0  ;;  %v5921_v48 = vpop.permute.xlu0 %5920 }
 0xe78   :  { %v5923_v7 = vunpack.i.h.bf16 %v5921_v48  ;;  %v5922_v52 = vunpack.i.l.bf16 %v5921_v48 }
 0xe79   :  { %v7218_v18 = vpop.eup %6065 }
 0xe88   :  { %5935 = vrot.lane.b32.xlu1 %v5934_v47, %s6159_s26  ;;  %v3364_v47 = vmul.f32 1.442695, %v3340_v54 }
 0xe8a   :  { %6067 = vpow2.f32 %v3364_v47 }
 0xe8b   :  { %6069 = vpow2.f32 %v3378_v1  ;;  %v5738_v1 = vpack.c.bf16 %v5923_v7, %v5922_v52 }
 0xe8c   :  { %6071 = vpow2.f32 %v3376_v9 }
 0xe8d   :  { %5930 = vrot.lane.b32.xlu0 %v5929_v0, %s6159_s26  ;;  %v3345_v0 = vsub.f32 %v7140_v30, %v3325_v5  ;;  %v3407_v30 = vsel %vm1059_vm13, %v7218_v18, 0.0 }
 0xe8f   :  { %v3374_v28 = vmul.f32 1.442695, %v3345_v0 }
 0xe91   :  { %6073 = vpow2.f32 %v3374_v28 }
 0xe92   :  { %6075 = vpow2.f32 %v3372_v40 }
 0xe94   :  { %v7222_v12 = vpop.eup %6067 }
 0xe95   :  { %v7226_v39 = vpop.eup %6069  ;;  %v3404_v27 = vsel %vm1059_vm13, %v7222_v12, 0.0 }
 0xe96   :  { %v7230_v33 = vpop.eup %6071  ;;  %v3425_v35 = vsel %vm1059_vm13, %v7226_v39, 0.0 }
 0xe97   :  { %v3422_v19 = vsel %vm1059_vm13, %v7230_v33, 0.0 }
 0xe9b   :  { %v7234_v31 = vpop.eup %6073 }
 0xe9c   :  { %v3419_v61 = vsel %vm1059_vm13, %v7234_v31, 0.0  ;;  %v7240_v46 = vpop.eup %6075 }
 0xe9d   :  { %v3416_v17 = vsel %vm1059_vm13, %v7240_v46, 0.0 }
 0xeac   :  { %3411 = vadd.xlane.f32.xlu0 %v3410_v34  ;;  %3408 = vadd.xlane.f32.xlu1 %v3407_v30 }
 0xeb0   :  { %3405 = vadd.xlane.f32.xlu0 %v3404_v27  ;;  %3426 = vadd.xlane.f32.xlu1 %v3425_v35 }
 0xeb4   :  { %3423 = vadd.xlane.f32.xlu0 %v3422_v19  ;;  %3420 = vadd.xlane.f32.xlu1 %v3419_v61 }
 0xeb8   :  { %3417 = vadd.xlane.f32.xlu1 %v3416_v17 }
 0xec9   :  { %5945 = vrot.lane.b32.xlu1 %v5944_v11, %s6159_s26 }
 0xeca   :  { %5940 = vrot.lane.b32.xlu0 %v5939_v36, %s6159_s26  ;;  %v5926_v36 = vpop.permute.xlu1 %5925 }
 0xecb   :  { %v5928_v47 = vunpack.i.h.bf16 %v5926_v36  ;;  %v5927_v24 = vunpack.i.l.bf16 %v5926_v36 }
 0xecd   :  { %v5742_v28 = vpack.c.bf16 %v5928_v47, %v5927_v24 }
 0xeea   :  { %v3385_v6 = vpop.xlane.xlu1 %3384 }
 0xeeb   :  { %v3382_v11 = vpop.xlane.xlu0 %3381 }
 0xef7   :  { %v3403_v26 = vpop.xlane.xlu1 %3402 }
 0xef8   :  { %v3400_v63 = vpop.xlane.xlu0 %3399 }
 0xef9   :  { %6077 = vrcp.f32 %v3400_v63 }
 0xefb   :  { %v3391_v59 = vpop.xlane.xlu1 %3390 }
 0xefc   :  { %v3388_v60 = vpop.xlane.xlu0 %3387 }
 0xf00   :  { %v3397_v8 = vpop.xlane.xlu1 %3396 }
 0xf01   :  { %6079 = vrcp.f32 %v3397_v8 }
 0xf03   :  { %v6078_v14 = vpop.eup %6077 }
 0xf04   :  { %v3394_v23 = vpop.xlane.xlu0 %3393  ;;  %v3415_v45 = vpop.xlane.xlu1 %3414  ;;  %v3441_v53 = vmul.f32 %v6078_v14, %v7175_v49 }
 0xf05   :  { %6081 = vrcp.f32 %v3394_v23 }
 0xf06   :  { %6083 = vrcp.f32 %v3403_v26 }
 0xf07   :  { %6085 = vrcp.f32 %v3382_v11 }
 0xf08   :  { %6087 = vrcp.f32 %v3385_v6  ;;  %v5931_v0 = vpop.permute.xlu0 %5930  ;;  %v5936_v40 = vpop.permute.xlu1 %5935 }
 0xf09   :  { %6089 = vrcp.f32 %v3388_v60  ;;  %v5933_v49 = vunpack.i.h.bf16 %v5931_v0  ;;  %v5932_v2 = vunpack.i.l.bf16 %v5931_v0  ;;  %v5938_v27 = vunpack.i.h.bf16 %v5936_v40 }
 0xf0a   :  { %6091 = vrcp.f32 %v3391_v59  ;;  %v5937_v35 = vunpack.i.l.bf16 %v5936_v40 }
 0xf0b   :  { %v6080_v22 = vpop.eup %6079  ;;  %v5746_v30 = vpack.c.bf16 %v5933_v49, %v5932_v2 }
 0xf0c   :  { %v3439_v54 = vmul.f32 %v6080_v22, %v7189_v44  ;;  %v5750_v19 = vpack.c.bf16 %v5938_v27, %v5937_v35 }
 0xf0f   :  { %v6082_v4 = vpop.eup %6081 }
 0xf10   :  { %v3437_v25 = vmul.f32 %v6082_v4, %v7195_v51  ;;  %v6084_v29 = vpop.eup %6083 }
 0xf11   :  { %v6086_v5 = vpop.eup %6085  ;;  %v3443_v51 = vmul.f32 %v6084_v29, %v7173_v58 }
 0xf12   :  { %5408 = vmatprep.mubr.msk.f32.mxu0 %vm1059_vm13, %v3437_v25  ;;  %v6088_v44 = vpop.eup %6087  ;;  %v3429_v3 = vmul.f32 %v6086_v5, %v7162_v32 }
 0xf13   :  { %5409 = vmatmul.mubr.msk.f32.vlgmr.msra.gmra.mrb[38].mxu0 %vm1059_vm13, %v3439_v54  ;;  %v6090_v9 = vpop.eup %6089 }
 0xf14   :  { %5737 = vmatpush3.bf16.msra.mxu0 %v7080_v50  ;;  %5415 = vmatprep.mubr.msk.f32.mxu0 %vm1059_vm13, %v3441_v53  ;;  %v3431_v50 = vmul.f32 %v6088_v44, %v7160_v21  ;;  %v6092_v34 = vpop.eup %6091  ;;  %v3433_v58 = vmul.f32 %v6090_v9, %v7183_v38 }
 0xf15   :  { %5739 = vmatprep.subr.bf16.mxu0 %v5738_v1  ;;  %v3435_v32 = vmul.f32 %v6092_v34, %v7181_v55 }
 0xf17   :  { %5416 = vmatmul.mubr.msk.f32.vlgmr.msra.gmra.mrb[40].mxu0 %vm1059_vm13, %v3443_v51 }
 0xf18   :  { %5741 = vmatpush3.bf16.msra.mxu0 %v5738_v1  ;;  %5422 = vmatprep.mubr.msk.f32.mxu0 %vm1059_vm13, %v3429_v3 }
 0xf19   :  { %5743 = vmatprep.subr.bf16.mxu0 %v5742_v28 }
 0xf1b   :  { %5423 = vmatmul.mubr.msk.f32.vlgmr.msra.gmra.mrb[38].mxu0 %vm1059_vm13, %v3431_v50 }
 0xf1c   :  { %5745 = vmatpush3.bf16.msra.mxu0 %v5742_v28  ;;  %5429 = vmatprep.mubr.msk.f32.mxu0 %vm1059_vm13, %v3433_v58 }
 0xf1d   :  { %5747 = vmatprep.subr.bf16.mxu0 %v5746_v30 }
 0xf1f   :  { %5430 = vmatmul.mubr.msk.f32.vlgmr.msra.gmra.mrb[40].mxu0 %vm1059_vm13, %v3435_v32 }
 0xf20   :  { %5749 = vmatpush3.bf16.msra.mxu0 %v5746_v30 }
 0xf21   :  { %5751 = vmatprep.subr.bf16.mxu0 %v5750_v19 }
 0xf39   :  { %v3412_v21 = vpop.xlane.xlu0 %3411  ;;  %v3409_v61 = vpop.xlane.xlu1 %3408 }
 0xf3a   :  { %6093 = vrcp.f32 %v3412_v21 }
 0xf3b   :  { %6095 = vrcp.f32 %v3409_v61 }
 0xf3d   :  { %v3406_v38 = vpop.xlane.xlu0 %3405  ;;  %v3427_v17 = vpop.xlane.xlu1 %3426 }
 0xf3e   :  { %6097 = vrcp.f32 %v3406_v38 }
 0xf3f   :  { %6099 = vrcp.f32 %v3415_v45  ;;  %v4867_v45 = vld [vmem:[%s7448_s7 + $0x1] ss:$0 sm:$0xff] }
 0xf41   :  { %v3424_v37 = vpop.xlane.xlu0 %3423  ;;  %v3421_v56 = vpop.xlane.xlu1 %3420 }
 0xf42   :  { %6101 = vrcp.f32 %v3424_v37 }
 0xf43   :  { %6103 = vrcp.f32 %v3421_v56 }
 0xf44   :  { %v6094_v15 = vpop.eup %6093 }
 0xf45   :  { %v5941_v43 = vpop.permute.xlu0 %5940  ;;  %v3418_v55 = vpop.xlane.xlu1 %3417  ;;  %v3449_v59 = vmul.f32 %v6094_v15, %v7216_v42 }
 0xf46   :  { %v6096_v20 = vpop.eup %6095  ;;  %6105 = vrcp.f32 %v3418_v55  ;;  %v5943_v36 = vunpack.i.h.bf16 %v5941_v43  ;;  %v5942_v48 = vunpack.i.l.bf16 %v5941_v43  ;;  %v4870_v55 = vld [vmem:[%s7451_s10 + $0x20] sm:$0xff] }
 0xf47   :  { %v3447_v11 = vmul.f32 %v6096_v20, %v7218_v18  ;;  %6107 = vrcp.f32 %v3427_v17  ;;  %v4871_v20 = vld [vmem:[%s7451_s10 + $0x28] sm:$0xff] }
 0xf48   :  { %v6098_v16 = vpop.eup %6097  ;;  %v5754_v60 = vpack.c.bf16 %v5943_v36, %v5942_v48  ;;  %v5770_v36 = vpack.c.bf16 %v4871_v20, %v4870_v55  ;;  %v4873_v48 = vld [vmem:[%s7451_s10 + $0x38] sm:$0xff]  ;;  %v4874_v55 = vld [vmem:[%s7452_s11 + $0x1] ss:$0 sm:$0xff] }
 0xf49   :  { %v3445_v6 = vmul.f32 %v6098_v16, %v7222_v12  ;;  %v5946_v26 = vpop.permute.xlu1 %5945  ;;  %v6100_v63 = vpop.eup %6099  ;;  %v4872_v16 = vld [vmem:[%s7451_s10 + $0x30] sm:$0xff] }
 0xf4a   :  { %v5948_v8 = vunpack.i.h.bf16 %v5946_v26  ;;  %v5947_v23 = vunpack.i.l.bf16 %v5946_v26  ;;  %v3451_v14 = vmul.f32 %v6100_v63, %v7193_v62  ;;  %5771 = vmatprep.subr.bf16.mxu1 %v5770_v36  ;;  %v4880_v26 = vld [vmem:[%s7453_s12 + $0x88] sm:$0xff] }
 0xf4b   :  { %5436 = vmatprep.mubr.msk.f32.mxu0 %vm1059_vm13, %v3445_v6  ;;  %v5774_v6 = vpack.c.bf16 %v4873_v48, %v4872_v16 }
 0xf4c   :  { %5437 = vmatmul.mubr.msk.f32.vlgmr.msra.gmra.mrb[38].mxu0 %vm1059_vm13, %v3447_v11  ;;  %v6102_v12 = vpop.eup %6101  ;;  %v5758_v22 = vpack.c.bf16 %v5948_v8, %v5947_v23  ;;  %v4879_v11 = vld [vmem:[%s7453_s12 + $0x80] sm:$0xff] }
 0xf4d   :  { %5753 = vmatpush3.bf16.msra.mxu0 %v5750_v19  ;;  %5443 = vmatprep.mubr.msk.f32.mxu0 %vm1059_vm13, %v3449_v59  ;;  %v6104_v18 = vpop.eup %6103  ;;  %v3457_v25 = vmul.f32 %v6102_v12, %v7230_v33  ;;  %v5778_v63 = vpack.c.bf16 %v4880_v26, %v4879_v11 }
 0xf4e   :  { %5755 = vmatprep.subr.bf16.mxu0 %v5754_v60  ;;  %v3455_v7 = vmul.f32 %v6104_v18, %v7234_v31 }
 0xf50   :  { %5444 = vmatmul.mubr.msk.f32.vlgmr.msra.gmra.mrb[40].mxu0 %vm1059_vm13, %v3451_v14  ;;  %v6106_v4 = vpop.eup %6105 }
 0xf51   :  { %5757 = vmatpush3.bf16.msra.mxu0 %v5754_v60  ;;  %v3453_v42 = vmul.f32 %v6106_v4, %v7240_v46  ;;  %v6108_v52 = vpop.eup %6107 }
 0xf52   :  { %5759 = vmatprep.subr.bf16.mxu0 %v5758_v22  ;;  %v3459_v62 = vmul.f32 %v6108_v52, %v7226_v39 }
 0xf53   :  { %5450 = vmatprep.mubr.msk.f32.mxu0 %vm1059_vm13, %v3453_v42 }
 0xf54   :  { %5451 = vmatmul.mubr.msk.f32.vlgmr.msra.gmra.mrb[38].mxu0 %vm1059_vm13, %v3455_v7 }
 0xf55   :  { %5761 = vmatpush3.bf16.msra.mxu0 %v5758_v22  ;;  %5457 = vmatprep.mubr.msk.f32.mxu0 %vm1059_vm13, %v3457_v25 }
 0xf58   :  { %5458 = vmatmul.mubr.msk.f32.vlgmr.msra.gmra.mrb[40].mxu0 %vm1059_vm13, %v3459_v62  ;;  %v4868_v62 = vld [vmem:[%s7449_s8 + $0x1] ss:$0 sm:$0xff] }
0x1027   :  { %v5452_v54 = vpop.f32.mrb[38].mxu0 }
0x1028   :  { %v4094_v29 = vpop.f32.mrb[39].mxu0 }
0x1029   :  { %5468 = vmatprep.mubr.msk.f32.mxu1 %vm188_vm1, %v4094_v29 }
0x102a   :  { %5469 = vmatmul.mubr.msk.f32.vlgmr.msra.gmra.mrb[24].mxu1 %vm188_vm1, %v5452_v54 }
0x102b   :  { %v5459_v31 = vpop.f32.mrb[40].mxu0  ;;  %5773 = vmatpush3.bf16.msra.mxu1 %v5770_v36 }
0x102c   :  { %v4183_v46 = vpop.f32.mrb[41].mxu0  ;;  %5775 = vmatprep.subr.bf16.mxu1 %v5774_v6 }
0x102d   :  { %5471 = vmatprep.mubr.msk.f32.mxu1 %vm188_vm1, %v4183_v46  ;;  %v4869_v46 = vld [vmem:[%s7450_s9 + $0x1] ss:$0 sm:$0xff] }
0x102e   :  { %5472 = vmatmul.mubr.msk.f32.gmra.mrb[26].mxu1 %vm188_vm1, %v5459_v31 }
0x102f   :  { %5777 = vmatpush3.bf16.msra.mxu1 %v5774_v6 }
0x1030   :  { %5779 = vmatprep.subr.bf16.mxu1 %v5778_v63 }
0x10fd   :  { %v5470_v33 = vpop.f32.mrb[24].mxu1 }
0x10fe   :  { %v4299_v39 = vadd.f32 %v5470_v33, %v6880_v57  ;;  %v4279_v53 = vpop.f32.mrb[25].mxu1 }
0x10ff   :  { %v4298_v5 = vadd.f32 %v4279_v53, %v6882_v10  ;;  %v4882_v53 = vld [vmem:[%s7453_s12 + $0x98] sm:$0xff] }
0x1100   :  { %v7306_v47 = vadd.f32 %v4867_v45, %v4299_v39  ;;  %v4881_v39 = vld [vmem:[%s7453_s12 + $0x90] sm:$0xff] }
0x1101   :  { %v7308_v24 = vadd.f32 %v4867_v45, %v4298_v5  ;;  %v5473_v1 = vpop.f32.mrb[26].mxu1 }
0x1102   :  { %v4289_v0 = vpop.f32.mrb[27].mxu1  ;;  %v4316_v51 = vsel %vm188_vm1, %v7306_v47, 0.0  ;;  %v4301_v44 = vadd.f32 %v5473_v1, %v6890_v13 }
0x1103   :  { %v4300_v3 = vadd.f32 %v4289_v0, %v6892_v41  ;;  %4317 = vadd.xlane.f32.xlu1 %v4316_v51  ;;  %v4313_v57 = vsel %vm188_vm1, %v7308_v24, 0.0 }
0x1104   :  { %4314 = vadd.xlane.f32.xlu0 %v4313_v57  ;;  %v7318_v10 = vadd.f32 %v4867_v45, %v4301_v44  ;;  %v5782_v44 = vpack.c.bf16 %v4882_v53, %v4881_v39  ;;  %v4883_v57 = vld [vmem:[%s7453_s12 + $0xa0] sm:$0xff] }
0x1105   :  { %v7316_v9 = vadd.f32 %v4867_v45, %v4300_v3  ;;  %v4895_v53 = vld [vmem:[%s7454_s13 + $0x1] ss:$0 sm:$0xff] }
0x1106   :  { %v4322_v49 = vsel %vm188_vm1, %v7318_v10, 0.0 }
0x1107   :  { %v4319_v28 = vsel %vm188_vm1, %v7316_v9, 0.0 }
0x1108   :  { %4320 = vadd.xlane.f32.xlu0 %v4319_v28  ;;  %v4884_v28 = vld [vmem:[%s7453_s12 + $0xa8] sm:$0xff] }
0x110c   :  { %4323 = vadd.xlane.f32.xlu0 %v4322_v49 }
0x1190   :  { %v4318_v13 = vpop.xlane.xlu1 %4317 }
0x1191   :  { %v4326_v2 = vmul.f32 0.03125, %v4318_v13  ;;  %v4315_v41 = vpop.xlane.xlu0 %4314 }
0x1192   :  { %v4325_v40 = vmul.f32 0.03125, %v4315_v41  ;;  %v5786_v41 = vpack.c.bf16 %v4884_v28, %v4883_v57 }
0x1193   :  { %v4330_v50 = vsub.f32 %v7306_v47, %v4326_v2 }
0x1194   :  { %v4329_v34 = vsub.f32 %v7308_v24, %v4325_v40 }
0x1195   :  { %v4321_v58 = vpop.xlane.xlu0 %4320  ;;  %v4334_v30 = vmul.f32 %v4330_v50, %v4330_v50 }
0x1196   :  { %v4327_v27 = vmul.f32 0.03125, %v4321_v58  ;;  %v4333_v35 = vmul.f32 %v4329_v34, %v4329_v34  ;;  %v4886_v58 = vld [vmem:[%s7453_s12 + $0xb8] sm:$0xff] }
0x1197   :  { %v4340_v32 = vsel %vm188_vm1, %v4334_v30, 0.0 }
0x1198   :  { %v4331_v19 = vsub.f32 %v7316_v9, %v4327_v27  ;;  %4341 = vadd.xlane.f32.xlu1 %v4340_v32  ;;  %v4337_v21 = vsel %vm188_vm1, %v4333_v35, 0.0  ;;  %v4887_v27 = vld [vmem:[%s7453_s12 + $0xc0] sm:$0xff]  ;;  %v4888_v35 = vld [vmem:[%s7453_s12 + $0xc8] sm:$0xff] }
0x1199   :  { %4338 = vadd.xlane.f32.xlu0 %v4337_v21  ;;  %v4324_v61 = vpop.xlane.xlu0 %4323  ;;  %v5794_v32 = vpack.c.bf16 %v4888_v35, %v4887_v27  ;;  %v4890_v21 = vld [vmem:[%s7453_s12 + $0xd8] sm:$0xff] }
0x119a   :  { %v4328_v38 = vmul.f32 0.03125, %v4324_v61  ;;  %v4335_v17 = vmul.f32 %v4331_v19, %v4331_v19 }
0x119c   :  { %v4332_v37 = vsub.f32 %v7318_v10, %v4328_v38  ;;  %v4343_v56 = vsel %vm188_vm1, %v4335_v17, 0.0  ;;  %v4891_v38 = vld [vmem:[%s7453_s12 + $0xe0] sm:$0xff]  ;;  %v4892_v17 = vld [vmem:[%s7453_s12 + $0xe8] sm:$0xff] }
0x119d   :  { %4344 = vadd.xlane.f32.xlu0 %v4343_v56  ;;  %v4893_v56 = vld [vmem:[%s7453_s12 + $0xf0] sm:$0xff] }
0x119e   :  { %v4336_v43 = vmul.f32 %v4332_v37, %v4332_v37 }
0x11a0   :  { %v4346_v15 = vsel %vm188_vm1, %v4336_v43, 0.0  ;;  %v4894_v43 = vld [vmem:[%s7453_s12 + $0xf8] sm:$0xff] }
0x11a1   :  { %4347 = vadd.xlane.f32.xlu1 %v4346_v15  ;;  %v5806_v15 = vpack.c.bf16 %v4894_v43, %v4893_v56 }
0x1225   :  { %v4342_v59 = vpop.xlane.xlu1 %4341 }
0x1226   :  { %v4350_v60 = vmul.f32 0.03125, %v4342_v59  ;;  %v4339_v8 = vpop.xlane.xlu0 %4338 }
0x1227   :  { %v4349_v23 = vmul.f32 0.03125, %v4339_v8 }
0x1228   :  { %v4354_v14 = vadd.f32 1e-05, %v4350_v60 }
0x1229   :  { %v4353_v12 = vadd.f32 1e-05, %v4349_v23 }
0x122a   :  { %6109 = vrsqrt.f32 %v4354_v14  ;;  %v4345_v18 = vpop.xlane.xlu0 %4344 }
0x122b   :  { %6111 = vrsqrt.f32 %v4353_v12  ;;  %v4351_v22 = vmul.f32 0.03125, %v4345_v18 }
0x122d   :  { %v4355_v4 = vadd.f32 1e-05, %v4351_v22 }
0x122e   :  { %v4348_v42 = vpop.xlane.xlu1 %4347 }
0x122f   :  { %6113 = vrsqrt.f32 %v4355_v4  ;;  %v4352_v7 = vmul.f32 0.03125, %v4348_v42 }
0x1231   :  { %v4356_v52 = vadd.f32 1e-05, %v4352_v7 }
0x1233   :  { %6115 = vrsqrt.f32 %v4356_v52 }
0x1234   :  { %v6110_v25 = vpop.eup %6109 }
0x1235   :  { %v6112_v54 = vpop.eup %6111  ;;  %v4362_v29 = vmul.f32 %v6110_v25, %v4330_v50 }
0x1236   :  { %v4361_v31 = vmul.f32 %v6112_v54, %v4329_v34  ;;  %v4885_v34 = vld [vmem:[%s7453_s12 + $0xb0] sm:$0xff] }
0x1237   :  { %v4370_v33 = vmul.f32 %v4868_v62, %v4362_v29  ;;  %v5790_v30 = vpack.c.bf16 %v4886_v58, %v4885_v34 }
0x1238   :  { %v4369_v45 = vmul.f32 %v4868_v62, %v4361_v31 }
0x1239   :  { %v6114_v5 = vpop.eup %6113  ;;  %v4378_v51 = vadd.f32 %v4869_v46, %v4370_v33 }
0x123a   :  { %v4377_v1 = vadd.f32 %v4869_v46, %v4369_v45  ;;  %v4363_v0 = vmul.f32 %v6114_v5, %v4331_v19  ;;  %v4889_v19 = vld [vmem:[%s7453_s12 + $0xd0] sm:$0xff] }
0x123b   :  { %v5798_v61 = vpack.c.bf16 %v4890_v21, %v4889_v19 }
0x123c   :  { %5482 = vmatprep.mubr.msk.f32.mxu1 %vm188_vm1, %v4377_v1  ;;  %v4371_v3 = vmul.f32 %v4868_v62, %v4363_v0 }
0x123d   :  { %v6116_v49 = vpop.eup %6115  ;;  %5483 = vmatmul.mubr.msk.f32.vlgmr.msra.gmra.mrb[28].mxu1 %vm188_vm1, %v4378_v51 }
0x123e   :  { %v4379_v13 = vadd.f32 %v4869_v46, %v4371_v3  ;;  %v4364_v2 = vmul.f32 %v6116_v49, %v4332_v37  ;;  %5781 = vmatpush3.bf16.msra.mxu1 %v5778_v63  ;;  %v5802_v37 = vpack.c.bf16 %v4892_v17, %v4891_v38 }
0x123f   :  { %5783 = vmatprep.subr.bf16.mxu1 %v5782_v44 }
0x1240   :  { %5485 = vmatprep.mubr.msk.f32.mxu1 %vm188_vm1, %v4379_v13  ;;  %v4372_v40 = vmul.f32 %v4868_v62, %v4364_v2 }
0x1242   :  { %v4380_v50 = vadd.f32 %v4869_v46, %v4372_v40  ;;  %5785 = vmatpush3.bf16.msra.mxu1 %v5782_v44 }
0x1243   :  { %5787 = vmatprep.subr.bf16.mxu1 %v5786_v41 }
0x1244   :  { %5486 = vmatmul.mubr.msk.f32.gmra.mrb[30].mxu1 %vm188_vm1, %v4380_v50 }
0x1246   :  { %5789 = vmatpush3.bf16.msra.mxu1 %v5786_v41 }
0x1247   :  { %5791 = vmatprep.subr.bf16.mxu1 %v5790_v30 }
0x124a   :  { %5793 = vmatpush3.bf16.msra.mxu1 %v5790_v30 }
0x124b   :  { %5795 = vmatprep.subr.bf16.mxu1 %v5794_v32 }
0x124e   :  { %5797 = vmatpush3.bf16.msra.mxu1 %v5794_v32 }
0x124f   :  { %5799 = vmatprep.subr.bf16.mxu1 %v5798_v61 }
0x1252   :  { %5801 = vmatpush3.bf16.msra.mxu1 %v5798_v61 }
0x1253   :  { %5803 = vmatprep.subr.bf16.mxu1 %v5802_v37 }
0x1256   :  { %5805 = vmatpush3.bf16.msra.mxu1 %v5802_v37 }
0x1257   :  { %5807 = vmatprep.subr.bf16.mxu1 %v5806_v15 }
0x125a   :  { %5809 = vmatpush3.bf16.msra.mxu1 %v5806_v15 }
0x1310   :  { %v5484_v20 = vpop.f32.mrb[28].mxu1 }
0x1311   :  { %v4475_v16 = vadd.f32 %v5484_v20, %v4874_v55  ;;  %v4469_v36 = vpop.f32.mrb[29].mxu1 }
0x1312   :  { %v4470_v48 = vadd.f32 %v4874_v55, %v4469_v36 }
0x1313   :  { %v4493_v6 = vmul.f32 0.70710677, %v4475_v16  ;;  %v4489_v42 = vmul.f32 0.5, %v4475_v16 }
0x1314   :  { %v4492_v11 = vmul.f32 0.70710677, %v4470_v48  ;;  %v4488_v22 = vmul.f32 0.5, %v4470_v48 }
0x1315   :  { %6117 = verf.f32 %v4493_v6 }
0x1316   :  { %6119 = verf.f32 %v4492_v11 }
0x1317   :  { %v5487_v26 = vpop.f32.mrb[30].mxu1 }
0x1318   :  { %v4485_v63 = vadd.f32 %v5487_v26, %v4874_v55  ;;  %v4479_v59 = vpop.f32.mrb[31].mxu1 }
0x1319   :  { %v4480_v60 = vadd.f32 %v4874_v55, %v4479_v59 }
0x131a   :  { %v4495_v8 = vmul.f32 0.70710677, %v4485_v63  ;;  %v4491_v46 = vmul.f32 0.5, %v4485_v63 }
0x131b   :  { %v4494_v23 = vmul.f32 0.70710677, %v4480_v60  ;;  %v4490_v29 = vmul.f32 0.5, %v4480_v60 }
0x131c   :  { %6121 = verf.f32 %v4495_v8 }
0x131d   :  { %6123 = verf.f32 %v4494_v23 }
0x131f   :  { %v6118_v14 = vpop.eup %6117 }
0x1320   :  { %v6120_v12 = vpop.eup %6119  ;;  %v4501_v18 = vadd.f32 1.0, %v6118_v14 }
0x1321   :  { %v4500_v4 = vadd.f32 1.0, %v6120_v12 }
0x1322   :  { %v4505_v52 = vmul.f32 %v4501_v18, %v4489_v42  ;;  %v4896_v18 = vld [vmem:[%s7455_s14] ss:$0 sm:$0xff]  ;;  %s6161_s14 = smov [#allocation2]  }
0x1323   :  { %v4504_v7 = vmul.f32 %v4500_v4, %v4488_v22  ;;  %v4897_v4 = vld [vmem:[%s7456_s15] ss:$0 sm:$0xff]  ;;  %s4722_s15 = sshll.u32 %s6161_s14, 4  ;;  %s4723_s15 = int_to_ptr.vmem [resolvable:$true] %s4722_s15 }
0x1324   :  { %p6138_p1 = scmp.lt.s32.totalorder %s4723_s15, %s4723_s15 }
0x1325   :  { %5520 = vmatprep.mubr.f32.mxu1 %v4504_v7 }
0x1326   :  { %v6122_v25 = vpop.eup %6121  ;;  %5521 = vmatmul.mubr.f32.vlgmr.msra.gmra.mrb[32].mxu1 %v4505_v52 }
0x1327   :  { %v6124_v62 = vpop.eup %6123  ;;  %v4503_v54 = vadd.f32 1.0, %v6122_v25 }
0x1328   :  { %v4502_v31 = vadd.f32 1.0, %v6124_v62 }
0x1329   :  { %v4507_v45 = vmul.f32 %v4503_v54, %v4491_v46 }
0x132a   :  { %v4506_v33 = vmul.f32 %v4502_v31, %v4490_v29 }
0x132c   :  { %5523 = vmatprep.mubr.f32.mxu1 %v4506_v33 }
0x132d   :  { %5524 = vmatmul.mubr.f32.gmra.mrb[34].mxu1 %v4507_v45 }
0x13f9   :  { %v5522_v39 = vpop.f32.mrb[32].mxu1 }
0x13fa   :  { %v4611_v5 = vadd.f32 %v5522_v39, %v7306_v47  ;;  %v4591_v1 = vpop.f32.mrb[33].mxu1 }
0x13fb   :  { %v4610_v28 = vadd.f32 %v4591_v1, %v7308_v24 }
0x13fc   :  { %v4620_v0 = vadd.f32 %v4895_v53, %v4611_v5 }
0x13fd   :  { %v4619_v40 = vadd.f32 %v4895_v53, %v4610_v28 }
0x13fe   :  { %v4628_v51 = vsel %vm188_vm1, %v4620_v0, 0.0 }
0x13ff   :  { %4629 = vadd.xlane.f32.xlu0 %v4628_v51  ;;  %v4625_v50 = vsel %vm188_vm1, %v4619_v40, 0.0 }
0x1400   :  { %v5525_v44 = vpop.f32.mrb[34].mxu1 }
0x1401   :  { %v4613_v3 = vadd.f32 %v5525_v44, %v7318_v10  ;;  %v4601_v57 = vpop.f32.mrb[35].mxu1 }
0x1402   :  { %v4612_v49 = vadd.f32 %v4601_v57, %v7316_v9 }
0x1403   :  { %v4622_v13 = vadd.f32 %v4895_v53, %v4613_v3 }
0x1404   :  { %v4621_v2 = vadd.f32 %v4895_v53, %v4612_v49 }
0x1405   :  { %v4634_v41 = vsel %vm188_vm1, %v4622_v13, 0.0 }
0x1406   :  { %4635 = vadd.xlane.f32.xlu0 %v4634_v41  ;;  %v4631_v47 = vsel %vm188_vm1, %v4621_v2, 0.0 }
0x1407   :  { %4632 = vadd.xlane.f32.xlu1 %v4631_v47 }
0x140b   :  { %4626 = vadd.xlane.f32.xlu1 %v4625_v50 }
0x148c   :  { %v4630_v34 = vpop.xlane.xlu0 %4629 }
0x148d   :  { %v4638_v58 = vmul.f32 0.03125, %v4630_v34 }
0x148f   :  { %v4642_v10 = vsub.f32 %v4620_v0, %v4638_v58 }
0x1491   :  { %v4646_v30 = vmul.f32 %v4642_v10, %v4642_v10 }
0x1493   :  { %v4636_v27 = vpop.xlane.xlu0 %4635  ;;  %v4652_v24 = vsel %vm188_vm1, %v4646_v30, 0.0 }
0x1494   :  { %v4640_v9 = vmul.f32 0.03125, %v4636_v27  ;;  %4653 = vadd.xlane.f32.xlu0 %v4652_v24  ;;  %v4633_v35 = vpop.xlane.xlu1 %4632 }
0x1495   :  { %v4639_v32 = vmul.f32 0.03125, %v4633_v35 }
0x1496   :  { %v4644_v19 = vsub.f32 %v4622_v13, %v4640_v9 }
0x1497   :  { %v4643_v21 = vsub.f32 %v4621_v2, %v4639_v32 }
0x1498   :  { %v4627_v61 = vpop.xlane.xlu1 %4626  ;;  %v4648_v38 = vmul.f32 %v4644_v19, %v4644_v19 }
0x1499   :  { %v4637_v17 = vmul.f32 0.03125, %v4627_v61  ;;  %v4647_v37 = vmul.f32 %v4643_v21, %v4643_v21 }
0x149a   :  { %v4658_v56 = vsel %vm188_vm1, %v4648_v38, 0.0 }
0x149b   :  { %v4641_v43 = vsub.f32 %v4619_v40, %v4637_v17  ;;  %4659 = vadd.xlane.f32.xlu0 %v4658_v56  ;;  %v4655_v15 = vsel %vm188_vm1, %v4647_v37, 0.0 }
0x149c   :  { %4656 = vadd.xlane.f32.xlu1 %v4655_v15 }
0x149d   :  { %v4645_v55 = vmul.f32 %v4641_v43, %v4641_v43 }
0x149f   :  { %v4649_v20 = vsel %vm188_vm1, %v4645_v55, 0.0 }
0x14a0   :  { %4650 = vadd.xlane.f32.xlu1 %v4649_v20 }
0x1521   :  { %v4654_v16 = vpop.xlane.xlu0 %4653 }
0x1522   :  { %v4662_v36 = vmul.f32 0.03125, %v4654_v16 }
0x1524   :  { %v4666_v48 = vadd.f32 1e-05, %v4662_v36 }
0x1526   :  { %6125 = vrsqrt.f32 %v4666_v48 }
0x1528   :  { %v4660_v6 = vpop.xlane.xlu0 %4659 }
0x1529   :  { %v4664_v11 = vmul.f32 0.03125, %v4660_v6  ;;  %v4657_v26 = vpop.xlane.xlu1 %4656 }
0x152a   :  { %v4663_v63 = vmul.f32 0.03125, %v4657_v26 }
0x152b   :  { %v4668_v59 = vadd.f32 1e-05, %v4664_v11 }
0x152c   :  { %v4667_v60 = vadd.f32 1e-05, %v4663_v63 }
0x152d   :  { %6127 = vrsqrt.f32 %v4668_v59  ;;  %v4651_v8 = vpop.xlane.xlu1 %4650 }
0x152e   :  { %6129 = vrsqrt.f32 %v4667_v60  ;;  %v4661_v23 = vmul.f32 0.03125, %v4651_v8 }
0x1530   :  { %v6126_v14 = vpop.eup %6125  ;;  %v4665_v12 = vadd.f32 1e-05, %v4661_v23 }
0x1531   :  { %v4674_v22 = vmul.f32 %v6126_v14, %v4642_v10 }
0x1532   :  { %6131 = vrsqrt.f32 %v4665_v12 }
0x1533   :  { %v4684_v42 = vmul.f32 %v4896_v18, %v4674_v22 }
0x1535   :  { %v4694_v7 = vadd.f32 %v4897_v4, %v4684_v42 }
0x1537   :  { %v6128_v52 = vpop.eup %6127  ;;  %4699 = vrot.lane.b32.xlu0 %v4694_v7, %s6160_s2 }
0x1538   :  { %v6130_v25 = vpop.eup %6129  ;;  %v4676_v54 = vmul.f32 %v6128_v52, %v4644_v19 }
0x1539   :  { %v4675_v62 = vmul.f32 %v6130_v25, %v4643_v21 }
0x153a   :  { %v4686_v33 = vmul.f32 %v4896_v18, %v4676_v54 }
0x153b   :  { %v4685_v29 = vmul.f32 %v4896_v18, %v4675_v62 }
0x153c   :  { %v6132_v31 = vpop.eup %6131  ;;  %v4696_v53 = vadd.f32 %v4897_v4, %v4686_v33 }
0x153d   :  { %v4695_v46 = vadd.f32 %v4897_v4, %v4685_v29  ;;  %v4673_v45 = vmul.f32 %v6132_v31, %v4641_v43 }
0x153f   :  { %4705 = vrot.lane.b32.xlu1 %v4695_v46, %s6159_s26  ;;  %v4683_v39 = vmul.f32 %v4896_v18, %v4673_v45  ;;  %s6133_s26 = scalar_lea.vmem %s4723_s15, 128 }
0x1540   :  { %p6134_p0 = scmp.ne.s32.totalorder %s4723_s15, %s6133_s26  ;;  %p6139_p2 = scmp.lt.s32.totalorder %s6133_s26, %s6133_s26 }
0x1541   :  { %v4693_v5 = vadd.f32 %v4897_v4, %v4683_v39 }
0x1542   :  { %p6140_p3 = por %p6139_p2, %p6138_p1 }
0x1543   :  { %4711 = vrot.lane.b32.xlu1 %v4696_v53, %s6158_s25  ;;  %4697 = vst.msk [vmem:[#allocation2] sm:$0xff] %vm188_vm1, %v4693_v5 }
0x1544   :  { %p6141_p4 = pnand %p6140_p3, %p6134_p0 }
0x15a9   :  { %v4700_v1 = vpop.permute.xlu0 %4699 }
0x15aa   :  { %4703 = vst.msk [vmem:[#allocation2] sm:$0xff] %vm4702_vm14, %v4700_v1 }
0x15b1   :  { %v4706_v0 = vpop.permute.xlu1 %4705 }
0x15b2   :  { %4709 = vst.msk [vmem:[#allocation2] sm:$0xff] %vm4708_vm15, %v4706_v0 }
0x15b5   :  { %v4712_v51 = vpop.permute.xlu1 %4711 }
0x15b6   :  { %4715 = vst.msk [vmem:[#allocation2] sm:$0xff] %vm4714_vm0, %v4712_v51 }
0x15b7   :  { %6144 = shalt.err (!%p6141_p4)
}
0x15b8   :  { %s6145_s0 = scalar_lea.hbm %s7457_s16, 128 }
0x15b9   :  { %p6146_p5 = scmp.ne.s32.totalorder %s7457_s16, %s6145_s0  ;;  %p6149_p6 = scmp.lt.u32.totalorder %s6145_s0, %s7457_s16 }
0x15bb   :  { %p6151_p7 = pnand %p6149_p6, %p6146_p5 }
0x15bd   :  { %6154 = shalt.err (!%p6151_p7)
}
0x15be   :  { %4725 = dma.vmem_to_hbm [thread:$0]  %s4723_s15, 128, %s7457_s16, [#allocation3]  }
0x15bf   :  { %6155 = dma.done.wait [#allocation3], 128  }
0x15c0   :  { %6156 = vsyncadd [#allocation3], 4294967168 }
0x15c1   :  { %4729 = vsyncpa [#allocation3], 1 }

</bundles_post_ra>
